<compile_context>
chip_gen: v7x
topology: tpu7x:2x2x1
jax: 0.10.0
libtpu: 0.0.40
codegen_flags: <defaults>
</compile_context>

<pallas_src>
import functools
import math

import jax
import jax.numpy as jnp
from jax import lax
from jax.experimental import pallas as pl
from jax.experimental.pallas import tpu as pltpu

CH = 32
N_CLASSES = 4
LEAK = 0.01  # nn.LeakyReLU default negative_slope

# (in_ch, out_ch, stride) for the five conv_blocks of `features`.
CONV_CFG = (
    (3, 2 * CH, 1),
    (2 * CH, 2 * CH, 2),
    (2 * CH, 4 * CH, 1),
    (4 * CH, 4 * CH, 2),
    (4 * CH, 8 * CH, 1),
)


def _pick_tile(m, candidates=(256, 128, 64, 32, 16, 8)):
    """Largest tile from `candidates` that divides m (else the full extent)."""
    for c in candidates:
        if m >= c and m % c == 0:
            return c
    return m


def _round_up(x, m):
    return ((x + m - 1) // m) * m


# ---------------------------------------------------------------------------
# Kernel 1: fused (M, K) @ (K, N) + bias [+ LeakyReLU]  (one call per conv layer)
# ---------------------------------------------------------------------------
def _matmul_bias_act_kernel(x_ref, w_ref, b_ref, o_ref, *, leaky):
    # x_ref: (TM, K) bf16 | w_ref: (K, N) bf16 | b_ref: (1, N) f32 | o_ref: (TM, N) f32
    acc = jnp.dot(x_ref[...], w_ref[...], preferred_element_type=jnp.float32)
    acc = acc + b_ref[...]
    if leaky:
        acc = jnp.where(acc >= 0.0, acc, LEAK * acc)
    o_ref[...] = acc.astype(o_ref.dtype)


def _fused_matmul(x_bf16, w_bf16, b_f32, *, leaky):
    M, K = x_bf16.shape
    N = w_bf16.shape[1]
    tm = _pick_tile(M)
    grid = (M // tm,)
    flops = 2 * M * K * N
    bytes_accessed = int(M * K * 2 + K * N * 2 + N * 4 + M * N * 4)
    return pl.pallas_call(
        functools.partial(_matmul_bias_act_kernel, leaky=leaky),
        out_shape=jax.ShapeDtypeStruct((M, N), jnp.float32),
        grid=grid,
        in_specs=[
            pl.BlockSpec((tm, K), lambda i: (i, 0)),   # activations: tiled over M
            pl.BlockSpec((K, N), lambda i: (0, 0)),    # weights: VMEM-resident
            pl.BlockSpec((1, N), lambda i: (0, 0)),    # bias:    VMEM-resident
        ],
        out_specs=pl.BlockSpec((tm, N), lambda i: (i, 0)),
        compiler_params=pltpu.CompilerParams(dimension_semantics=("parallel",)),
        cost_estimate=pl.CostEstimate(flops=flops, transcendentals=0,
                                      bytes_accessed=bytes_accessed),
    )(x_bf16, w_bf16, b_f32)


def _im2col(x, stride):
    """x: (B, H, W, C) -> patches (B*Ho*Wo, 9*C); K ordering = (kh, kw, cin)."""
    B, H, W, C = x.shape
    xp = jnp.pad(x, ((0, 0), (1, 1), (1, 1), (0, 0)))
    Ho = (H - 1) // stride + 1
    Wo = (W - 1) // stride + 1
    cols = []
    for kh in range(3):
        for kw in range(3):
            cols.append(
                lax.slice(
                    xp,
                    (0, kh, kw, 0),
                    (B, kh + (Ho - 1) * stride + 1, kw + (Wo - 1) * stride + 1, C),
                    (1, stride, stride, 1)))
    patches = jnp.stack(cols, axis=3)                    # (B, Ho, Wo, 9, C)
    return patches.reshape(B * Ho * Wo, 9 * C), Ho, Wo


def conv_block_forward(x, w, b, stride):
    """Conv2d(3x3, pad=1, stride) + LeakyReLU. x: NHWC f32, w: HWIO f32."""
    B = x.shape[0]
    cin, cout = w.shape[2], w.shape[3]
    patches, Ho, Wo = _im2col(x, stride)                 # (M, 9*Cin) f32
    w2 = w.reshape(9 * cin, cout)                        # matches patch K ordering
    k = 9 * cin
    k_pad = _round_up(k, 128)                            # lane-align K (zeros: no-op)
    if k_pad != k:
        patches = jnp.pad(patches, ((0, 0), (0, k_pad - k)))
        w2 = jnp.pad(w2, ((0, k_pad - k), (0, 0)))
    out = _fused_matmul(patches.astype(jnp.bfloat16),
                        w2.astype(jnp.bfloat16),
                        b.reshape(1, cout).astype(jnp.float32),
                        leaky=True)
    return out.reshape(B, Ho, Wo, cout)


# ---------------------------------------------------------------------------
# Kernel 2: fused head  (spatial mean -> Linear -> LeakyReLU -> Linear)
# ---------------------------------------------------------------------------
def _head_kernel(f_ref, w1_ref, b1_ref, w2_ref, b2_ref, o_ref):
    hw = f_ref.shape[1]
    pooled = jnp.sum(f_ref[...], axis=1) * (1.0 / hw)            # (TB, C) f32
    h = jnp.dot(pooled.astype(jnp.bfloat16), w1_ref[...],
                preferred_element_type=jnp.float32) + b1_ref[...]
    h = jnp.where(h >= 0.0, h, LEAK * h)
    logits = jnp.dot(h.astype(jnp.bfloat16), w2_ref[...],
                     preferred_element_type=jnp.float32) + b2_ref[...]
    o_ref[...] = logits.astype(o_ref.dtype)


def head_forward(feats, w1, b1, w2, b2):
    B, HW, C = feats.shape
    h1 = w1.shape[1]
    n_out = w2.shape[1]
    tb = _pick_tile(B, candidates=(256, 128, 64, 32, 16, 8, 4, 2))
    grid = (B // tb,)
    flops = 2 * B * (C * h1 + h1 * n_out) + B * HW * C
    bytes_accessed = int(B * HW * C * 4 + C * h1 * 2 + h1 * n_out * 2
                         + (h1 + n_out) * 4 + B * n_out * 4)
    return pl.pallas_call(
        _head_kernel,
        out_shape=jax.ShapeDtypeStruct((B, n_out), jnp.float32),
        grid=grid,
        in_specs=[
            pl.BlockSpec((tb, HW, C), lambda i: (i, 0, 0)),  # features: tiled over batch
            pl.BlockSpec((C, h1), lambda i: (0, 0)),         # weights resident
            pl.BlockSpec((1, h1), lambda i: (0, 0)),
            pl.BlockSpec((h1, n_out), lambda i: (0, 0)),
            pl.BlockSpec((1, n_out), lambda i: (0, 0)),
        ],
        out_specs=pl.BlockSpec((tb, n_out), lambda i: (i, 0)),
        compiler_params=pltpu.CompilerParams(dimension_semantics=("parallel",)),
        cost_estimate=pl.CostEstimate(flops=flops, transcendentals=0,
                                      bytes_accessed=bytes_accessed),
    )(feats, w1.astype(jnp.bfloat16), b1.reshape(1, h1).astype(jnp.float32),
      w2.astype(jnp.bfloat16), b2.reshape(1, n_out).astype(jnp.float32))


# ---------------------------------------------------------------------------
# Full forward
# ---------------------------------------------------------------------------
def classifier_forward(img, params):
    """img: (B, 3, H, W) NCHW float32 (PyTorch layout). Returns (B, n_classes) f32."""
    conv_params, (w1, b1, w2, b2) = params
    x = jnp.transpose(img, (0, 2, 3, 1)).astype(jnp.float32)     # NCHW -> NHWC
    for (w, b), (_, _, stride) in zip(conv_params, CONV_CFG):
        x = conv_block_forward(x, w, b, stride)
    B, H, W, C = x.shape
    feats = x.reshape(B, H * W, C)
    return head_forward(feats, w1, b1, w2, b2)


def init_params(key):
    """Deterministic init mimicking nn.Conv2d/nn.Linear defaults.

    Conv weights stored HWIO (3, 3, Cin, Cout); linear weights (in, out)."""
    ks = jax.random.split(key, 2 * len(CONV_CFG) + 4)
    conv_params = []
    for i, (cin, cout, _) in enumerate(CONV_CFG):
        bound = 1.0 / math.sqrt(cin * 9)
        w = jax.random.uniform(ks[2 * i], (3, 3, cin, cout), jnp.float32, -bound, bound)
        b = jax.random.uniform(ks[2 * i + 1], (cout,), jnp.float32, -bound, bound)
        conv_params.append((w, b))

    def lin(kw, kb, fin, fout):
        bound = 1.0 / math.sqrt(fin)
        w = jax.random.uniform(kw, (fin, fout), jnp.float32, -bound, bound)
        b = jax.random.uniform(kb, (fout,), jnp.float32, -bound, bound)
        return w, b

    # TODO(synk): the PyTorch spec declares last_encode1 = Linear(16*ch, 8*ch), but the
    # pooled features only have 8*ch channels (shape mismatch that would raise in torch);
    # we use in_features = 8*ch so the forward is well-defined and runnable.
    w1, b1 = lin(ks[-4], ks[-3], 8 * CH, 8 * CH)
    w2, b2 = lin(ks[-2], ks[-1], 8 * CH, N_CLASSES)
    return conv_params, (w1, b1, w2, b2)


def reference_forward(img, params):
    """Pure-JAX reference (lax.conv) with the same bf16 operand rounding."""
    conv_params, (w1, b1, w2, b2) = params
    x = jnp.transpose(img, (0, 2, 3, 1)).astype(jnp.float32)
    for (w, b), (_, _, stride) in zip(conv_params, CONV_CFG):
        y = lax.conv_general_dilated(
            x.astype(jnp.bfloat16), w.astype(jnp.bfloat16),
            window_strides=(stride, stride), padding=((1, 1), (1, 1)),
            dimension_numbers=("NHWC", "HWIO", "NHWC"),
            preferred_element_type=jnp.float32)
        y = y + b.reshape(1, 1, 1, -1)
        x = jnp.where(y >= 0.0, y, LEAK * y)
    pooled = jnp.mean(x, axis=(1, 2))
    h = jnp.dot(pooled.astype(jnp.bfloat16), w1.astype(jnp.bfloat16),
                preferred_element_type=jnp.float32) + b1
    h = jnp.where(h >= 0.0, h, LEAK * h)
    return jnp.dot(h.astype(jnp.bfloat16), w2.astype(jnp.bfloat16),
                   preferred_element_type=jnp.float32) + b2


if __name__ == "__main__":
    key = jax.random.PRNGKey(0)
    k_param, k_img = jax.random.split(key)
    params = init_params(k_param)

    batch, height, width = 2, 16, 16
    img = jax.random.normal(k_img, (batch, 3, height, width), dtype=jnp.float32)

    fwd = jax.jit(classifier_forward)
    logits = jax.block_until_ready(fwd(img, params))

    ref = reference_forward(img, params)
    assert logits.shape == (batch, N_CLASSES)
    assert jnp.allclose(logits, ref, atol=1e-2, rtol=1e-2), (logits, ref)

    print("KERNEL_OK")
</pallas_src>

<mosaic_0001>
module attributes {stable_mosaic.version = 11 : i64} {
  func.func @_matmul_bias_act_kernel(%arg0: i32, %arg1: memref<256x128xbf16, #tpu.memory_space<vmem>>, %arg2: memref<128x64xbf16, #tpu.memory_space<vmem>>, %arg3: memref<1x64xf32, #tpu.memory_space<vmem>>, %arg4: memref<256x64xf32, #tpu.memory_space<vmem>>) attributes {dimension_semantics = [#tpu.dimension_semantics<parallel>], iteration_bounds = array<i64: 2>, scalar_prefetch = 0 : i64, scratch_operands = 0 : i64, tpu.core_type = #tpu.core_type<tc>, window_params = [{transform_indices = @transform_0, window_bounds = array<i64: 256, 128>}, {pipeline_mode = #tpu.pipeline_mode<synchronous>, transform_indices = @transform_1, window_bounds = array<i64: 128, 64>}, {pipeline_mode = #tpu.pipeline_mode<synchronous>, transform_indices = @transform_2, window_bounds = array<i64: 1, 64>}, {transform_indices = @transform_3, window_bounds = array<i64: 256, 64>}]} {
    %c0 = arith.constant 0 : index
    %c0_0 = arith.constant 0 : index
    %0 = vector.load %arg1[%c0, %c0_0] : memref<256x128xbf16, #tpu.memory_space<vmem>>, vector<256x128xbf16>
    %c0_1 = arith.constant 0 : index
    %c0_2 = arith.constant 0 : index
    %1 = vector.load %arg2[%c0_1, %c0_2] : memref<128x64xbf16, #tpu.memory_space<vmem>>, vector<128x64xbf16>
    %cst = arith.constant dense<0.000000e+00> : vector<256x64xf32>
    %2 = tpu.matmul %0, %1, %cst {dimension_numbers = #tpu.dot_dimension_numbers<[1], [0], [0], [1], [0, 0, 1, 1], [], []>} : vector<256x128xbf16>, vector<128x64xbf16>, vector<256x64xf32> -> vector<256x64xf32>
    %c0_3 = arith.constant 0 : index
    %c0_4 = arith.constant 0 : index
    %3 = vector.load %arg3[%c0_3, %c0_4] : memref<1x64xf32, #tpu.memory_space<vmem>>, vector<1x64xf32>
    %4 = vector.broadcast %3 : vector<1x64xf32> to vector<256x64xf32>
    %5 = arith.addf %2, %4 : vector<256x64xf32>
    %cst_5 = arith.constant 0.000000e+00 : f32
    %6 = vector.broadcast %cst_5 : f32 to vector<256x64xf32>
    %7 = arith.cmpf oge, %5, %6 : vector<256x64xf32>
    %cst_6 = arith.constant 0.00999999977 : f32
    %8 = vector.broadcast %cst_6 : f32 to vector<256x64xf32>
    %9 = arith.mulf %8, %5 : vector<256x64xf32>
    %10 = arith.select %7, %5, %9 : vector<256x64xi1>, vector<256x64xf32>
    %c0_7 = arith.constant 0 : index
    %c0_8 = arith.constant 0 : index
    %11 = vector.load %arg4[%c0_7, %c0_8] : memref<256x64xf32, #tpu.memory_space<vmem>>, vector<256x64xf32>
    tpu.vector_store %arg4[%c0_7, %c0_8], %10 {strides = array<i32>} : memref<256x64xf32, #tpu.memory_space<vmem>>, vector<256x64xf32>,
    return
  }
  func.func @transform_0(%arg0: i32) -> (i32, i32) {
    %c0_i32 = arith.constant 0 : i32
    %c0_i32_0 = arith.constant 0 : i32
    return %arg0, %c0_i32 : i32, i32
  }
  func.func @transform_1(%arg0: i32) -> (i32, i32) {
    %c0_i32 = arith.constant 0 : i32
    %c0_i32_0 = arith.constant 0 : i32
    %c0_i32_1 = arith.constant 0 : i32
    return %c0_i32, %c0_i32_0 : i32, i32
  }
  func.func @transform_2(%arg0: i32) -> (i32, i32) {
    %c0_i32 = arith.constant 0 : i32
    %c0_i32_0 = arith.constant 0 : i32
    %c0_i32_1 = arith.constant 0 : i32
    return %c0_i32, %c0_i32_0 : i32, i32
  }
  func.func @transform_3(%arg0: i32) -> (i32, i32) {
    %c0_i32 = arith.constant 0 : i32
    %c0_i32_0 = arith.constant 0 : i32
    return %arg0, %c0_i32 : i32, i32
  }
}

module attributes {stable_mosaic.version = 11 : i64} {
  func.func @_matmul_bias_act_kernel(%arg0: i32, %arg1: memref<128x640xbf16, #tpu.memory_space<vmem>>, %arg2: memref<640x64xbf16, #tpu.memory_space<vmem>>, %arg3: memref<1x64xf32, #tpu.memory_space<vmem>>, %arg4: memref<128x64xf32, #tpu.memory_space<vmem>>) attributes {dimension_semantics = [#tpu.dimension_semantics<parallel>], iteration_bounds = array<i64: 1>, scalar_prefetch = 0 : i64, scratch_operands = 0 : i64, tpu.core_type = #tpu.core_type<tc>, window_params = [{transform_indices = @transform_0, window_bounds = array<i64: 128, 640>}, {pipeline_mode = #tpu.pipeline_mode<synchronous>, transform_indices = @transform_1, window_bounds = array<i64: 640, 64>}, {pipeline_mode = #tpu.pipeline_mode<synchronous>, transform_indices = @transform_2, window_bounds = array<i64: 1, 64>}, {transform_indices = @transform_3, window_bounds = array<i64: 128, 64>}]} {
    %c0 = arith.constant 0 : index
    %c0_0 = arith.constant 0 : index
    %0 = vector.load %arg1[%c0, %c0_0] : memref<128x640xbf16, #tpu.memory_space<vmem>>, vector<128x640xbf16>
    %c0_1 = arith.constant 0 : index
    %c0_2 = arith.constant 0 : index
    %1 = vector.load %arg2[%c0_1, %c0_2] : memref<640x64xbf16, #tpu.memory_space<vmem>>, vector<640x64xbf16>
    %cst = arith.constant dense<0.000000e+00> : vector<128x64xf32>
    %2 = tpu.matmul %0, %1, %cst {dimension_numbers = #tpu.dot_dimension_numbers<[1], [0], [0], [1], [0, 0, 1, 1], [], []>} : vector<128x640xbf16>, vector<640x64xbf16>, vector<128x64xf32> -> vector<128x64xf32>
    %c0_3 = arith.constant 0 : index
    %c0_4 = arith.constant 0 : index
    %3 = vector.load %arg3[%c0_3, %c0_4] : memref<1x64xf32, #tpu.memory_space<vmem>>, vector<1x64xf32>
    %4 = vector.broadcast %3 : vector<1x64xf32> to vector<128x64xf32>
    %5 = arith.addf %2, %4 : vector<128x64xf32>
    %cst_5 = arith.constant 0.000000e+00 : f32
    %6 = vector.broadcast %cst_5 : f32 to vector<128x64xf32>
    %7 = arith.cmpf oge, %5, %6 : vector<128x64xf32>
    %cst_6 = arith.constant 0.00999999977 : f32
    %8 = vector.broadcast %cst_6 : f32 to vector<128x64xf32>
    %9 = arith.mulf %8, %5 : vector<128x64xf32>
    %10 = arith.select %7, %5, %9 : vector<128x64xi1>, vector<128x64xf32>
    %c0_7 = arith.constant 0 : index
    %c0_8 = arith.constant 0 : index
    %11 = vector.load %arg4[%c0_7, %c0_8] : memref<128x64xf32, #tpu.memory_space<vmem>>, vector<128x64xf32>
    tpu.vector_store %arg4[%c0_7, %c0_8], %10 {strides = array<i32>} : memref<128x64xf32, #tpu.memory_space<vmem>>, vector<128x64xf32>,
    return
  }
  func.func @transform_0(%arg0: i32) -> (i32, i32) {
    %c0_i32 = arith.constant 0 : i32
    %c0_i32_0 = arith.constant 0 : i32
    return %arg0, %c0_i32 : i32, i32
  }
  func.func @transform_1(%arg0: i32) -> (i32, i32) {
    %c0_i32 = arith.constant 0 : i32
    %c0_i32_0 = arith.constant 0 : i32
    %c0_i32_1 = arith.constant 0 : i32
    return %c0_i32, %c0_i32_0 : i32, i32
  }
  func.func @transform_2(%arg0: i32) -> (i32, i32) {
    %c0_i32 = arith.constant 0 : i32
    %c0_i32_0 = arith.constant 0 : i32
    %c0_i32_1 = arith.constant 0 : i32
    return %c0_i32, %c0_i32_0 : i32, i32
  }
  func.func @transform_3(%arg0: i32) -> (i32, i32) {
    %c0_i32 = arith.constant 0 : i32
    %c0_i32_0 = arith.constant 0 : i32
    return %arg0, %c0_i32 : i32, i32
  }
}

module attributes {stable_mosaic.version = 11 : i64} {
  func.func @_matmul_bias_act_kernel(%arg0: i32, %arg1: memref<128x640xbf16, #tpu.memory_space<vmem>>, %arg2: memref<640x128xbf16, #tpu.memory_space<vmem>>, %arg3: memref<1x128xf32, #tpu.memory_space<vmem>>, %arg4: memref<128x128xf32, #tpu.memory_space<vmem>>) attributes {dimension_semantics = [#tpu.dimension_semantics<parallel>], iteration_bounds = array<i64: 1>, scalar_prefetch = 0 : i64, scratch_operands = 0 : i64, tpu.core_type = #tpu.core_type<tc>, window_params = [{transform_indices = @transform_0, window_bounds = array<i64: 128, 640>}, {pipeline_mode = #tpu.pipeline_mode<synchronous>, transform_indices = @transform_1, window_bounds = array<i64: 640, 128>}, {pipeline_mode = #tpu.pipeline_mode<synchronous>, transform_indices = @transform_2, window_bounds = array<i64: 1, 128>}, {transform_indices = @transform_3, window_bounds = array<i64: 128, 128>}]} {
    %c0 = arith.constant 0 : index
    %c0_0 = arith.constant 0 : index
    %0 = vector.load %arg1[%c0, %c0_0] : memref<128x640xbf16, #tpu.memory_space<vmem>>, vector<128x640xbf16>
    %c0_1 = arith.constant 0 : index
    %c0_2 = arith.constant 0 : index
    %1 = vector.load %arg2[%c0_1, %c0_2] : memref<640x128xbf16, #tpu.memory_space<vmem>>, vector<640x128xbf16>
    %cst = arith.constant dense<0.000000e+00> : vector<128x128xf32>
    %2 = tpu.matmul %0, %1, %cst {dimension_numbers = #tpu.dot_dimension_numbers<[1], [0], [0], [1], [0, 0, 1, 1], [], []>} : vector<128x640xbf16>, vector<640x128xbf16>, vector<128x128xf32> -> vector<128x128xf32>
    %c0_3 = arith.constant 0 : index
    %c0_4 = arith.constant 0 : index
    %3 = vector.load %arg3[%c0_3, %c0_4] : memref<1x128xf32, #tpu.memory_space<vmem>>, vector<1x128xf32>
    %4 = vector.broadcast %3 : vector<1x128xf32> to vector<128x128xf32>
    %5 = arith.addf %2, %4 : vector<128x128xf32>
    %cst_5 = arith.constant 0.000000e+00 : f32
    %6 = vector.broadcast %cst_5 : f32 to vector<128x128xf32>
    %7 = arith.cmpf oge, %5, %6 : vector<128x128xf32>
    %cst_6 = arith.constant 0.00999999977 : f32
    %8 = vector.broadcast %cst_6 : f32 to vector<128x128xf32>
    %9 = arith.mulf %8, %5 : vector<128x128xf32>
    %10 = arith.select %7, %5, %9 : vector<128x128xi1>, vector<128x128xf32>
    %c0_7 = arith.constant 0 : index
    %c0_8 = arith.constant 0 : index
    %11 = vector.load %arg4[%c0_7, %c0_8] : memref<128x128xf32, #tpu.memory_space<vmem>>, vector<128x128xf32>
    tpu.vector_store %arg4[%c0_7, %c0_8], %10 {strides = array<i32>} : memref<128x128xf32, #tpu.memory_space<vmem>>, vector<128x128xf32>,
    return
  }
  func.func @transform_0(%arg0: i32) -> (i32, i32) {
    %c0_i32 = arith.constant 0 : i32
    %c0_i32_0 = arith.constant 0 : i32
    return %arg0, %c0_i32 : i32, i32
  }
  func.func @transform_1(%arg0: i32) -> (i32, i32) {
    %c0_i32 = arith.constant 0 : i32
    %c0_i32_0 = arith.constant 0 : i32
    %c0_i32_1 = arith.constant 0 : i32
    return %c0_i32, %c0_i32_0 : i32, i32
  }
  func.func @transform_2(%arg0: i32) -> (i32, i32) {
    %c0_i32 = arith.constant 0 : i32
    %c0_i32_0 = arith.constant 0 : i32
    %c0_i32_1 = arith.constant 0 : i32
    return %c0_i32, %c0_i32_0 : i32, i32
  }
  func.func @transform_3(%arg0: i32) -> (i32, i32) {
    %c0_i32 = arith.constant 0 : i32
    %c0_i32_0 = arith.constant 0 : i32
    return %arg0, %c0_i32 : i32, i32
  }
}

module attributes {stable_mosaic.version = 11 : i64} {
  func.func @_matmul_bias_act_kernel(%arg0: i32, %arg1: memref<32x1152xbf16, #tpu.memory_space<vmem>>, %arg2: memref<1152x128xbf16, #tpu.memory_space<vmem>>, %arg3: memref<1x128xf32, #tpu.memory_space<vmem>>, %arg4: memref<32x128xf32, #tpu.memory_space<vmem>>) attributes {dimension_semantics = [#tpu.dimension_semantics<parallel>], iteration_bounds = array<i64: 1>, scalar_prefetch = 0 : i64, scratch_operands = 0 : i64, tpu.core_type = #tpu.core_type<tc>, window_params = [{transform_indices = @transform_0, window_bounds = array<i64: 32, 1152>}, {pipeline_mode = #tpu.pipeline_mode<synchronous>, transform_indices = @transform_1, window_bounds = array<i64: 1152, 128>}, {pipeline_mode = #tpu.pipeline_mode<synchronous>, transform_indices = @transform_2, window_bounds = array<i64: 1, 128>}, {transform_indices = @transform_3, window_bounds = array<i64: 32, 128>}]} {
    %c0 = arith.constant 0 : index
    %c0_0 = arith.constant 0 : index
    %0 = vector.load %arg1[%c0, %c0_0] : memref<32x1152xbf16, #tpu.memory_space<vmem>>, vector<32x1152xbf16>
    %c0_1 = arith.constant 0 : index
    %c0_2 = arith.constant 0 : index
    %1 = vector.load %arg2[%c0_1, %c0_2] : memref<1152x128xbf16, #tpu.memory_space<vmem>>, vector<1152x128xbf16>
    %cst = arith.constant dense<0.000000e+00> : vector<32x128xf32>
    %2 = tpu.matmul %0, %1, %cst {dimension_numbers = #tpu.dot_dimension_numbers<[1], [0], [0], [1], [0, 0, 1, 1], [], []>} : vector<32x1152xbf16>, vector<1152x128xbf16>, vector<32x128xf32> -> vector<32x128xf32>
    %c0_3 = arith.constant 0 : index
    %c0_4 = arith.constant 0 : index
    %3 = vector.load %arg3[%c0_3, %c0_4] : memref<1x128xf32, #tpu.memory_space<vmem>>, vector<1x128xf32>
    %4 = vector.broadcast %3 : vector<1x128xf32> to vector<32x128xf32>
    %5 = arith.addf %2, %4 : vector<32x128xf32>
    %cst_5 = arith.constant 0.000000e+00 : f32
    %6 = vector.broadcast %cst_5 : f32 to vector<32x128xf32>
    %7 = arith.cmpf oge, %5, %6 : vector<32x128xf32>
    %cst_6 = arith.constant 0.00999999977 : f32
    %8 = vector.broadcast %cst_6 : f32 to vector<32x128xf32>
    %9 = arith.mulf %8, %5 : vector<32x128xf32>
    %10 = arith.select %7, %5, %9 : vector<32x128xi1>, vector<32x128xf32>
    %c0_7 = arith.constant 0 : index
    %c0_8 = arith.constant 0 : index
    %11 = vector.load %arg4[%c0_7, %c0_8] : memref<32x128xf32, #tpu.memory_space<vmem>>, vector<32x128xf32>
    tpu.vector_store %arg4[%c0_7, %c0_8], %10 {strides = array<i32>} : memref<32x128xf32, #tpu.memory_space<vmem>>, vector<32x128xf32>,
    return
  }
  func.func @transform_0(%arg0: i32) -> (i32, i32) {
    %c0_i32 = arith.constant 0 : i32
    %c0_i32_0 = arith.constant 0 : i32
    return %arg0, %c0_i32 : i32, i32
  }
  func.func @transform_1(%arg0: i32) -> (i32, i32) {
    %c0_i32 = arith.constant 0 : i32
    %c0_i32_0 = arith.constant 0 : i32
    %c0_i32_1 = arith.constant 0 : i32
    return %c0_i32, %c0_i32_0 : i32, i32
  }
  func.func @transform_2(%arg0: i32) -> (i32, i32) {
    %c0_i32 = arith.constant 0 : i32
    %c0_i32_0 = arith.constant 0 : i32
    %c0_i32_1 = arith.constant 0 : i32
    return %c0_i32, %c0_i32_0 : i32, i32
  }
  func.func @transform_3(%arg0: i32) -> (i32, i32) {
    %c0_i32 = arith.constant 0 : i32
    %c0_i32_0 = arith.constant 0 : i32
    return %arg0, %c0_i32 : i32, i32
  }
}

module attributes {stable_mosaic.version = 11 : i64} {
  func.func @_matmul_bias_act_kernel(%arg0: i32, %arg1: memref<32x1152xbf16, #tpu.memory_space<vmem>>, %arg2: memref<1152x256xbf16, #tpu.memory_space<vmem>>, %arg3: memref<1x256xf32, #tpu.memory_space<vmem>>, %arg4: memref<32x256xf32, #tpu.memory_space<vmem>>) attributes {dimension_semantics = [#tpu.dimension_semantics<parallel>], iteration_bounds = array<i64: 1>, scalar_prefetch = 0 : i64, scratch_operands = 0 : i64, tpu.core_type = #tpu.core_type<tc>, window_params = [{transform_indices = @transform_0, window_bounds = array<i64: 32, 1152>}, {pipeline_mode = #tpu.pipeline_mode<synchronous>, transform_indices = @transform_1, window_bounds = array<i64: 1152, 256>}, {pipeline_mode = #tpu.pipeline_mode<synchronous>, transform_indices = @transform_2, window_bounds = array<i64: 1, 256>}, {transform_indices = @transform_3, window_bounds = array<i64: 32, 256>}]} {
    %c0 = arith.constant 0 : index
    %c0_0 = arith.constant 0 : index
    %0 = vector.load %arg1[%c0, %c0_0] : memref<32x1152xbf16, #tpu.memory_space<vmem>>, vector<32x1152xbf16>
    %c0_1 = arith.constant 0 : index
    %c0_2 = arith.constant 0 : index
    %1 = vector.load %arg2[%c0_1, %c0_2] : memref<1152x256xbf16, #tpu.memory_space<vmem>>, vector<1152x256xbf16>
    %cst = arith.constant dense<0.000000e+00> : vector<32x256xf32>
    %2 = tpu.matmul %0, %1, %cst {dimension_numbers = #tpu.dot_dimension_numbers<[1], [0], [0], [1], [0, 0, 1, 1], [], []>} : vector<32x1152xbf16>, vector<1152x256xbf16>, vector<32x256xf32> -> vector<32x256xf32>
    %c0_3 = arith.constant 0 : index
    %c0_4 = arith.constant 0 : index
    %3 = vector.load %arg3[%c0_3, %c0_4] : memref<1x256xf32, #tpu.memory_space<vmem>>, vector<1x256xf32>
    %4 = vector.broadcast %3 : vector<1x256xf32> to vector<32x256xf32>
    %5 = arith.addf %2, %4 : vector<32x256xf32>
    %cst_5 = arith.constant 0.000000e+00 : f32
    %6 = vector.broadcast %cst_5 : f32 to vector<32x256xf32>
    %7 = arith.cmpf oge, %5, %6 : vector<32x256xf32>
    %cst_6 = arith.constant 0.00999999977 : f32
    %8 = vector.broadcast %cst_6 : f32 to vector<32x256xf32>
    %9 = arith.mulf %8, %5 : vector<32x256xf32>
    %10 = arith.select %7, %5, %9 : vector<32x256xi1>, vector<32x256xf32>
    %c0_7 = arith.constant 0 : index
    %c0_8 = arith.constant 0 : index
    %11 = vector.load %arg4[%c0_7, %c0_8] : memref<32x256xf32, #tpu.memory_space<vmem>>, vector<32x256xf32>
    tpu.vector_store %arg4[%c0_7, %c0_8], %10 {strides = array<i32>} : memref<32x256xf32, #tpu.memory_space<vmem>>, vector<32x256xf32>,
    return
  }
  func.func @transform_0(%arg0: i32) -> (i32, i32) {
    %c0_i32 = arith.constant 0 : i32
    %c0_i32_0 = arith.constant 0 : i32
    return %arg0, %c0_i32 : i32, i32
  }
  func.func @transform_1(%arg0: i32) -> (i32, i32) {
    %c0_i32 = arith.constant 0 : i32
    %c0_i32_0 = arith.constant 0 : i32
    %c0_i32_1 = arith.constant 0 : i32
    return %c0_i32, %c0_i32_0 : i32, i32
  }
  func.func @transform_2(%arg0: i32) -> (i32, i32) {
    %c0_i32 = arith.constant 0 : i32
    %c0_i32_0 = arith.constant 0 : i32
    %c0_i32_1 = arith.constant 0 : i32
    return %c0_i32, %c0_i32_0 : i32, i32
  }
  func.func @transform_3(%arg0: i32) -> (i32, i32) {
    %c0_i32 = arith.constant 0 : i32
    %c0_i32_0 = arith.constant 0 : i32
    return %arg0, %c0_i32 : i32, i32
  }
}

module attributes {stable_mosaic.version = 11 : i64} {
  func.func @_head_kernel(%arg0: i32, %arg1: memref<2x16x256xf32, #tpu.memory_space<vmem>>, %arg2: memref<256x256xbf16, #tpu.memory_space<vmem>>, %arg3: memref<1x256xf32, #tpu.memory_space<vmem>>, %arg4: memref<256x4xbf16, #tpu.memory_space<vmem>>, %arg5: memref<1x4xf32, #tpu.memory_space<vmem>>, %arg6: memref<2x4xf32, #tpu.memory_space<vmem>>) attributes {dimension_semantics = [#tpu.dimension_semantics<parallel>], iteration_bounds = array<i64: 1>, scalar_prefetch = 0 : i64, scratch_operands = 0 : i64, tpu.core_type = #tpu.core_type<tc>, window_params = [{transform_indices = @transform_0, window_bounds = array<i64: 2, 16, 256>}, {pipeline_mode = #tpu.pipeline_mode<synchronous>, transform_indices = @transform_1, window_bounds = array<i64: 256, 256>}, {pipeline_mode = #tpu.pipeline_mode<synchronous>, transform_indices = @transform_2, window_bounds = array<i64: 1, 256>}, {pipeline_mode = #tpu.pipeline_mode<synchronous>, transform_indices = @transform_3, window_bounds = array<i64: 256, 4>}, {pipeline_mode = #tpu.pipeline_mode<synchronous>, transform_indices = @transform_4, window_bounds = array<i64: 1, 4>}, {transform_indices = @transform_5, window_bounds = array<i64: 2, 4>}]} {
    %c0 = arith.constant 0 : index
    %c0_0 = arith.constant 0 : index
    %c0_1 = arith.constant 0 : index
    %0 = vector.load %arg1[%c0, %c0_0, %c0_1] : memref<2x16x256xf32, #tpu.memory_space<vmem>>, vector<2x16x256xf32>
    %cst = arith.constant dense<0.000000e+00> : vector<2x256xf32>
    %1 = vector.multi_reduction <add>, %0, %cst [1] : vector<2x16x256xf32> to vector<2x256xf32>
    %cst_2 = arith.constant 6.250000e-02 : f32
    %2 = vector.broadcast %cst_2 : f32 to vector<2x256xf32>
    %3 = arith.mulf %1, %2 : vector<2x256xf32>
    %4 = arith.truncf %3 : vector<2x256xf32> to vector<2x256xbf16>
    %c0_3 = arith.constant 0 : index
    %c0_4 = arith.constant 0 : index
    %5 = vector.load %arg2[%c0_3, %c0_4] : memref<256x256xbf16, #tpu.memory_space<vmem>>, vector<256x256xbf16>
    %cst_5 = arith.constant dense<0.000000e+00> : vector<2x256xf32>
    %6 = tpu.matmul %4, %5, %cst_5 {dimension_numbers = #tpu.dot_dimension_numbers<[1], [0], [0], [1], [0, 0, 1, 1], [], []>} : vector<2x256xbf16>, vector<256x256xbf16>, vector<2x256xf32> -> vector<2x256xf32>
    %c0_6 = arith.constant 0 : index
    %c0_7 = arith.constant 0 : index
    %7 = vector.load %arg3[%c0_6, %c0_7] : memref<1x256xf32, #tpu.memory_space<vmem>>, vector<1x256xf32>
    %8 = vector.broadcast %7 : vector<1x256xf32> to vector<2x256xf32>
    %9 = arith.addf %6, %8 : vector<2x256xf32>
    %cst_8 = arith.constant 0.000000e+00 : f32
    %10 = vector.broadcast %cst_8 : f32 to vector<2x256xf32>
    %11 = arith.cmpf oge, %9, %10 : vector<2x256xf32>
    %cst_9 = arith.constant 0.00999999977 : f32
    %12 = vector.broadcast %cst_9 : f32 to vector<2x256xf32>
    %13 = arith.mulf %12, %9 : vector<2x256xf32>
    %14 = arith.select %11, %9, %13 : vector<2x256xi1>, vector<2x256xf32>
    %15 = arith.truncf %14 : vector<2x256xf32> to vector<2x256xbf16>
    %c0_10 = arith.constant 0 : index
    %c0_11 = arith.constant 0 : index
    %16 = vector.load %arg4[%c0_10, %c0_11] : memref<256x4xbf16, #tpu.memory_space<vmem>>, vector<256x4xbf16>
    %cst_12 = arith.constant dense<0.000000e+00> : vector<2x4xf32>
    %17 = tpu.matmul %15, %16, %cst_12 {dimension_numbers = #tpu.dot_dimension_numbers<[1], [0], [0], [1], [0, 0, 1, 1], [], []>} : vector<2x256xbf16>, vector<256x4xbf16>, vector<2x4xf32> -> vector<2x4xf32>
    %c0_13 = arith.constant 0 : index
    %c0_14 = arith.constant 0 : index
    %18 = vector.load %arg5[%c0_13, %c0_14] : memref<1x4xf32, #tpu.memory_space<vmem>>, vector<1x4xf32>
    %19 = vector.broadcast %18 : vector<1x4xf32> to vector<2x4xf32>
    %20 = arith.addf %17, %19 : vector<2x4xf32>
    %c0_15 = arith.constant 0 : index
    %c0_16 = arith.constant 0 : index
    %21 = vector.load %arg6[%c0_15, %c0_16] : memref<2x4xf32, #tpu.memory_space<vmem>>, vector<2x4xf32>
    tpu.vector_store %arg6[%c0_15, %c0_16], %20 {strides = array<i32>} : memref<2x4xf32, #tpu.memory_space<vmem>>, vector<2x4xf32>,
    return
  }
  func.func @transform_0(%arg0: i32) -> (i32, i32, i32) {
    %c0_i32 = arith.constant 0 : i32
    %c0_i32_0 = arith.constant 0 : i32
    %c0_i32_1 = arith.constant 0 : i32
    return %arg0, %c0_i32, %c0_i32_0 : i32, i32, i32
  }
  func.func @transform_1(%arg0: i32) -> (i32, i32) {
    %c0_i32 = arith.constant 0 : i32
    %c0_i32_0 = arith.constant 0 : i32
    %c0_i32_1 = arith.constant 0 : i32
    return %c0_i32, %c0_i32_0 : i32, i32
  }
  func.func @transform_2(%arg0: i32) -> (i32, i32) {
    %c0_i32 = arith.constant 0 : i32
    %c0_i32_0 = arith.constant 0 : i32
    %c0_i32_1 = arith.constant 0 : i32
    return %c0_i32, %c0_i32_0 : i32, i32
  }
  func.func @transform_3(%arg0: i32) -> (i32, i32) {
    %c0_i32 = arith.constant 0 : i32
    %c0_i32_0 = arith.constant 0 : i32
    %c0_i32_1 = arith.constant 0 : i32
    return %c0_i32, %c0_i32_0 : i32, i32
  }
  func.func @transform_4(%arg0: i32) -> (i32, i32) {
    %c0_i32 = arith.constant 0 : i32
    %c0_i32_0 = arith.constant 0 : i32
    %c0_i32_1 = arith.constant 0 : i32
    return %c0_i32, %c0_i32_0 : i32, i32
  }
  func.func @transform_5(%arg0: i32) -> (i32, i32) {
    %c0_i32 = arith.constant 0 : i32
    %c0_i32_0 = arith.constant 0 : i32
    return %arg0, %c0_i32 : i32, i32
  }
}

</mosaic_0001>

<bundles_post_ra>
// kernel: classifier_forward.6
= control target key start
LH: loop header
LB: loop body
LE: loop exit
PB: predicated region body
PF: predicated region fallthrough
CT: control target
= control target key end

     0   :  { %s904_s12 = smov 0   ;;  %s1070_s0 = inlined_call_operand.vmem [shape: bf16[512,128], index: 0, kind: input, shape index: {}]   ;;  %s1071_s1 = inlined_call_operand.vmem [shape: bf16[128,64], index: 1, kind: input, shape index: {}]   ;;  %s1072_s2 = inlined_call_operand.vmem [shape: f32[1,64], index: 2, kind: input, shape index: {}]   ;;  %s1073_s3 = inlined_call_operand.vmem [shape: f32[512,64], index: 3, kind: output, shape index: {}]  }
   0x1 LB: > { %s720_s13 = sadd.s32 4294967295, %s882_s12   ;;  %p724_p0 = scmp.ge.s32.totalorder %s882_s12, 1  ;;  %s882_s12 = sphi %s904_s12, %s13_s12  }
   0x2   : > { %p138_p1 = scmp.lt.s32.totalorder %s882_s12, 3 }
   0x4   : > { %p139_p2 = pnand %p724_p0, %p138_p1 }
   0x5   : > { %v852_v0 = vld [vmem:[%s1071_s1] sm:$0xff] (!%p139_p2)   ;;  %s725_s16 = sshll.u32 (!%p139_p2), %s720_s13, 5  ;;  %v853_v1 = vld [vmem:[%s1071_s1 + $0x8] sm:$0xff] (!%p139_p2)   ;;  %v854_v2 = vld [vmem:[%s1071_s1 + $0x10] sm:$0xff] (!%p139_p2)   ;;  %vm631_vm0 = vcmask (!%p139_p2), 523264  }
   0x6   : > { %142 = sbr.rel (%p139_p2) target bundleno = 287 (0x11f), region = 32  ;;  %p163_p3 = scmp.lt.s32.totalorder (!%p139_p2), %s725_s16, 63  ;;  %780 = vmatprep.subr.bf16.mxu0 (!%p139_p2), %v852_v0  ;;  %828 = vmatprep.subr.bf16.mxu1 (!%p139_p2), %v852_v0  ;;  %v855_v3 = vld [vmem:[%s1071_s1 + $0x18] sm:$0xff] (!%p139_p2)   ;;  %v856_v6 = vld [vmem:[%s1071_s1 + $0x20] sm:$0xff] (!%p139_p2)   ;;  %v857_v7 = vld [vmem:[%s1071_s1 + $0x28] sm:$0xff] (!%p139_p2)  }
   0x7   : > { %781 = vmatpush3.bf16.msra.mxu0 (!%p139_p2), %v852_v0  ;;  %836 = vmatpush3.bf16.msra.mxu1 (!%p139_p2), %v852_v0  ;;  %v858_v8 = vld [vmem:[%s1071_s1 + $0x30] sm:$0xff] (!%p139_p2)   ;;  %v859_v9 = vld [vmem:[%s1071_s1 + $0x38] sm:$0xff] (!%p139_p2)   ;;  %v963_v24 = vld [vmem:[%s1072_s2] ss:$0 sm:$0xff] (!%p139_p2) }
   0x8   : > { %782 = vmatprep.subr.bf16.mxu0 (!%p139_p2), %v853_v1  ;;  %829 = vmatprep.subr.bf16.mxu1 (!%p139_p2), %v853_v1 }
   0xb   : > { %783 = vmatpush3.bf16.msra.mxu0 (!%p139_p2), %v853_v1  ;;  %837 = vmatpush3.bf16.msra.mxu1 (!%p139_p2), %v853_v1 }
   0xc   : > { %784 = vmatprep.subr.bf16.mxu0 (!%p139_p2), %v854_v2  ;;  %830 = vmatprep.subr.bf16.mxu1 (!%p139_p2), %v854_v2 }
   0xd   : > { %s1075_s16 = smov (!%p163_p3, %s725_s16), 63 }
   0xe   : > { %s726_s21 = sshll.u32 %s1075_s16, 2  ;;  %s728_s10 = sshll.u32 %s1075_s16, 3 }
   0xf   : > { %s927_s24 = scalar_lea.vmem %s1070_s0, %s726_s21  ;;  %785 = vmatpush3.bf16.msra.mxu0 %v854_v2  ;;  %838 = vmatpush3.bf16.msra.mxu1 %v854_v2  ;;  %s973_s14 = scalar_lea.vmem %s1073_s3, %s728_s10 }
  0x10   : > { %v860_v4 = vld [vmem:[%s927_s24] sm:$0xff]   ;;  %786 = vmatprep.subr.bf16.mxu0 %v855_v3  ;;  %831 = vmatprep.subr.bf16.mxu1 %v855_v3  ;;  %v862_v10 = vld [vmem:[%s927_s24 + $0x8] sm:$0xff]   ;;  %v864_v12 = vld [vmem:[%s927_s24 + $0x10] sm:$0xff]  }
  0x11   : > { %v861_v5 = vld [vmem:[%s927_s24 + $0x40] sm:$0xff]   ;;  %796 = vmatprep.mubr.bf16.mxu0 %v860_v4  ;;  %v863_v11 = vld [vmem:[%s927_s24 + $0x48] sm:$0xff]   ;;  %v865_v13 = vld [vmem:[%s927_s24 + $0x50] sm:$0xff]  }
  0x12   : > { %812 = vmatprep.mubr.bf16.mxu1 %v861_v5  ;;  %v866_v14 = vld [vmem:[%s927_s24 + $0x18] sm:$0xff]   ;;  %v868_v16 = vld [vmem:[%s927_s24 + $0x20] sm:$0xff]   ;;  %v870_v18 = vld [vmem:[%s927_s24 + $0x28] sm:$0xff]  }
  0x13   : > { %787 = vmatpush3.bf16.msra.mxu0 %v855_v3  ;;  %839 = vmatpush3.bf16.msra.mxu1 %v855_v3  ;;  %v867_v15 = vld [vmem:[%s927_s24 + $0x58] sm:$0xff]   ;;  %v869_v17 = vld [vmem:[%s927_s24 + $0x60] sm:$0xff]   ;;  %v871_v19 = vld [vmem:[%s927_s24 + $0x68] sm:$0xff]  }
  0x14   : > { %788 = vmatprep.subr.bf16.mxu0 %v856_v6  ;;  %832 = vmatprep.subr.bf16.mxu1 %v856_v6  ;;  %v872_v20 = vld [vmem:[%s927_s24 + $0x30] sm:$0xff]   ;;  %v874_v22 = vld [vmem:[%s927_s24 + $0x38] sm:$0xff]  }
  0x15   : > { %v873_v21 = vld [vmem:[%s927_s24 + $0x70] sm:$0xff]   ;;  %v875_v23 = vld [vmem:[%s927_s24 + $0x78] sm:$0xff]  }
  0x17   : > { %789 = vmatpush3.bf16.msra.mxu0 %v856_v6  ;;  %840 = vmatpush3.bf16.msra.mxu1 %v856_v6 }
  0x18   : > { %790 = vmatprep.subr.bf16.mxu0 %v857_v7  ;;  %833 = vmatprep.subr.bf16.mxu1 %v857_v7 }
  0x1b   : > { %791 = vmatpush3.bf16.msra.mxu0 %v857_v7  ;;  %841 = vmatpush3.bf16.msra.mxu1 %v857_v7 }
  0x1c   : > { %792 = vmatprep.subr.bf16.mxu0 %v858_v8  ;;  %834 = vmatprep.subr.bf16.mxu1 %v858_v8 }
  0x1f   : > { %793 = vmatpush3.bf16.msra.mxu0 %v858_v8  ;;  %842 = vmatpush3.bf16.msra.mxu1 %v858_v8 }
  0x20   : > { %794 = vmatprep.subr.bf16.mxu0 %v859_v9  ;;  %835 = vmatprep.subr.bf16.mxu1 %v859_v9 }
  0x23   : > { %795 = vmatpush3.bf16.msra.mxu0 %v859_v9  ;;  %843 = vmatpush3.bf16.msra.mxu1 %v859_v9 }
  0x26   : > { %797 = vmatmul.mubr.bf16.vlgmr.msra.gmra.mrb[0].mxu0 %v862_v10  ;;  %813 = vmatmul.mubr.bf16.vlgmr.msra.gmra.mrb[0].mxu1 %v863_v11 }
  0x27   : > { %800 = vmatprep.mubr.bf16.mxu0 %v864_v12  ;;  %816 = vmatprep.mubr.bf16.mxu1 %v865_v13 }
  0x2e   : > { %801 = vmatmul.mubr.bf16.gmra.mrb[4].mxu0 %v866_v14  ;;  %817 = vmatmul.mubr.bf16.gmra.mrb[4].mxu1 %v867_v15 }
  0x2f   : > { %804 = vmatprep.mubr.bf16.mxu0 %v868_v16  ;;  %820 = vmatprep.mubr.bf16.mxu1 %v869_v17 }
  0x36   : > { %805 = vmatmul.mubr.bf16.gmra.mrb[8].mxu0 %v870_v18  ;;  %821 = vmatmul.mubr.bf16.gmra.mrb[8].mxu1 %v871_v19 }
  0x37   : > { %808 = vmatprep.mubr.bf16.mxu0 %v872_v20  ;;  %824 = vmatprep.mubr.bf16.mxu1 %v873_v21 }
  0x3e   : > { %809 = vmatmul.mubr.bf16.gmra.mrb[12].mxu0 %v874_v22  ;;  %825 = vmatmul.mubr.bf16.gmra.mrb[12].mxu1 %v875_v23 }
  0xf9   : > { %v798_v25 = vpop.f32.mrb[0].mxu0  ;;  %v814_v26 = vpop.f32.mrb[0].mxu1 }
  0xfa   : > { %v417_v27 = vadd.f32 %v798_v25, %v963_v24  ;;  %v481_v28 = vadd.f32 %v814_v26, %v963_v24  ;;  %v408_v29 = vpop.f32.mrb[1].mxu0  ;;  %v472_v30 = vpop.f32.mrb[1].mxu1 }
  0xfb   : > { %v409_v31 = vadd.f32 %v963_v24, %v408_v29  ;;  %v473_v32 = vadd.f32 %v963_v24, %v472_v30  ;;  %v799_v33 = vpop.f32.mrb[2].mxu0  ;;  %v815_v34 = vpop.f32.mrb[2].mxu1 }
  0xfc   : > { %vm537_vm1 = vcmp.ge.f32.partialorder %v417_v27, 0.0  ;;  %v569_v35 = vmul.f32 0.01, %v417_v27  ;;  %vm553_vm2 = vcmp.ge.f32.partialorder %v481_v28, 0.0  ;;  %v585_v36 = vmul.f32 0.01, %v481_v28 }
  0xfd   : > { %vm535_vm3 = vcmp.ge.f32.partialorder %v409_v31, 0.0  ;;  %v567_v37 = vmul.f32 0.01, %v409_v31  ;;  %vm551_vm4 = vcmp.ge.f32.partialorder %v473_v32, 0.0  ;;  %v583_v38 = vmul.f32 0.01, %v473_v32 }
  0xfe   : > { %v601_v39 = vsel %vm537_vm1, %v417_v27, %v569_v35  ;;  %v617_v40 = vsel %vm553_vm2, %v481_v28, %v585_v36  ;;  %v420_v41 = vadd.f32 %v799_v33, %v963_v24  ;;  %v484_v42 = vadd.f32 %v815_v34, %v963_v24  ;;  %v411_v43 = vpop.f32.mrb[3].mxu0  ;;  %v475_v44 = vpop.f32.mrb[3].mxu1 }
  0xff   : > { %634 = vst.msk [vmem:[%s973_s14 + $0x10] sm:$0xff] %vm631_vm0, %v601_v39  ;;  %650 = vst.msk [vmem:[%s973_s14 + $0x90] sm:$0xff] %vm631_vm0, %v617_v40  ;;  %v599_v45 = vsel %vm535_vm3, %v409_v31, %v567_v37  ;;  %v615_v46 = vsel %vm551_vm4, %v473_v32, %v583_v38  ;;  %v412_v47 = vadd.f32 %v963_v24, %v411_v43 }
 0x100   : > { %v476_v48 = vadd.f32 %v963_v24, %v475_v44  ;;  %632 = vst.msk [vmem:[%s973_s14] sm:$0xff] %vm631_vm0, %v599_v45  ;;  %648 = vst.msk [vmem:[%s973_s14 + $0x80] sm:$0xff] %vm631_vm0, %v615_v46  ;;  %vm538_vm5 = vcmp.ge.f32.partialorder %v420_v41, 0.0  ;;  %v570_v49 = vmul.f32 0.01, %v420_v41  ;;  %vm554_vm6 = vcmp.ge.f32.partialorder %v484_v42, 0.0 }
 0x101   : > { %v586_v50 = vmul.f32 0.01, %v484_v42  ;;  %vm536_vm7 = vcmp.ge.f32.partialorder %v412_v47, 0.0  ;;  %v568_v51 = vmul.f32 0.01, %v412_v47  ;;  %v802_v55 = vpop.f32.mrb[4].mxu0 }
 0x102   : > { %vm552_vm8 = vcmp.ge.f32.partialorder %v476_v48, 0.0  ;;  %v584_v52 = vmul.f32 0.01, %v476_v48  ;;  %v602_v53 = vsel %vm538_vm5, %v420_v41, %v570_v49  ;;  %v818_v56 = vpop.f32.mrb[4].mxu1  ;;  %v433_v59 = vadd.f32 %v802_v55, %v963_v24  ;;  %v424_v61 = vpop.f32.mrb[5].mxu0 }
 0x103   : > { %v618_v54 = vsel %vm554_vm6, %v484_v42, %v586_v50  ;;  %635 = vst.msk [vmem:[%s973_s14 + $0x18] sm:$0xff] %vm631_vm0, %v602_v53  ;;  %v600_v57 = vsel %vm536_vm7, %v412_v47, %v568_v51  ;;  %v497_v60 = vadd.f32 %v818_v56, %v963_v24  ;;  %v488_v62 = vpop.f32.mrb[5].mxu1  ;;  %v425_v63 = vadd.f32 %v963_v24, %v424_v61  ;;  %v803_v1 = vpop.f32.mrb[6].mxu0 }
 0x104   : > { %651 = vst.msk [vmem:[%s973_s14 + $0x98] sm:$0xff] %vm631_vm0, %v618_v54  ;;  %v616_v58 = vsel %vm552_vm8, %v476_v48, %v584_v52  ;;  %633 = vst.msk [vmem:[%s973_s14 + $0x8] sm:$0xff] %vm631_vm0, %v600_v57  ;;  %v489_v0 = vadd.f32 %v963_v24, %v488_v62  ;;  %v819_v2 = vpop.f32.mrb[6].mxu1  ;;  %vm541_vm9 = vcmp.ge.f32.partialorder %v433_v59, 0.0  ;;  %v573_v3 = vmul.f32 0.01, %v433_v59 }
 0x105   : > { %649 = vst.msk [vmem:[%s973_s14 + $0x88] sm:$0xff] %vm631_vm0, %v616_v58  ;;  %vm557_vm10 = vcmp.ge.f32.partialorder %v497_v60, 0.0  ;;  %v589_v4 = vmul.f32 0.01, %v497_v60  ;;  %vm539_vm11 = vcmp.ge.f32.partialorder %v425_v63, 0.0  ;;  %v436_v9 = vadd.f32 %v803_v1, %v963_v24  ;;  %v427_v11 = vpop.f32.mrb[7].mxu0 }
 0x106   : > { %v571_v5 = vmul.f32 0.01, %v425_v63  ;;  %vm555_vm12 = vcmp.ge.f32.partialorder %v489_v0, 0.0  ;;  %v587_v6 = vmul.f32 0.01, %v489_v0  ;;  %v605_v7 = vsel %vm541_vm9, %v433_v59, %v573_v3  ;;  %v491_v12 = vpop.f32.mrb[7].mxu1 }
 0x107   : > { %v621_v8 = vsel %vm557_vm10, %v497_v60, %v589_v4  ;;  %v500_v10 = vadd.f32 %v819_v2, %v963_v24  ;;  %638 = vst.msk [vmem:[%s973_s14 + $0x30] sm:$0xff] %vm631_vm0, %v605_v7  ;;  %v428_v15 = vadd.f32 %v963_v24, %v427_v11  ;;  %v492_v16 = vadd.f32 %v963_v24, %v491_v12 }
 0x108   : > { %654 = vst.msk [vmem:[%s973_s14 + $0xb0] sm:$0xff] %vm631_vm0, %v621_v8  ;;  %v603_v13 = vsel %vm539_vm11, %v425_v63, %v571_v5  ;;  %v619_v14 = vsel %vm555_vm12, %v489_v0, %v587_v6  ;;  %vm542_vm13 = vcmp.ge.f32.partialorder %v436_v9, 0.0  ;;  %v574_v17 = vmul.f32 0.01, %v436_v9 }
 0x109   : > { %636 = vst.msk [vmem:[%s973_s14 + $0x20] sm:$0xff] %vm631_vm0, %v603_v13  ;;  %652 = vst.msk [vmem:[%s973_s14 + $0xa0] sm:$0xff] %vm631_vm0, %v619_v14  ;;  %vm558_vm14 = vcmp.ge.f32.partialorder %v500_v10, 0.0  ;;  %v590_v18 = vmul.f32 0.01, %v500_v10  ;;  %vm540_vm15 = vcmp.ge.f32.partialorder %v428_v15, 0.0 }
 0x10a   : > { %v572_v19 = vmul.f32 0.01, %v428_v15  ;;  %vm556_vm1 = vcmp.ge.f32.partialorder %v492_v16, 0.0  ;;  %v588_v20 = vmul.f32 0.01, %v492_v16  ;;  %v606_v21 = vsel %vm542_vm13, %v436_v9, %v574_v17  ;;  %v806_v23 = vpop.f32.mrb[8].mxu0 }
 0x10b   : > { %v622_v22 = vsel %vm558_vm14, %v500_v10, %v590_v18  ;;  %v822_v25 = vpop.f32.mrb[8].mxu1  ;;  %639 = vst.msk [vmem:[%s973_s14 + $0x38] sm:$0xff] %vm631_vm0, %v606_v21  ;;  %v449_v28 = vadd.f32 %v806_v23, %v963_v24  ;;  %v440_v30 = vpop.f32.mrb[9].mxu0 }
 0x10c   : > { %655 = vst.msk [vmem:[%s973_s14 + $0xb8] sm:$0xff] %vm631_vm0, %v622_v22  ;;  %v604_v26 = vsel %vm540_vm15, %v428_v15, %v572_v19  ;;  %v620_v27 = vsel %vm556_vm1, %v492_v16, %v588_v20  ;;  %v513_v29 = vadd.f32 %v822_v25, %v963_v24  ;;  %v504_v31 = vpop.f32.mrb[9].mxu1  ;;  %v441_v32 = vadd.f32 %v963_v24, %v440_v30  ;;  %v807_v34 = vpop.f32.mrb[10].mxu0 }
 0x10d   : > { %637 = vst.msk [vmem:[%s973_s14 + $0x28] sm:$0xff] %vm631_vm0, %v604_v26  ;;  %653 = vst.msk [vmem:[%s973_s14 + $0xa8] sm:$0xff] %vm631_vm0, %v620_v27  ;;  %v505_v33 = vadd.f32 %v963_v24, %v504_v31  ;;  %v823_v35 = vpop.f32.mrb[10].mxu1  ;;  %vm545_vm2 = vcmp.ge.f32.partialorder %v449_v28, 0.0  ;;  %v577_v36 = vmul.f32 0.01, %v449_v28  ;;  %v452_v42 = vadd.f32 %v807_v34, %v963_v24 }
 0x10e   : > { %vm561_vm3 = vcmp.ge.f32.partialorder %v513_v29, 0.0  ;;  %v593_v37 = vmul.f32 0.01, %v513_v29  ;;  %vm543_vm4 = vcmp.ge.f32.partialorder %v441_v32, 0.0  ;;  %v575_v38 = vmul.f32 0.01, %v441_v32 }
 0x10f   : > { %vm559_vm5 = vcmp.ge.f32.partialorder %v505_v33, 0.0  ;;  %v591_v39 = vmul.f32 0.01, %v505_v33  ;;  %v609_v40 = vsel %vm545_vm2, %v449_v28, %v577_v36  ;;  %v516_v43 = vadd.f32 %v823_v35, %v963_v24  ;;  %v443_v44 = vpop.f32.mrb[11].mxu0  ;;  %v507_v45 = vpop.f32.mrb[11].mxu1 }
 0x110   : > { %v625_v41 = vsel %vm561_vm3, %v513_v29, %v593_v37  ;;  %642 = vst.msk [vmem:[%s973_s14 + $0x50] sm:$0xff] %vm631_vm0, %v609_v40  ;;  %v607_v46 = vsel %vm543_vm4, %v441_v32, %v575_v38  ;;  %v444_v48 = vadd.f32 %v963_v24, %v443_v44  ;;  %v508_v49 = vadd.f32 %v963_v24, %v507_v45 }
 0x111   : > { %658 = vst.msk [vmem:[%s973_s14 + $0xd0] sm:$0xff] %vm631_vm0, %v625_v41  ;;  %v623_v47 = vsel %vm559_vm5, %v505_v33, %v591_v39  ;;  %v810_v50 = vpop.f32.mrb[12].mxu0  ;;  %v826_v51 = vpop.f32.mrb[12].mxu1  ;;  %640 = vst.msk [vmem:[%s973_s14 + $0x40] sm:$0xff] %vm631_vm0, %v607_v46  ;;  %vm546_vm6 = vcmp.ge.f32.partialorder %v452_v42, 0.0  ;;  %vm562_vm7 = vcmp.ge.f32.partialorder %v516_v43, 0.0 }
 0x112   : > { %656 = vst.msk [vmem:[%s973_s14 + $0xc0] sm:$0xff] %vm631_vm0, %v623_v47  ;;  %v578_v52 = vmul.f32 0.01, %v452_v42  ;;  %v594_v53 = vmul.f32 0.01, %v516_v43  ;;  %vm544_vm8 = vcmp.ge.f32.partialorder %v444_v48, 0.0  ;;  %v465_v58 = vadd.f32 %v810_v50, %v963_v24 }
 0x113   : > { %v576_v54 = vmul.f32 0.01, %v444_v48  ;;  %vm560_vm9 = vcmp.ge.f32.partialorder %v508_v49, 0.0  ;;  %v592_v55 = vmul.f32 0.01, %v508_v49  ;;  %v529_v59 = vadd.f32 %v826_v51, %v963_v24  ;;  %v456_v60 = vpop.f32.mrb[13].mxu0 }
 0x114   : > { %v610_v56 = vsel %vm546_vm6, %v452_v42, %v578_v52  ;;  %v626_v57 = vsel %vm562_vm7, %v516_v43, %v594_v53  ;;  %v520_v61 = vpop.f32.mrb[13].mxu1  ;;  %v457_v0 = vadd.f32 %v963_v24, %v456_v60  ;;  %v811_v2 = vpop.f32.mrb[14].mxu0  ;;  %vm549_vm10 = vcmp.ge.f32.partialorder %v465_v58, 0.0 }
 0x115   : > { %643 = vst.msk [vmem:[%s973_s14 + $0x58] sm:$0xff] %vm631_vm0, %v610_v56  ;;  %659 = vst.msk [vmem:[%s973_s14 + $0xd8] sm:$0xff] %vm631_vm0, %v626_v57  ;;  %v608_v62 = vsel %vm544_vm8, %v444_v48, %v576_v54  ;;  %v624_v63 = vsel %vm560_vm9, %v508_v49, %v592_v55  ;;  %v521_v1 = vadd.f32 %v963_v24, %v520_v61  ;;  %v827_v3 = vpop.f32.mrb[14].mxu1  ;;  %v581_v4 = vmul.f32 0.01, %v465_v58  ;;  %v459_v12 = vpop.f32.mrb[15].mxu0 }
 0x116   : > { %641 = vst.msk [vmem:[%s973_s14 + $0x48] sm:$0xff] %vm631_vm0, %v608_v62  ;;  %657 = vst.msk [vmem:[%s973_s14 + $0xc8] sm:$0xff] %vm631_vm0, %v624_v63  ;;  %vm565_vm11 = vcmp.ge.f32.partialorder %v529_v59, 0.0  ;;  %v597_v5 = vmul.f32 0.01, %v529_v59  ;;  %vm547_vm12 = vcmp.ge.f32.partialorder %v457_v0, 0.0  ;;  %v468_v10 = vadd.f32 %v811_v2, %v963_v24 }
 0x117   : > { %v579_v6 = vmul.f32 0.01, %v457_v0  ;;  %vm563_vm13 = vcmp.ge.f32.partialorder %v521_v1, 0.0  ;;  %v595_v7 = vmul.f32 0.01, %v521_v1  ;;  %v613_v8 = vsel %vm549_vm10, %v465_v58, %v581_v4  ;;  %v523_v13 = vpop.f32.mrb[15].mxu1 }
 0x118   : > { %v629_v9 = vsel %vm565_vm11, %v529_v59, %v597_v5  ;;  %v532_v11 = vadd.f32 %v827_v3, %v963_v24  ;;  %646 = vst.msk [vmem:[%s973_s14 + $0x70] sm:$0xff] %vm631_vm0, %v613_v8  ;;  %v460_v16 = vadd.f32 %v963_v24, %v459_v12  ;;  %v524_v17 = vadd.f32 %v963_v24, %v523_v13 }
 0x119   : > { %662 = vst.msk [vmem:[%s973_s14 + $0xf0] sm:$0xff] %vm631_vm0, %v629_v9  ;;  %v611_v14 = vsel %vm547_vm12, %v457_v0, %v579_v6  ;;  %v627_v15 = vsel %vm563_vm13, %v521_v1, %v595_v7  ;;  %vm550_vm14 = vcmp.ge.f32.partialorder %v468_v10, 0.0  ;;  %v582_v18 = vmul.f32 0.01, %v468_v10 }
 0x11a   : > { %644 = vst.msk [vmem:[%s973_s14 + $0x60] sm:$0xff] %vm631_vm0, %v611_v14  ;;  %660 = vst.msk [vmem:[%s973_s14 + $0xe0] sm:$0xff] %vm631_vm0, %v627_v15  ;;  %vm566_vm15 = vcmp.ge.f32.partialorder %v532_v11, 0.0  ;;  %v598_v19 = vmul.f32 0.01, %v532_v11  ;;  %vm548_vm1 = vcmp.ge.f32.partialorder %v460_v16, 0.0 }
 0x11b   : > { %v580_v20 = vmul.f32 0.01, %v460_v16  ;;  %vm564_vm2 = vcmp.ge.f32.partialorder %v524_v17, 0.0  ;;  %v596_v21 = vmul.f32 0.01, %v524_v17  ;;  %v614_v22 = vsel %vm550_vm14, %v468_v10, %v582_v18 }
 0x11c   : > { %v630_v23 = vsel %vm566_vm15, %v532_v11, %v598_v19  ;;  %647 = vst.msk [vmem:[%s973_s14 + $0x78] sm:$0xff] %vm631_vm0, %v614_v22 }
 0x11d   : > { %663 = vst.msk [vmem:[%s973_s14 + $0xf8] sm:$0xff] %vm631_vm0, %v630_v23  ;;  %v612_v24 = vsel %vm548_vm1, %v460_v16, %v580_v20  ;;  %v628_v25 = vsel %vm564_vm2, %v524_v17, %v596_v21 }
 0x11e   : > { %645 = vst.msk [vmem:[%s973_s14 + $0x68] sm:$0xff] %vm631_vm0, %v612_v24  ;;  %661 = vst.msk [vmem:[%s973_s14 + $0xe8] sm:$0xff] %vm631_vm0, %v628_v25 }
 0x11f PF: > { %s13_s12 = sadd.s32 1, %s882_s12  }
 0x120   : > { %p10_p4 = scmp.ge.s32.totalorder %s13_s12, 4  }
 0x122   :  { %12 = sbr.rel (!%p10_p4) target bundleno = 1 (0x1), region = 62 }

// kernel: classifier_forward.7
= control target key start
LH: loop header
LB: loop body
LE: loop exit
PB: predicated region body
PF: predicated region fallthrough
CT: control target
= control target key end

     0   :  { %vm937_vm0 = vcmask 523264   ;;  %s1708_s1 = inlined_call_operand.vmem [shape: bf16[640,64], index: 1, kind: input, shape index: {}]   ;;  %s1709_s0 = inlined_call_operand.vmem [shape: bf16[128,640], index: 0, kind: input, shape index: {}]   ;;  %s1710_s2 = inlined_call_operand.vmem [shape: f32[1,64], index: 2, kind: input, shape index: {}]   ;;  %s1711_s3 = inlined_call_operand.vmem [shape: f32[128,64], index: 3, kind: output, shape index: {}]  }
   0x1   :  { %v1231_v0 = vld [vmem:[%s1708_s1 + $0x40] sm:$0xff]   ;;  %v1235_v4 = vld [vmem:[%s1708_s1 + $0x48] sm:$0xff]   ;;  %v1239_v8 = vld [vmem:[%s1708_s1 + $0x50] sm:$0xff]  }
   0x2   :  { %v1232_v1 = vld [vmem:[%s1708_s1 + $0xc0] sm:$0xff]   ;;  %1039 = vmatprep.subr.bf16.mxu0 %v1231_v0  ;;  %v1236_v5 = vld [vmem:[%s1708_s1 + $0xc8] sm:$0xff]   ;;  %v1240_v9 = vld [vmem:[%s1708_s1 + $0xd0] sm:$0xff]  }
   0x3   :  { %v1233_v2 = vld [vmem:[%s1708_s1] sm:$0xff]   ;;  %1103 = vmatprep.subr.bf16.mxu1 %v1232_v1  ;;  %v1237_v6 = vld [vmem:[%s1708_s1 + $0x8] sm:$0xff]   ;;  %v1241_v10 = vld [vmem:[%s1708_s1 + $0x10] sm:$0xff]  }
   0x4   :  { %v1234_v3 = vld [vmem:[%s1708_s1 + $0x80] sm:$0xff]   ;;  %1040 = vmatpush3.bf16.msra.mxu0 %v1233_v2  ;;  %v1238_v7 = vld [vmem:[%s1708_s1 + $0x88] sm:$0xff]   ;;  %v1242_v11 = vld [vmem:[%s1708_s1 + $0x90] sm:$0xff]  }
   0x5   :  { %1104 = vmatpush3.bf16.msra.mxu1 %v1234_v3  ;;  %1041 = vmatprep.subr.bf16.mxu0 %v1235_v4  ;;  %v1243_v12 = vld [vmem:[%s1708_s1 + $0x58] sm:$0xff]   ;;  %v1247_v16 = vld [vmem:[%s1708_s1 + $0x60] sm:$0xff]   ;;  %v1251_v20 = vld [vmem:[%s1708_s1 + $0x68] sm:$0xff]  }
   0x6   :  { %1105 = vmatprep.subr.bf16.mxu1 %v1236_v5  ;;  %v1244_v13 = vld [vmem:[%s1708_s1 + $0xd8] sm:$0xff]   ;;  %v1248_v17 = vld [vmem:[%s1708_s1 + $0xe0] sm:$0xff]   ;;  %v1252_v21 = vld [vmem:[%s1708_s1 + $0xe8] sm:$0xff]  }
   0x7   :  { %v1245_v14 = vld [vmem:[%s1708_s1 + $0x18] sm:$0xff]   ;;  %v1249_v18 = vld [vmem:[%s1708_s1 + $0x20] sm:$0xff]   ;;  %v1253_v22 = vld [vmem:[%s1708_s1 + $0x28] sm:$0xff]  }
   0x8   :  { %1042 = vmatpush3.bf16.msra.mxu0 %v1237_v6  ;;  %v1246_v15 = vld [vmem:[%s1708_s1 + $0x98] sm:$0xff]   ;;  %v1250_v19 = vld [vmem:[%s1708_s1 + $0xa0] sm:$0xff]   ;;  %v1254_v23 = vld [vmem:[%s1708_s1 + $0xa8] sm:$0xff]  }
   0x9   :  { %1106 = vmatpush3.bf16.msra.mxu1 %v1238_v7  ;;  %1043 = vmatprep.subr.bf16.mxu0 %v1239_v8  ;;  %v1255_v24 = vld [vmem:[%s1708_s1 + $0x70] sm:$0xff]   ;;  %v1259_v28 = vld [vmem:[%s1708_s1 + $0x78] sm:$0xff]   ;;  %v1268_v35 = vld [vmem:[%s1709_s0 + $0xc] ss:$20 sps:$4 sm:$0xff]  }
   0xa   :  { %1107 = vmatprep.subr.bf16.mxu1 %v1240_v9  ;;  %v1256_v25 = vld [vmem:[%s1708_s1 + $0xf0] sm:$0xff]   ;;  %v1260_v29 = vld [vmem:[%s1708_s1 + $0xf8] sm:$0xff]   ;;  %v1269_v36 = vld [vmem:[%s1708_s1 + $0x100] sm:$0xff]   ;;  %727 = vmatprep.mubr.bf16.mxu1 %v1268_v35 }
   0xb   :  { %v1257_v26 = vld [vmem:[%s1708_s1 + $0x30] sm:$0xff]   ;;  %v1261_v30 = vld [vmem:[%s1708_s1 + $0x38] sm:$0xff]   ;;  %v1270_v37 = vld [vmem:[%s1709_s0 + $0x2c] ss:$20 sps:$4 sm:$0xff]  }
   0xc   :  { %1044 = vmatpush3.bf16.msra.mxu0 %v1241_v10  ;;  %v1258_v27 = vld [vmem:[%s1708_s1 + $0xb0] sm:$0xff]   ;;  %v1262_v31 = vld [vmem:[%s1708_s1 + $0xb8] sm:$0xff]   ;;  %v1276_v39 = vld [vmem:[%s1708_s1 + $0x108] sm:$0xff]  }
   0xd   :  { %1108 = vmatpush3.bf16.msra.mxu1 %v1242_v11  ;;  %1045 = vmatprep.subr.bf16.mxu0 %v1243_v12  ;;  %v1263_v32 = vld [vmem:[%s1709_s0] ss:$20 sps:$4 sm:$0xff]   ;;  %v1265_v33 = vld [vmem:[%s1709_s0 + $0x4] ss:$20 sps:$4 sm:$0xff]   ;;  %v1266_v34 = vld [vmem:[%s1709_s0 + $0x8] ss:$20 sps:$4 sm:$0xff]  }
   0xe   :  { %1109 = vmatprep.subr.bf16.mxu1 %v1244_v13  ;;  %630 = vmatprep.mubr.bf16.mxu0 %v1265_v33  ;;  %v1272_v38 = vld [vmem:[%s1709_s0 + $0x34] ss:$20 sps:$4 sm:$0xff]   ;;  %v1275_v41 = vld [vmem:[%s1709_s0 + $0x30] ss:$20 sps:$4 sm:$0xff]   ;;  %v1290_v45 = vld [vmem:[%s1708_s1 + $0x118] sm:$0xff]  }
   0xf   :  { %v1274_v40 = vld [vmem:[%s1709_s0 + $0x28] ss:$20 sps:$4 sm:$0xff]   ;;  %v1283_v44 = vld [vmem:[%s1708_s1 + $0x110] sm:$0xff]   ;;  %v1282_v47 = vld [vmem:[%s1709_s0 + $0x58] ss:$20 sps:$4 sm:$0xff]  }
  0x10   :  { %1046 = vmatpush3.bf16.msra.mxu0 %v1245_v14  ;;  %v1277_v42 = vld [vmem:[%s1709_s0 + $0x54] ss:$20 sps:$4 sm:$0xff]   ;;  %v1279_v43 = vld [vmem:[%s1709_s0 + $0x5c] ss:$20 sps:$4 sm:$0xff]   ;;  %v1286_v49 = vld [vmem:[%s1709_s0 + $0x84] ss:$20 sps:$4 sm:$0xff]  }
  0x11   :  { %1110 = vmatpush3.bf16.msra.mxu1 %v1246_v15  ;;  %1047 = vmatprep.subr.bf16.mxu0 %v1247_v16  ;;  %v1281_v46 = vld [vmem:[%s1709_s0 + $0x50] ss:$20 sps:$4 sm:$0xff]   ;;  %v1304_v51 = vld [vmem:[%s1708_s1 + $0x128] sm:$0xff]   ;;  %v1289_v53 = vld [vmem:[%s1709_s0 + $0x80] ss:$20 sps:$4 sm:$0xff]  }
  0x12   :  { %1111 = vmatprep.subr.bf16.mxu1 %v1248_v17  ;;  %v1284_v48 = vld [vmem:[%s1709_s0 + $0x7c] ss:$20 sps:$4 sm:$0xff]   ;;  %v1297_v50 = vld [vmem:[%s1708_s1 + $0x120] sm:$0xff]   ;;  %v1288_v52 = vld [vmem:[%s1709_s0 + $0x78] ss:$20 sps:$4 sm:$0xff]  }
  0x13   :  { %v1291_v54 = vld [vmem:[%s1709_s0 + $0xa4] ss:$20 sps:$4 sm:$0xff]   ;;  %v1311_v55 = vld [vmem:[%s1708_s1 + $0x130] sm:$0xff]   ;;  %v1293_v56 = vld [vmem:[%s1709_s0 + $0xac] ss:$20 sps:$4 sm:$0xff]  }
  0x14   :  { %1048 = vmatpush3.bf16.msra.mxu0 %v1249_v18  ;;  %v1318_v57 = vld [vmem:[%s1708_s1 + $0x138] sm:$0xff]   ;;  %v1295_v58 = vld [vmem:[%s1709_s0 + $0xa0] ss:$20 sps:$4 sm:$0xff]   ;;  %v1303_v63 = vld [vmem:[%s1709_s0 + $0xd0] ss:$20 sps:$4 sm:$0xff]  }
  0x15   :  { %1112 = vmatpush3.bf16.msra.mxu1 %v1250_v19  ;;  %1049 = vmatprep.subr.bf16.mxu0 %v1251_v20  ;;  %v1296_v59 = vld [vmem:[%s1709_s0 + $0xa8] ss:$20 sps:$4 sm:$0xff]   ;;  %v1298_v60 = vld [vmem:[%s1709_s0 + $0xcc] ss:$20 sps:$4 sm:$0xff]   ;;  %v1309_v2 = vld [vmem:[%s1709_s0 + $0xf0] ss:$20 sps:$4 sm:$0xff]  }
  0x16   :  { %1113 = vmatprep.subr.bf16.mxu1 %v1252_v21  ;;  %v1300_v61 = vld [vmem:[%s1709_s0 + $0xd4] ss:$20 sps:$4 sm:$0xff]   ;;  %v1307_v1 = vld [vmem:[%s1709_s0 + $0xfc] ss:$20 sps:$4 sm:$0xff]   ;;  %v1310_v3 = vld [vmem:[%s1709_s0 + $0xf8] ss:$20 sps:$4 sm:$0xff]  }
  0x17   :  { %v1302_v62 = vld [vmem:[%s1709_s0 + $0xc8] ss:$20 sps:$4 sm:$0xff]   ;;  %v1314_v5 = vld [vmem:[%s1709_s0 + $0x124] ss:$20 sps:$4 sm:$0xff]   ;;  %v1317_v7 = vld [vmem:[%s1709_s0 + $0x120] ss:$20 sps:$4 sm:$0xff]  }
  0x18   :  { %1050 = vmatpush3.bf16.msra.mxu0 %v1253_v22  ;;  %v1305_v0 = vld [vmem:[%s1709_s0 + $0xf4] ss:$20 sps:$4 sm:$0xff]   ;;  %v1312_v4 = vld [vmem:[%s1709_s0 + $0x11c] ss:$20 sps:$4 sm:$0xff]   ;;  %v1316_v6 = vld [vmem:[%s1709_s0 + $0x118] ss:$20 sps:$4 sm:$0xff]  }
  0x19   :  { %1114 = vmatpush3.bf16.msra.mxu1 %v1254_v23  ;;  %1051 = vmatprep.subr.bf16.mxu0 %v1255_v24  ;;  %v1319_v8 = vld [vmem:[%s1709_s0 + $0x10] ss:$20 sps:$4 sm:$0xff]   ;;  %v1321_v10 = vld [vmem:[%s1709_s0 + $0x38] ss:$20 sps:$4 sm:$0xff]   ;;  %v1323_v12 = vld [vmem:[%s1709_s0 + $0x60] ss:$20 sps:$4 sm:$0xff]  }
  0x1a   :  { %1115 = vmatprep.subr.bf16.mxu1 %v1256_v25  ;;  %v1320_v9 = vld [vmem:[%s1709_s0 + $0xb0] ss:$20 sps:$4 sm:$0xff]   ;;  %v1322_v11 = vld [vmem:[%s1709_s0 + $0xd8] ss:$20 sps:$4 sm:$0xff]   ;;  %v1324_v13 = vld [vmem:[%s1709_s0 + $0x100] ss:$20 sps:$4 sm:$0xff]  }
  0x1b   :  { %v1325_v14 = vld [vmem:[%s1709_s0 + $0x88] ss:$20 sps:$4 sm:$0xff]   ;;  %v1590_v18 = vld [vmem:[%s1710_s2] ss:$0 sm:$0xff] }
  0x1c   :  { %1052 = vmatpush3.bf16.msra.mxu0 %v1257_v26  ;;  %v1326_v15 = vld [vmem:[%s1709_s0 + $0x128] ss:$20 sps:$4 sm:$0xff]  }
  0x1d   :  { %1116 = vmatpush3.bf16.msra.mxu1 %v1258_v27  ;;  %1053 = vmatprep.subr.bf16.mxu0 %v1259_v28 }
  0x1e   :  { %1117 = vmatprep.subr.bf16.mxu1 %v1260_v29 }
  0x20   :  { %1054 = vmatpush3.bf16.msra.mxu0 %v1261_v30 }
  0x21   :  { %1118 = vmatpush3.bf16.msra.mxu1 %v1262_v31  ;;  %1183 = vmatprep.subr.bf16.mxu0 %v1269_v36 }
  0x22   :  { %1215 = vmatprep.subr.bf16.mxu1 %v1269_v36 }
  0x23   :  { %631 = vmatmul.mubr.bf16.vlgmr.msra.gmra.mrb[0].mxu0 %v1263_v32 }
  0x24   :  { %728 = vmatmul.mubr.bf16.vlgmr.msra.gmra.mrb[0].mxu1 %v1266_v34  ;;  %1184 = vmatpush3.bf16.msra.mxu0 %v1269_v36 }
  0x25   :  { %1223 = vmatpush3.bf16.msra.mxu1 %v1269_v36  ;;  %638 = vmatprep.mubr.bf16.mxu0 %v1270_v37 }
  0x26   :  { %735 = vmatprep.mubr.bf16.mxu1 %v1272_v38  ;;  %1185 = vmatprep.subr.bf16.mxu0 %v1276_v39 }
  0x27   :  { %1216 = vmatprep.subr.bf16.mxu1 %v1276_v39 }
  0x28   :  { %1186 = vmatpush3.bf16.msra.mxu0 %v1276_v39 }
  0x29   :  { %1224 = vmatpush3.bf16.msra.mxu1 %v1276_v39  ;;  %1187 = vmatprep.subr.bf16.mxu0 %v1283_v44 }
  0x2a   :  { %1217 = vmatprep.subr.bf16.mxu1 %v1283_v44 }
  0x2b   :  { %639 = vmatmul.mubr.bf16.gmra.mrb[4].mxu0 %v1274_v40 }
  0x2c   :  { %736 = vmatmul.mubr.bf16.gmra.mrb[4].mxu1 %v1275_v41  ;;  %646 = vmatprep.mubr.bf16.mxu0 %v1277_v42 }
  0x2d   :  { %743 = vmatprep.mubr.bf16.mxu1 %v1279_v43  ;;  %1188 = vmatpush3.bf16.msra.mxu0 %v1283_v44 }
  0x2e   :  { %1225 = vmatpush3.bf16.msra.mxu1 %v1283_v44  ;;  %1189 = vmatprep.subr.bf16.mxu0 %v1290_v45 }
  0x2f   :  { %1218 = vmatprep.subr.bf16.mxu1 %v1290_v45 }
  0x31   :  { %1190 = vmatpush3.bf16.msra.mxu0 %v1290_v45 }
  0x32   :  { %1226 = vmatpush3.bf16.msra.mxu1 %v1290_v45  ;;  %1191 = vmatprep.subr.bf16.mxu0 %v1297_v50 }
  0x33   :  { %647 = vmatmul.mubr.bf16.gmra.mrb[8].mxu0 %v1281_v46  ;;  %1219 = vmatprep.subr.bf16.mxu1 %v1297_v50 }
  0x34   :  { %744 = vmatmul.mubr.bf16.gmra.mrb[8].mxu1 %v1282_v47  ;;  %654 = vmatprep.mubr.bf16.mxu0 %v1284_v48 }
  0x35   :  { %751 = vmatprep.mubr.bf16.mxu1 %v1286_v49  ;;  %1192 = vmatpush3.bf16.msra.mxu0 %v1297_v50 }
  0x36   :  { %1227 = vmatpush3.bf16.msra.mxu1 %v1297_v50  ;;  %1193 = vmatprep.subr.bf16.mxu0 %v1304_v51 }
  0x37   :  { %1220 = vmatprep.subr.bf16.mxu1 %v1304_v51 }
  0x39   :  { %1194 = vmatpush3.bf16.msra.mxu0 %v1304_v51 }
  0x3a   :  { %1228 = vmatpush3.bf16.msra.mxu1 %v1304_v51  ;;  %1195 = vmatprep.subr.bf16.mxu0 %v1311_v55 }
  0x3b   :  { %655 = vmatmul.mubr.bf16.gmra.mrb[12].mxu0 %v1288_v52  ;;  %1221 = vmatprep.subr.bf16.mxu1 %v1311_v55 }
  0x3c   :  { %752 = vmatmul.mubr.bf16.gmra.mrb[12].mxu1 %v1289_v53  ;;  %662 = vmatprep.mubr.bf16.mxu0 %v1291_v54 }
  0x3d   :  { %759 = vmatprep.mubr.bf16.mxu1 %v1293_v56  ;;  %1196 = vmatpush3.bf16.msra.mxu0 %v1311_v55 }
  0x3e   :  { %1229 = vmatpush3.bf16.msra.mxu1 %v1311_v55  ;;  %1197 = vmatprep.subr.bf16.mxu0 %v1318_v57 }
  0x3f   :  { %1222 = vmatprep.subr.bf16.mxu1 %v1318_v57 }
  0x41   :  { %1198 = vmatpush3.bf16.msra.mxu0 %v1318_v57 }
  0x42   :  { %1230 = vmatpush3.bf16.msra.mxu1 %v1318_v57 }
  0x43   :  { %663 = vmatmul.mubr.bf16.gmra.mrb[16].mxu0 %v1295_v58 }
  0x44   :  { %760 = vmatmul.mubr.bf16.gmra.mrb[16].mxu1 %v1296_v59  ;;  %670 = vmatprep.mubr.bf16.mxu0 %v1298_v60 }
  0x45   :  { %767 = vmatprep.mubr.bf16.mxu1 %v1300_v61 }
  0x4b   :  { %671 = vmatmul.mubr.bf16.gmra.mrb[20].mxu0 %v1302_v62 }
  0x4c   :  { %768 = vmatmul.mubr.bf16.gmra.mrb[20].mxu1 %v1303_v63  ;;  %678 = vmatprep.mubr.bf16.mxu0 %v1305_v0 }
  0x4d   :  { %775 = vmatprep.mubr.bf16.mxu1 %v1307_v1 }
  0x53   :  { %679 = vmatmul.mubr.bf16.gmra.mrb[24].mxu0 %v1309_v2 }
  0x54   :  { %776 = vmatmul.mubr.bf16.gmra.mrb[24].mxu1 %v1310_v3  ;;  %686 = vmatprep.mubr.bf16.mxu0 %v1312_v4 }
  0x55   :  { %783 = vmatprep.mubr.bf16.mxu1 %v1314_v5 }
  0x5b   :  { %687 = vmatmul.mubr.bf16.gmra.mrb[28].mxu0 %v1316_v6 }
  0x5c   :  { %784 = vmatmul.mubr.bf16.gmra.mrb[28].mxu1 %v1317_v7  ;;  %1199 = vmatprep.mubr.bf16.mxu0 %v1319_v8 }
  0x5d   :  { %1207 = vmatprep.mubr.bf16.mxu1 %v1320_v9 }
  0x63   :  { %1200 = vmatmul.mubr.bf16.vlgmr.msra.gmra.mrb[32].mxu0 %v1321_v10 }
  0x64   :  { %1208 = vmatmul.mubr.bf16.vlgmr.msra.gmra.mrb[32].mxu1 %v1322_v11  ;;  %1203 = vmatprep.mubr.bf16.mxu0 %v1323_v12 }
  0x65   :  { %1211 = vmatprep.mubr.bf16.mxu1 %v1324_v13 }
  0x6b   :  { %1204 = vmatmul.mubr.bf16.gmra.mrb[36].mxu0 %v1325_v14 }
  0x6c   :  { %1212 = vmatmul.mubr.bf16.gmra.mrb[36].mxu1 %v1326_v15 }
  0xf6   :  { %v1055_v16 = vpop.f32.mrb[0].mxu0 }
  0xf7   :  { %v1119_v17 = vpop.f32.mrb[0].mxu1  ;;  %v1056_v19 = vpop.f32.mrb[1].mxu0 }
  0xf8   :  { %v1057_v20 = vadd.f32 %v1056_v19, %v1055_v16  ;;  %v1120_v21 = vpop.f32.mrb[1].mxu1  ;;  %v1058_v22 = vpop.f32.mrb[2].mxu0 }
  0xf9   :  { %v1121_v23 = vadd.f32 %v1120_v21, %v1119_v17  ;;  %v1122_v24 = vpop.f32.mrb[2].mxu1  ;;  %v1059_v25 = vpop.f32.mrb[3].mxu0 }
  0xfa   :  { %v633_v26 = vadd.f32 %v1057_v20, %v1590_v18  ;;  %v1060_v27 = vadd.f32 %v1059_v25, %v1058_v22  ;;  %v1123_v28 = vpop.f32.mrb[3].mxu1 }
  0xfb   :  { %v1124_v29 = vadd.f32 %v1123_v28, %v1122_v24 }
  0xfc   :  { %v636_v30 = vadd.f32 %v1060_v27, %v1590_v18  ;;  %v1594_v31 = vadd.f32 %v1121_v23, %v633_v26 }
  0xfe   :  { %v1061_v32 = vpop.f32.mrb[4].mxu0  ;;  %v1596_v33 = vadd.f32 %v1124_v29, %v636_v30 }
  0xff   :  { %v1125_v34 = vpop.f32.mrb[4].mxu1  ;;  %v1062_v35 = vpop.f32.mrb[5].mxu0 }
 0x100   :  { %v1063_v36 = vadd.f32 %v1062_v35, %v1061_v32  ;;  %v1126_v37 = vpop.f32.mrb[5].mxu1  ;;  %v1064_v38 = vpop.f32.mrb[6].mxu0 }
 0x101   :  { %v1127_v39 = vadd.f32 %v1126_v37, %v1125_v34  ;;  %v1128_v40 = vpop.f32.mrb[6].mxu1  ;;  %v1065_v41 = vpop.f32.mrb[7].mxu0 }
 0x102   :  { %v641_v42 = vadd.f32 %v1063_v36, %v1590_v18  ;;  %v1066_v43 = vadd.f32 %v1065_v41, %v1064_v38  ;;  %v1129_v44 = vpop.f32.mrb[7].mxu1 }
 0x103   :  { %v1130_v45 = vadd.f32 %v1129_v44, %v1128_v40 }
 0x104   :  { %v644_v46 = vadd.f32 %v1066_v43, %v1590_v18  ;;  %v1600_v47 = vadd.f32 %v1127_v39, %v641_v42 }
 0x106   :  { %v1067_v48 = vpop.f32.mrb[8].mxu0  ;;  %v1602_v49 = vadd.f32 %v1130_v45, %v644_v46 }
 0x107   :  { %v1131_v50 = vpop.f32.mrb[8].mxu1  ;;  %v1068_v51 = vpop.f32.mrb[9].mxu0 }
 0x108   :  { %v1069_v52 = vadd.f32 %v1068_v51, %v1067_v48  ;;  %v1132_v53 = vpop.f32.mrb[9].mxu1  ;;  %v1070_v54 = vpop.f32.mrb[10].mxu0 }
 0x109   :  { %v1133_v55 = vadd.f32 %v1132_v53, %v1131_v50  ;;  %v1134_v56 = vpop.f32.mrb[10].mxu1  ;;  %v1071_v57 = vpop.f32.mrb[11].mxu0 }
 0x10a   :  { %v649_v58 = vadd.f32 %v1069_v52, %v1590_v18  ;;  %v1072_v59 = vadd.f32 %v1071_v57, %v1070_v54  ;;  %v1135_v60 = vpop.f32.mrb[11].mxu1 }
 0x10b   :  { %v1136_v61 = vadd.f32 %v1135_v60, %v1134_v56 }
 0x10c   :  { %v652_v62 = vadd.f32 %v1072_v59, %v1590_v18  ;;  %v1606_v63 = vadd.f32 %v1133_v55, %v649_v58 }
 0x10e   :  { %v1073_v0 = vpop.f32.mrb[12].mxu0  ;;  %v1608_v1 = vadd.f32 %v1136_v61, %v652_v62 }
 0x10f   :  { %v1137_v2 = vpop.f32.mrb[12].mxu1  ;;  %v1074_v3 = vpop.f32.mrb[13].mxu0 }
 0x110   :  { %v1075_v4 = vadd.f32 %v1074_v3, %v1073_v0  ;;  %v1138_v5 = vpop.f32.mrb[13].mxu1  ;;  %v1076_v6 = vpop.f32.mrb[14].mxu0 }
 0x111   :  { %v1139_v7 = vadd.f32 %v1138_v5, %v1137_v2  ;;  %v1140_v8 = vpop.f32.mrb[14].mxu1  ;;  %v1077_v9 = vpop.f32.mrb[15].mxu0 }
 0x112   :  { %v657_v10 = vadd.f32 %v1075_v4, %v1590_v18  ;;  %v1078_v11 = vadd.f32 %v1077_v9, %v1076_v6  ;;  %v1141_v12 = vpop.f32.mrb[15].mxu1 }
 0x113   :  { %v1142_v13 = vadd.f32 %v1141_v12, %v1140_v8 }
 0x114   :  { %v660_v14 = vadd.f32 %v1078_v11, %v1590_v18  ;;  %v1612_v15 = vadd.f32 %v1139_v7, %v657_v10 }
 0x116   :  { %v1079_v16 = vpop.f32.mrb[16].mxu0  ;;  %v1614_v17 = vadd.f32 %v1142_v13, %v660_v14 }
 0x117   :  { %v1143_v19 = vpop.f32.mrb[16].mxu1  ;;  %v1080_v20 = vpop.f32.mrb[17].mxu0 }
 0x118   :  { %v1081_v21 = vadd.f32 %v1080_v20, %v1079_v16  ;;  %v1144_v22 = vpop.f32.mrb[17].mxu1  ;;  %v1082_v23 = vpop.f32.mrb[18].mxu0 }
 0x119   :  { %v1145_v24 = vadd.f32 %v1144_v22, %v1143_v19  ;;  %v1146_v25 = vpop.f32.mrb[18].mxu1  ;;  %v1083_v26 = vpop.f32.mrb[19].mxu0 }
 0x11a   :  { %v665_v27 = vadd.f32 %v1081_v21, %v1590_v18  ;;  %v1084_v28 = vadd.f32 %v1083_v26, %v1082_v23  ;;  %v1147_v29 = vpop.f32.mrb[19].mxu1 }
 0x11b   :  { %v1148_v30 = vadd.f32 %v1147_v29, %v1146_v25 }
 0x11c   :  { %v668_v32 = vadd.f32 %v1084_v28, %v1590_v18  ;;  %v762_v34 = vadd.f32 %v1145_v24, %v665_v27 }
 0x11e   :  { %v1085_v35 = vpop.f32.mrb[20].mxu0  ;;  %v1618_v36 = vadd.f32 %v1148_v30, %v668_v32 }
 0x11f   :  { %v1149_v37 = vpop.f32.mrb[20].mxu1  ;;  %v1086_v38 = vpop.f32.mrb[21].mxu0 }
 0x120   :  { %v1087_v39 = vadd.f32 %v1086_v38, %v1085_v35  ;;  %v1150_v40 = vpop.f32.mrb[21].mxu1  ;;  %v1088_v41 = vpop.f32.mrb[22].mxu0 }
 0x121   :  { %v1151_v42 = vadd.f32 %v1150_v40, %v1149_v37  ;;  %v1152_v43 = vpop.f32.mrb[22].mxu1  ;;  %v1089_v44 = vpop.f32.mrb[23].mxu0 }
 0x122   :  { %v673_v45 = vadd.f32 %v1087_v39, %v1590_v18  ;;  %v1090_v46 = vadd.f32 %v1089_v44, %v1088_v41  ;;  %v1153_v48 = vpop.f32.mrb[23].mxu1 }
 0x123   :  { %v1154_v50 = vadd.f32 %v1153_v48, %v1152_v43 }
 0x124   :  { %v676_v51 = vadd.f32 %v1090_v46, %v1590_v18  ;;  %v770_v52 = vadd.f32 %v1151_v42, %v673_v45 }
 0x126   :  { %v1091_v53 = vpop.f32.mrb[24].mxu0  ;;  %v773_v54 = vadd.f32 %v1154_v50, %v676_v51 }
 0x127   :  { %v1155_v55 = vpop.f32.mrb[24].mxu1  ;;  %v1092_v56 = vpop.f32.mrb[25].mxu0 }
 0x128   :  { %v1093_v57 = vadd.f32 %v1092_v56, %v1091_v53  ;;  %v1156_v58 = vpop.f32.mrb[25].mxu1  ;;  %v1094_v59 = vpop.f32.mrb[26].mxu0 }
 0x129   :  { %v1157_v60 = vadd.f32 %v1156_v58, %v1155_v55  ;;  %v1158_v61 = vpop.f32.mrb[26].mxu1  ;;  %v1095_v62 = vpop.f32.mrb[27].mxu0 }
 0x12a   :  { %v681_v0 = vadd.f32 %v1093_v57, %v1590_v18  ;;  %v1096_v2 = vadd.f32 %v1095_v62, %v1094_v59  ;;  %v1159_v3 = vpop.f32.mrb[27].mxu1 }
 0x12b   :  { %v1160_v4 = vadd.f32 %v1159_v3, %v1158_v61 }
 0x12c   :  { %v684_v5 = vadd.f32 %v1096_v2, %v1590_v18  ;;  %v1624_v6 = vadd.f32 %v1157_v60, %v681_v0 }
 0x12e   :  { %v1097_v7 = vpop.f32.mrb[28].mxu0  ;;  %v1626_v8 = vadd.f32 %v1160_v4, %v684_v5 }
 0x12f   :  { %v1161_v9 = vpop.f32.mrb[28].mxu1  ;;  %v1098_v10 = vpop.f32.mrb[29].mxu0 }
 0x130   :  { %v1099_v11 = vadd.f32 %v1098_v10, %v1097_v7  ;;  %v1162_v12 = vpop.f32.mrb[29].mxu1  ;;  %v1100_v13 = vpop.f32.mrb[30].mxu0 }
 0x131   :  { %v1163_v14 = vadd.f32 %v1162_v12, %v1161_v9  ;;  %v1164_v16 = vpop.f32.mrb[30].mxu1  ;;  %v1101_v19 = vpop.f32.mrb[31].mxu0 }
 0x132   :  { %v689_v20 = vadd.f32 %v1099_v11, %v1590_v18  ;;  %v1102_v21 = vadd.f32 %v1101_v19, %v1100_v13  ;;  %v1165_v22 = vpop.f32.mrb[31].mxu1 }
 0x133   :  { %v1166_v23 = vadd.f32 %v1165_v22, %v1164_v16 }
 0x134   :  { %v692_v24 = vadd.f32 %v1102_v21, %v1590_v18  ;;  %v786_v25 = vadd.f32 %v1163_v14, %v689_v20 }
 0x136   :  { %v1201_v26 = vpop.f32.mrb[32].mxu0  ;;  %v1630_v27 = vadd.f32 %v1166_v23, %v692_v24 }
 0x137   :  { %v835_v28 = vadd.f32 %v1201_v26, %v1600_v47  ;;  %v1209_v29 = vpop.f32.mrb[32].mxu1  ;;  %v826_v30 = vpop.f32.mrb[33].mxu0 }
 0x138   :  { %v867_v32 = vadd.f32 %v1209_v29, %v770_v52  ;;  %v827_v35 = vadd.f32 %v826_v30, %v1594_v31  ;;  %v858_v37 = vpop.f32.mrb[33].mxu1  ;;  %v1202_v38 = vpop.f32.mrb[34].mxu0 }
 0x139   :  { %vm891_vm1 = vcmp.ge.f32.partialorder %v835_v28, 0.0  ;;  %v907_v39 = vmul.f32 0.01, %v835_v28  ;;  %v859_v40 = vadd.f32 %v858_v37, %v762_v34  ;;  %v838_v41 = vadd.f32 %v1202_v38, %v1602_v49  ;;  %v1210_v18 = vpop.f32.mrb[34].mxu1  ;;  %v829_v42 = vpop.f32.mrb[35].mxu0 }
 0x13a   :  { %vm899_vm2 = vcmp.ge.f32.partialorder %v867_v32, 0.0  ;;  %v915_v43 = vmul.f32 0.01, %v867_v32  ;;  %vm889_vm3 = vcmp.ge.f32.partialorder %v827_v35, 0.0  ;;  %v905_v44 = vmul.f32 0.01, %v827_v35 }
 0x13b   :  { %v923_v47 = vsel %vm891_vm1, %v835_v28, %v907_v39  ;;  %vm897_vm4 = vcmp.ge.f32.partialorder %v859_v40, 0.0  ;;  %v913_v45 = vmul.f32 0.01, %v859_v40  ;;  %vm892_vm5 = vcmp.ge.f32.partialorder %v838_v41, 0.0  ;;  %v861_v46 = vpop.f32.mrb[35].mxu1 }
 0x13c   :  { %940 = vst.msk [vmem:[%s1711_s3 + $0x10] sm:$0xff] %vm937_vm0, %v923_v47  ;;  %v931_v31 = vsel %vm899_vm2, %v867_v32, %v915_v43  ;;  %v921_v34 = vsel %vm889_vm3, %v827_v35, %v905_v44  ;;  %v908_v48 = vmul.f32 0.01, %v838_v41  ;;  %v870_v49 = vadd.f32 %v1210_v18, %v773_v54 }
 0x13d   :  { %948 = vst.msk [vmem:[%s1711_s3 + $0x50] sm:$0xff] %vm937_vm0, %v931_v31  ;;  %938 = vst.msk [vmem:[%s1711_s3] sm:$0xff] %vm937_vm0, %v921_v34  ;;  %v929_v50 = vsel %vm897_vm4, %v859_v40, %v913_v45  ;;  %v830_v51 = vadd.f32 %v829_v42, %v1596_v33  ;;  %v862_v52 = vadd.f32 %v861_v46, %v1618_v36 }
 0x13e   :  { %946 = vst.msk [vmem:[%s1711_s3 + $0x40] sm:$0xff] %vm937_vm0, %v929_v50  ;;  %v924_v53 = vsel %vm892_vm5, %v838_v41, %v908_v48  ;;  %vm900_vm6 = vcmp.ge.f32.partialorder %v870_v49, 0.0  ;;  %v916_v54 = vmul.f32 0.01, %v870_v49  ;;  %v1205_v55 = vpop.f32.mrb[36].mxu0 }
 0x13f   :  { %941 = vst.msk [vmem:[%s1711_s3 + $0x18] sm:$0xff] %vm937_vm0, %v924_v53  ;;  %vm890_vm7 = vcmp.ge.f32.partialorder %v830_v51, 0.0  ;;  %v906_v56 = vmul.f32 0.01, %v830_v51  ;;  %vm898_vm8 = vcmp.ge.f32.partialorder %v862_v52, 0.0  ;;  %v851_v36 = vadd.f32 %v1205_v55, %v1612_v15  ;;  %v1213_v58 = vpop.f32.mrb[36].mxu1 }
 0x140   :  { %v914_v33 = vmul.f32 0.01, %v862_v52  ;;  %v932_v57 = vsel %vm900_vm6, %v870_v49, %v916_v54  ;;  %v842_v59 = vpop.f32.mrb[37].mxu0  ;;  %v883_v62 = vadd.f32 %v1213_v58, %v786_v25  ;;  %v874_v2 = vpop.f32.mrb[37].mxu1 }
 0x141   :  { %949 = vst.msk [vmem:[%s1711_s3 + $0x58] sm:$0xff] %vm937_vm0, %v932_v57  ;;  %v922_v60 = vsel %vm890_vm7, %v830_v51, %v906_v56  ;;  %v843_v0 = vadd.f32 %v842_v59, %v1606_v63  ;;  %v1206_v3 = vpop.f32.mrb[38].mxu0  ;;  %vm895_vm9 = vcmp.ge.f32.partialorder %v851_v36, 0.0  ;;  %v911_v15 = vmul.f32 0.01, %v851_v36  ;;  %v1214_v7 = vpop.f32.mrb[38].mxu1 }
 0x142   :  { %v930_v61 = vsel %vm898_vm8, %v862_v52, %v914_v33  ;;  %939 = vst.msk [vmem:[%s1711_s3 + $0x8] sm:$0xff] %vm937_vm0, %v922_v60  ;;  %v875_v4 = vadd.f32 %v874_v2, %v1624_v6  ;;  %v854_v5 = vadd.f32 %v1206_v3, %v1614_v17  ;;  %v845_v63 = vpop.f32.mrb[39].mxu0  ;;  %vm903_vm10 = vcmp.ge.f32.partialorder %v883_v62, 0.0  ;;  %v877_v13 = vpop.f32.mrb[39].mxu1 }
 0x143   :  { %947 = vst.msk [vmem:[%s1711_s3 + $0x48] sm:$0xff] %vm937_vm0, %v930_v61  ;;  %v919_v9 = vmul.f32 0.01, %v883_v62  ;;  %vm893_vm11 = vcmp.ge.f32.partialorder %v843_v0, 0.0  ;;  %v909_v10 = vmul.f32 0.01, %v843_v0  ;;  %v927_v11 = vsel %vm895_vm9, %v851_v36, %v911_v15 }
 0x144   :  { %vm901_vm12 = vcmp.ge.f32.partialorder %v875_v4, 0.0  ;;  %v917_v12 = vmul.f32 0.01, %v875_v4  ;;  %vm896_vm13 = vcmp.ge.f32.partialorder %v854_v5, 0.0  ;;  %944 = vst.msk [vmem:[%s1711_s3 + $0x30] sm:$0xff] %vm937_vm0, %v927_v11  ;;  %v886_v17 = vadd.f32 %v1214_v7, %v1630_v27 }
 0x145   :  { %v935_v14 = vsel %vm903_vm10, %v883_v62, %v919_v9  ;;  %v925_v6 = vsel %vm893_vm11, %v843_v0, %v909_v10  ;;  %v912_v16 = vmul.f32 0.01, %v854_v5  ;;  %v846_v20 = vadd.f32 %v845_v63, %v1608_v1 }
 0x146   :  { %952 = vst.msk [vmem:[%s1711_s3 + $0x70] sm:$0xff] %vm937_vm0, %v935_v14  ;;  %942 = vst.msk [vmem:[%s1711_s3 + $0x20] sm:$0xff] %vm937_vm0, %v925_v6  ;;  %v933_v19 = vsel %vm901_vm12, %v875_v4, %v917_v12  ;;  %v878_v21 = vadd.f32 %v877_v13, %v1626_v8  ;;  %vm904_vm14 = vcmp.ge.f32.partialorder %v886_v17, 0.0  ;;  %v920_v23 = vmul.f32 0.01, %v886_v17 }
 0x147   :  { %950 = vst.msk [vmem:[%s1711_s3 + $0x60] sm:$0xff] %vm937_vm0, %v933_v19  ;;  %v928_v22 = vsel %vm896_vm13, %v854_v5, %v912_v16  ;;  %vm894_vm15 = vcmp.ge.f32.partialorder %v846_v20, 0.0  ;;  %v910_v24 = vmul.f32 0.01, %v846_v20 }
 0x148   :  { %945 = vst.msk [vmem:[%s1711_s3 + $0x38] sm:$0xff] %vm937_vm0, %v928_v22  ;;  %vm902_vm1 = vcmp.ge.f32.partialorder %v878_v21, 0.0  ;;  %v918_v25 = vmul.f32 0.01, %v878_v21  ;;  %v936_v1 = vsel %vm904_vm14, %v886_v17, %v920_v23 }
 0x149   :  { %953 = vst.msk [vmem:[%s1711_s3 + $0x78] sm:$0xff] %vm937_vm0, %v936_v1  ;;  %v926_v8 = vsel %vm894_vm15, %v846_v20, %v910_v24 }
 0x14a   :  { %v934_v26 = vsel %vm902_vm1, %v878_v21, %v918_v25  ;;  %943 = vst.msk [vmem:[%s1711_s3 + $0x28] sm:$0xff] %vm937_vm0, %v926_v8 }
 0x14b   :  { %951 = vst.msk [vmem:[%s1711_s3 + $0x68] sm:$0xff] %vm937_vm0, %v934_v26 }

// kernel: classifier_forward.8
= control target key start
LH: loop header
LB: loop body
LE: loop exit
PB: predicated region body
PF: predicated region fallthrough
CT: control target
= control target key end

     0   :  { %s1691_s1 = inlined_call_operand.vmem [shape: bf16[640,128], index: 1, kind: input, shape index: {}]   ;;  %s1692_s0 = inlined_call_operand.vmem [shape: bf16[128,640], index: 0, kind: input, shape index: {}]   ;;  %s1693_s2 = inlined_call_operand.vmem [shape: f32[1,128], index: 2, kind: input, shape index: {}]   ;;  %s1694_s3 = inlined_call_operand.vmem [shape: f32[128,128], index: 3, kind: output, shape index: {}]  }
   0x1   :  { %v1230_v0 = vld [vmem:[%s1691_s1 + $0x40] sm:$0xff]   ;;  %v1234_v4 = vld [vmem:[%s1691_s1 + $0x48] sm:$0xff]   ;;  %v1238_v8 = vld [vmem:[%s1691_s1 + $0x50] sm:$0xff]  }
   0x2   :  { %v1231_v1 = vld [vmem:[%s1691_s1 + $0xc0] sm:$0xff]   ;;  %1038 = vmatprep.subr.bf16.mxu0 %v1230_v0  ;;  %v1235_v5 = vld [vmem:[%s1691_s1 + $0xc8] sm:$0xff]   ;;  %v1239_v9 = vld [vmem:[%s1691_s1 + $0xd0] sm:$0xff]  }
   0x3   :  { %v1232_v2 = vld [vmem:[%s1691_s1] sm:$0xff]   ;;  %1102 = vmatprep.subr.bf16.mxu1 %v1231_v1  ;;  %v1236_v6 = vld [vmem:[%s1691_s1 + $0x8] sm:$0xff]   ;;  %v1240_v10 = vld [vmem:[%s1691_s1 + $0x10] sm:$0xff]  }
   0x4   :  { %v1233_v3 = vld [vmem:[%s1691_s1 + $0x80] sm:$0xff]   ;;  %1039 = vmatpush3.bf16.msra.mxu0 %v1232_v2  ;;  %v1237_v7 = vld [vmem:[%s1691_s1 + $0x88] sm:$0xff]   ;;  %v1241_v11 = vld [vmem:[%s1691_s1 + $0x90] sm:$0xff]  }
   0x5   :  { %1103 = vmatpush3.bf16.msra.mxu1 %v1233_v3  ;;  %1040 = vmatprep.subr.bf16.mxu0 %v1234_v4  ;;  %v1242_v12 = vld [vmem:[%s1691_s1 + $0x58] sm:$0xff]   ;;  %v1246_v16 = vld [vmem:[%s1691_s1 + $0x60] sm:$0xff]   ;;  %v1250_v20 = vld [vmem:[%s1691_s1 + $0x68] sm:$0xff]  }
   0x6   :  { %1104 = vmatprep.subr.bf16.mxu1 %v1235_v5  ;;  %v1243_v13 = vld [vmem:[%s1691_s1 + $0xd8] sm:$0xff]   ;;  %v1247_v17 = vld [vmem:[%s1691_s1 + $0xe0] sm:$0xff]   ;;  %v1251_v21 = vld [vmem:[%s1691_s1 + $0xe8] sm:$0xff]  }
   0x7   :  { %v1244_v14 = vld [vmem:[%s1691_s1 + $0x18] sm:$0xff]   ;;  %v1248_v18 = vld [vmem:[%s1691_s1 + $0x20] sm:$0xff]   ;;  %v1252_v22 = vld [vmem:[%s1691_s1 + $0x28] sm:$0xff]  }
   0x8   :  { %1041 = vmatpush3.bf16.msra.mxu0 %v1236_v6  ;;  %v1245_v15 = vld [vmem:[%s1691_s1 + $0x98] sm:$0xff]   ;;  %v1249_v19 = vld [vmem:[%s1691_s1 + $0xa0] sm:$0xff]   ;;  %v1253_v23 = vld [vmem:[%s1691_s1 + $0xa8] sm:$0xff]  }
   0x9   :  { %1105 = vmatpush3.bf16.msra.mxu1 %v1237_v7  ;;  %1042 = vmatprep.subr.bf16.mxu0 %v1238_v8  ;;  %v1254_v24 = vld [vmem:[%s1691_s1 + $0x70] sm:$0xff]   ;;  %v1258_v28 = vld [vmem:[%s1691_s1 + $0x78] sm:$0xff]   ;;  %v1267_v35 = vld [vmem:[%s1692_s0 + $0xc] ss:$20 sps:$4 sm:$0xff]  }
   0xa   :  { %1106 = vmatprep.subr.bf16.mxu1 %v1239_v9  ;;  %v1255_v25 = vld [vmem:[%s1691_s1 + $0xf0] sm:$0xff]   ;;  %v1259_v29 = vld [vmem:[%s1691_s1 + $0xf8] sm:$0xff]   ;;  %v1268_v36 = vld [vmem:[%s1691_s1 + $0x100] sm:$0xff]   ;;  %727 = vmatprep.mubr.bf16.mxu1 %v1267_v35 }
   0xb   :  { %v1256_v26 = vld [vmem:[%s1691_s1 + $0x30] sm:$0xff]   ;;  %v1260_v30 = vld [vmem:[%s1691_s1 + $0x38] sm:$0xff]   ;;  %v1269_v37 = vld [vmem:[%s1692_s0 + $0x2c] ss:$20 sps:$4 sm:$0xff]  }
   0xc   :  { %1043 = vmatpush3.bf16.msra.mxu0 %v1240_v10  ;;  %v1257_v27 = vld [vmem:[%s1691_s1 + $0xb0] sm:$0xff]   ;;  %v1261_v31 = vld [vmem:[%s1691_s1 + $0xb8] sm:$0xff]   ;;  %v1275_v39 = vld [vmem:[%s1691_s1 + $0x108] sm:$0xff]  }
   0xd   :  { %1107 = vmatpush3.bf16.msra.mxu1 %v1241_v11  ;;  %1044 = vmatprep.subr.bf16.mxu0 %v1242_v12  ;;  %v1262_v32 = vld [vmem:[%s1692_s0] ss:$20 sps:$4 sm:$0xff]   ;;  %v1264_v33 = vld [vmem:[%s1692_s0 + $0x4] ss:$20 sps:$4 sm:$0xff]   ;;  %v1265_v34 = vld [vmem:[%s1692_s0 + $0x8] ss:$20 sps:$4 sm:$0xff]  }
   0xe   :  { %1108 = vmatprep.subr.bf16.mxu1 %v1243_v13  ;;  %630 = vmatprep.mubr.bf16.mxu0 %v1264_v33  ;;  %v1271_v38 = vld [vmem:[%s1692_s0 + $0x34] ss:$20 sps:$4 sm:$0xff]   ;;  %v1274_v41 = vld [vmem:[%s1692_s0 + $0x30] ss:$20 sps:$4 sm:$0xff]   ;;  %v1289_v45 = vld [vmem:[%s1691_s1 + $0x118] sm:$0xff]  }
   0xf   :  { %v1273_v40 = vld [vmem:[%s1692_s0 + $0x28] ss:$20 sps:$4 sm:$0xff]   ;;  %v1282_v44 = vld [vmem:[%s1691_s1 + $0x110] sm:$0xff]   ;;  %v1281_v47 = vld [vmem:[%s1692_s0 + $0x58] ss:$20 sps:$4 sm:$0xff]  }
  0x10   :  { %1045 = vmatpush3.bf16.msra.mxu0 %v1244_v14  ;;  %v1276_v42 = vld [vmem:[%s1692_s0 + $0x54] ss:$20 sps:$4 sm:$0xff]   ;;  %v1278_v43 = vld [vmem:[%s1692_s0 + $0x5c] ss:$20 sps:$4 sm:$0xff]   ;;  %v1285_v49 = vld [vmem:[%s1692_s0 + $0x84] ss:$20 sps:$4 sm:$0xff]  }
  0x11   :  { %1109 = vmatpush3.bf16.msra.mxu1 %v1245_v15  ;;  %1046 = vmatprep.subr.bf16.mxu0 %v1246_v16  ;;  %v1280_v46 = vld [vmem:[%s1692_s0 + $0x50] ss:$20 sps:$4 sm:$0xff]   ;;  %v1303_v51 = vld [vmem:[%s1691_s1 + $0x128] sm:$0xff]   ;;  %v1288_v53 = vld [vmem:[%s1692_s0 + $0x80] ss:$20 sps:$4 sm:$0xff]  }
  0x12   :  { %1110 = vmatprep.subr.bf16.mxu1 %v1247_v17  ;;  %v1283_v48 = vld [vmem:[%s1692_s0 + $0x7c] ss:$20 sps:$4 sm:$0xff]   ;;  %v1296_v50 = vld [vmem:[%s1691_s1 + $0x120] sm:$0xff]   ;;  %v1287_v52 = vld [vmem:[%s1692_s0 + $0x78] ss:$20 sps:$4 sm:$0xff]  }
  0x13   :  { %v1290_v54 = vld [vmem:[%s1692_s0 + $0xa4] ss:$20 sps:$4 sm:$0xff]   ;;  %v1310_v55 = vld [vmem:[%s1691_s1 + $0x130] sm:$0xff]   ;;  %v1292_v56 = vld [vmem:[%s1692_s0 + $0xac] ss:$20 sps:$4 sm:$0xff]  }
  0x14   :  { %1047 = vmatpush3.bf16.msra.mxu0 %v1248_v18  ;;  %v1317_v57 = vld [vmem:[%s1691_s1 + $0x138] sm:$0xff]   ;;  %v1294_v58 = vld [vmem:[%s1692_s0 + $0xa0] ss:$20 sps:$4 sm:$0xff]   ;;  %v1302_v63 = vld [vmem:[%s1692_s0 + $0xd0] ss:$20 sps:$4 sm:$0xff]  }
  0x15   :  { %1111 = vmatpush3.bf16.msra.mxu1 %v1249_v19  ;;  %1048 = vmatprep.subr.bf16.mxu0 %v1250_v20  ;;  %v1295_v59 = vld [vmem:[%s1692_s0 + $0xa8] ss:$20 sps:$4 sm:$0xff]   ;;  %v1297_v60 = vld [vmem:[%s1692_s0 + $0xcc] ss:$20 sps:$4 sm:$0xff]   ;;  %v1308_v2 = vld [vmem:[%s1692_s0 + $0xf0] ss:$20 sps:$4 sm:$0xff]  }
  0x16   :  { %1112 = vmatprep.subr.bf16.mxu1 %v1251_v21  ;;  %v1299_v61 = vld [vmem:[%s1692_s0 + $0xd4] ss:$20 sps:$4 sm:$0xff]   ;;  %v1306_v1 = vld [vmem:[%s1692_s0 + $0xfc] ss:$20 sps:$4 sm:$0xff]   ;;  %v1309_v3 = vld [vmem:[%s1692_s0 + $0xf8] ss:$20 sps:$4 sm:$0xff]  }
  0x17   :  { %v1301_v62 = vld [vmem:[%s1692_s0 + $0xc8] ss:$20 sps:$4 sm:$0xff]   ;;  %v1313_v5 = vld [vmem:[%s1692_s0 + $0x124] ss:$20 sps:$4 sm:$0xff]   ;;  %v1316_v7 = vld [vmem:[%s1692_s0 + $0x120] ss:$20 sps:$4 sm:$0xff]  }
  0x18   :  { %1049 = vmatpush3.bf16.msra.mxu0 %v1252_v22  ;;  %v1304_v0 = vld [vmem:[%s1692_s0 + $0xf4] ss:$20 sps:$4 sm:$0xff]   ;;  %v1311_v4 = vld [vmem:[%s1692_s0 + $0x11c] ss:$20 sps:$4 sm:$0xff]   ;;  %v1315_v6 = vld [vmem:[%s1692_s0 + $0x118] ss:$20 sps:$4 sm:$0xff]  }
  0x19   :  { %1113 = vmatpush3.bf16.msra.mxu1 %v1253_v23  ;;  %1050 = vmatprep.subr.bf16.mxu0 %v1254_v24  ;;  %v1318_v8 = vld [vmem:[%s1692_s0 + $0x10] ss:$20 sps:$4 sm:$0xff]   ;;  %v1320_v10 = vld [vmem:[%s1692_s0 + $0x38] ss:$20 sps:$4 sm:$0xff]   ;;  %v1322_v12 = vld [vmem:[%s1692_s0 + $0x60] ss:$20 sps:$4 sm:$0xff]  }
  0x1a   :  { %1114 = vmatprep.subr.bf16.mxu1 %v1255_v25  ;;  %v1319_v9 = vld [vmem:[%s1692_s0 + $0xb0] ss:$20 sps:$4 sm:$0xff]   ;;  %v1321_v11 = vld [vmem:[%s1692_s0 + $0xd8] ss:$20 sps:$4 sm:$0xff]   ;;  %v1323_v13 = vld [vmem:[%s1692_s0 + $0x100] ss:$20 sps:$4 sm:$0xff]  }
  0x1b   :  { %v1324_v14 = vld [vmem:[%s1692_s0 + $0x88] ss:$20 sps:$4 sm:$0xff]   ;;  %v1589_v18 = vld [vmem:[%s1693_s2] ss:$0 sm:$0xff] }
  0x1c   :  { %1051 = vmatpush3.bf16.msra.mxu0 %v1256_v26  ;;  %v1325_v15 = vld [vmem:[%s1692_s0 + $0x128] ss:$20 sps:$4 sm:$0xff]  }
  0x1d   :  { %1115 = vmatpush3.bf16.msra.mxu1 %v1257_v27  ;;  %1052 = vmatprep.subr.bf16.mxu0 %v1258_v28 }
  0x1e   :  { %1116 = vmatprep.subr.bf16.mxu1 %v1259_v29 }
  0x20   :  { %1053 = vmatpush3.bf16.msra.mxu0 %v1260_v30 }
  0x21   :  { %1117 = vmatpush3.bf16.msra.mxu1 %v1261_v31  ;;  %1182 = vmatprep.subr.bf16.mxu0 %v1268_v36 }
  0x22   :  { %1214 = vmatprep.subr.bf16.mxu1 %v1268_v36 }
  0x23   :  { %631 = vmatmul.mubr.bf16.vlgmr.msra.gmra.mrb[0].mxu0 %v1262_v32 }
  0x24   :  { %728 = vmatmul.mubr.bf16.vlgmr.msra.gmra.mrb[0].mxu1 %v1265_v34  ;;  %1183 = vmatpush3.bf16.msra.mxu0 %v1268_v36 }
  0x25   :  { %1222 = vmatpush3.bf16.msra.mxu1 %v1268_v36  ;;  %638 = vmatprep.mubr.bf16.mxu0 %v1269_v37 }
  0x26   :  { %735 = vmatprep.mubr.bf16.mxu1 %v1271_v38  ;;  %1184 = vmatprep.subr.bf16.mxu0 %v1275_v39 }
  0x27   :  { %1215 = vmatprep.subr.bf16.mxu1 %v1275_v39 }
  0x28   :  { %1185 = vmatpush3.bf16.msra.mxu0 %v1275_v39 }
  0x29   :  { %1223 = vmatpush3.bf16.msra.mxu1 %v1275_v39  ;;  %1186 = vmatprep.subr.bf16.mxu0 %v1282_v44 }
  0x2a   :  { %1216 = vmatprep.subr.bf16.mxu1 %v1282_v44 }
  0x2b   :  { %639 = vmatmul.mubr.bf16.gmra.mrb[4].mxu0 %v1273_v40 }
  0x2c   :  { %736 = vmatmul.mubr.bf16.gmra.mrb[4].mxu1 %v1274_v41  ;;  %646 = vmatprep.mubr.bf16.mxu0 %v1276_v42 }
  0x2d   :  { %743 = vmatprep.mubr.bf16.mxu1 %v1278_v43  ;;  %1187 = vmatpush3.bf16.msra.mxu0 %v1282_v44 }
  0x2e   :  { %1224 = vmatpush3.bf16.msra.mxu1 %v1282_v44  ;;  %1188 = vmatprep.subr.bf16.mxu0 %v1289_v45 }
  0x2f   :  { %1217 = vmatprep.subr.bf16.mxu1 %v1289_v45 }
  0x31   :  { %1189 = vmatpush3.bf16.msra.mxu0 %v1289_v45 }
  0x32   :  { %1225 = vmatpush3.bf16.msra.mxu1 %v1289_v45  ;;  %1190 = vmatprep.subr.bf16.mxu0 %v1296_v50 }
  0x33   :  { %647 = vmatmul.mubr.bf16.gmra.mrb[8].mxu0 %v1280_v46  ;;  %1218 = vmatprep.subr.bf16.mxu1 %v1296_v50 }
  0x34   :  { %744 = vmatmul.mubr.bf16.gmra.mrb[8].mxu1 %v1281_v47  ;;  %654 = vmatprep.mubr.bf16.mxu0 %v1283_v48 }
  0x35   :  { %751 = vmatprep.mubr.bf16.mxu1 %v1285_v49  ;;  %1191 = vmatpush3.bf16.msra.mxu0 %v1296_v50 }
  0x36   :  { %1226 = vmatpush3.bf16.msra.mxu1 %v1296_v50  ;;  %1192 = vmatprep.subr.bf16.mxu0 %v1303_v51 }
  0x37   :  { %1219 = vmatprep.subr.bf16.mxu1 %v1303_v51 }
  0x39   :  { %1193 = vmatpush3.bf16.msra.mxu0 %v1303_v51 }
  0x3a   :  { %1227 = vmatpush3.bf16.msra.mxu1 %v1303_v51  ;;  %1194 = vmatprep.subr.bf16.mxu0 %v1310_v55 }
  0x3b   :  { %655 = vmatmul.mubr.bf16.gmra.mrb[12].mxu0 %v1287_v52  ;;  %1220 = vmatprep.subr.bf16.mxu1 %v1310_v55 }
  0x3c   :  { %752 = vmatmul.mubr.bf16.gmra.mrb[12].mxu1 %v1288_v53  ;;  %662 = vmatprep.mubr.bf16.mxu0 %v1290_v54 }
  0x3d   :  { %759 = vmatprep.mubr.bf16.mxu1 %v1292_v56  ;;  %1195 = vmatpush3.bf16.msra.mxu0 %v1310_v55 }
  0x3e   :  { %1228 = vmatpush3.bf16.msra.mxu1 %v1310_v55  ;;  %1196 = vmatprep.subr.bf16.mxu0 %v1317_v57 }
  0x3f   :  { %1221 = vmatprep.subr.bf16.mxu1 %v1317_v57 }
  0x41   :  { %1197 = vmatpush3.bf16.msra.mxu0 %v1317_v57 }
  0x42   :  { %1229 = vmatpush3.bf16.msra.mxu1 %v1317_v57 }
  0x43   :  { %663 = vmatmul.mubr.bf16.gmra.mrb[16].mxu0 %v1294_v58 }
  0x44   :  { %760 = vmatmul.mubr.bf16.gmra.mrb[16].mxu1 %v1295_v59  ;;  %670 = vmatprep.mubr.bf16.mxu0 %v1297_v60 }
  0x45   :  { %767 = vmatprep.mubr.bf16.mxu1 %v1299_v61 }
  0x4b   :  { %671 = vmatmul.mubr.bf16.gmra.mrb[20].mxu0 %v1301_v62 }
  0x4c   :  { %768 = vmatmul.mubr.bf16.gmra.mrb[20].mxu1 %v1302_v63  ;;  %678 = vmatprep.mubr.bf16.mxu0 %v1304_v0 }
  0x4d   :  { %775 = vmatprep.mubr.bf16.mxu1 %v1306_v1 }
  0x53   :  { %679 = vmatmul.mubr.bf16.gmra.mrb[24].mxu0 %v1308_v2 }
  0x54   :  { %776 = vmatmul.mubr.bf16.gmra.mrb[24].mxu1 %v1309_v3  ;;  %686 = vmatprep.mubr.bf16.mxu0 %v1311_v4 }
  0x55   :  { %783 = vmatprep.mubr.bf16.mxu1 %v1313_v5 }
  0x5b   :  { %687 = vmatmul.mubr.bf16.gmra.mrb[28].mxu0 %v1315_v6 }
  0x5c   :  { %784 = vmatmul.mubr.bf16.gmra.mrb[28].mxu1 %v1316_v7  ;;  %1198 = vmatprep.mubr.bf16.mxu0 %v1318_v8 }
  0x5d   :  { %1206 = vmatprep.mubr.bf16.mxu1 %v1319_v9 }
  0x63   :  { %1199 = vmatmul.mubr.bf16.vlgmr.msra.gmra.mrb[32].mxu0 %v1320_v10 }
  0x64   :  { %1207 = vmatmul.mubr.bf16.vlgmr.msra.gmra.mrb[32].mxu1 %v1321_v11  ;;  %1202 = vmatprep.mubr.bf16.mxu0 %v1322_v12 }
  0x65   :  { %1210 = vmatprep.mubr.bf16.mxu1 %v1323_v13 }
  0x6b   :  { %1203 = vmatmul.mubr.bf16.gmra.mrb[36].mxu0 %v1324_v14 }
  0x6c   :  { %1211 = vmatmul.mubr.bf16.gmra.mrb[36].mxu1 %v1325_v15 }
  0xf6   :  { %v1054_v16 = vpop.f32.mrb[0].mxu0 }
  0xf7   :  { %v1118_v17 = vpop.f32.mrb[0].mxu1  ;;  %v1055_v19 = vpop.f32.mrb[1].mxu0 }
  0xf8   :  { %v1056_v20 = vadd.f32 %v1055_v19, %v1054_v16  ;;  %v1119_v21 = vpop.f32.mrb[1].mxu1  ;;  %v1057_v22 = vpop.f32.mrb[2].mxu0 }
  0xf9   :  { %v1120_v23 = vadd.f32 %v1119_v21, %v1118_v17  ;;  %v1121_v24 = vpop.f32.mrb[2].mxu1  ;;  %v1058_v25 = vpop.f32.mrb[3].mxu0 }
  0xfa   :  { %v633_v26 = vadd.f32 %v1056_v20, %v1589_v18  ;;  %v1059_v27 = vadd.f32 %v1058_v25, %v1057_v22  ;;  %v1122_v28 = vpop.f32.mrb[3].mxu1 }
  0xfb   :  { %v1123_v29 = vadd.f32 %v1122_v28, %v1121_v24 }
  0xfc   :  { %v636_v30 = vadd.f32 %v1059_v27, %v1589_v18  ;;  %v1593_v31 = vadd.f32 %v1120_v23, %v633_v26 }
  0xfe   :  { %v1060_v32 = vpop.f32.mrb[4].mxu0  ;;  %v1595_v33 = vadd.f32 %v1123_v29, %v636_v30 }
  0xff   :  { %v1124_v34 = vpop.f32.mrb[4].mxu1  ;;  %v1061_v35 = vpop.f32.mrb[5].mxu0 }
 0x100   :  { %v1062_v36 = vadd.f32 %v1061_v35, %v1060_v32  ;;  %v1125_v37 = vpop.f32.mrb[5].mxu1  ;;  %v1063_v38 = vpop.f32.mrb[6].mxu0 }
 0x101   :  { %v1126_v39 = vadd.f32 %v1125_v37, %v1124_v34  ;;  %v1127_v40 = vpop.f32.mrb[6].mxu1  ;;  %v1064_v41 = vpop.f32.mrb[7].mxu0 }
 0x102   :  { %v641_v42 = vadd.f32 %v1062_v36, %v1589_v18  ;;  %v1065_v43 = vadd.f32 %v1064_v41, %v1063_v38  ;;  %v1128_v44 = vpop.f32.mrb[7].mxu1 }
 0x103   :  { %v1129_v45 = vadd.f32 %v1128_v44, %v1127_v40 }
 0x104   :  { %v644_v46 = vadd.f32 %v1065_v43, %v1589_v18  ;;  %v1599_v47 = vadd.f32 %v1126_v39, %v641_v42 }
 0x106   :  { %v1066_v48 = vpop.f32.mrb[8].mxu0  ;;  %v1601_v49 = vadd.f32 %v1129_v45, %v644_v46 }
 0x107   :  { %v1130_v50 = vpop.f32.mrb[8].mxu1  ;;  %v1067_v51 = vpop.f32.mrb[9].mxu0 }
 0x108   :  { %v1068_v52 = vadd.f32 %v1067_v51, %v1066_v48  ;;  %v1131_v53 = vpop.f32.mrb[9].mxu1  ;;  %v1069_v54 = vpop.f32.mrb[10].mxu0 }
 0x109   :  { %v1132_v55 = vadd.f32 %v1131_v53, %v1130_v50  ;;  %v1133_v56 = vpop.f32.mrb[10].mxu1  ;;  %v1070_v57 = vpop.f32.mrb[11].mxu0 }
 0x10a   :  { %v649_v58 = vadd.f32 %v1068_v52, %v1589_v18  ;;  %v1071_v59 = vadd.f32 %v1070_v57, %v1069_v54  ;;  %v1134_v60 = vpop.f32.mrb[11].mxu1 }
 0x10b   :  { %v1135_v61 = vadd.f32 %v1134_v60, %v1133_v56 }
 0x10c   :  { %v652_v62 = vadd.f32 %v1071_v59, %v1589_v18  ;;  %v1605_v63 = vadd.f32 %v1132_v55, %v649_v58 }
 0x10e   :  { %v1072_v0 = vpop.f32.mrb[12].mxu0  ;;  %v1607_v1 = vadd.f32 %v1135_v61, %v652_v62 }
 0x10f   :  { %v1136_v2 = vpop.f32.mrb[12].mxu1  ;;  %v1073_v3 = vpop.f32.mrb[13].mxu0 }
 0x110   :  { %v1074_v4 = vadd.f32 %v1073_v3, %v1072_v0  ;;  %v1137_v5 = vpop.f32.mrb[13].mxu1  ;;  %v1075_v6 = vpop.f32.mrb[14].mxu0 }
 0x111   :  { %v1138_v7 = vadd.f32 %v1137_v5, %v1136_v2  ;;  %v1139_v8 = vpop.f32.mrb[14].mxu1  ;;  %v1076_v9 = vpop.f32.mrb[15].mxu0 }
 0x112   :  { %v657_v10 = vadd.f32 %v1074_v4, %v1589_v18  ;;  %v1077_v11 = vadd.f32 %v1076_v9, %v1075_v6  ;;  %v1140_v12 = vpop.f32.mrb[15].mxu1 }
 0x113   :  { %v1141_v13 = vadd.f32 %v1140_v12, %v1139_v8 }
 0x114   :  { %v660_v14 = vadd.f32 %v1077_v11, %v1589_v18  ;;  %v1611_v15 = vadd.f32 %v1138_v7, %v657_v10 }
 0x116   :  { %v1078_v16 = vpop.f32.mrb[16].mxu0  ;;  %v1613_v17 = vadd.f32 %v1141_v13, %v660_v14 }
 0x117   :  { %v1142_v19 = vpop.f32.mrb[16].mxu1  ;;  %v1079_v20 = vpop.f32.mrb[17].mxu0 }
 0x118   :  { %v1080_v21 = vadd.f32 %v1079_v20, %v1078_v16  ;;  %v1143_v22 = vpop.f32.mrb[17].mxu1  ;;  %v1081_v23 = vpop.f32.mrb[18].mxu0 }
 0x119   :  { %v1144_v24 = vadd.f32 %v1143_v22, %v1142_v19  ;;  %v1145_v25 = vpop.f32.mrb[18].mxu1  ;;  %v1082_v26 = vpop.f32.mrb[19].mxu0 }
 0x11a   :  { %v665_v27 = vadd.f32 %v1080_v21, %v1589_v18  ;;  %v1083_v28 = vadd.f32 %v1082_v26, %v1081_v23  ;;  %v1146_v29 = vpop.f32.mrb[19].mxu1 }
 0x11b   :  { %v1147_v30 = vadd.f32 %v1146_v29, %v1145_v25 }
 0x11c   :  { %v668_v32 = vadd.f32 %v1083_v28, %v1589_v18  ;;  %v762_v34 = vadd.f32 %v1144_v24, %v665_v27 }
 0x11e   :  { %v1084_v35 = vpop.f32.mrb[20].mxu0  ;;  %v1617_v36 = vadd.f32 %v1147_v30, %v668_v32 }
 0x11f   :  { %v1148_v37 = vpop.f32.mrb[20].mxu1  ;;  %v1085_v38 = vpop.f32.mrb[21].mxu0 }
 0x120   :  { %v1086_v39 = vadd.f32 %v1085_v38, %v1084_v35  ;;  %v1149_v40 = vpop.f32.mrb[21].mxu1  ;;  %v1087_v41 = vpop.f32.mrb[22].mxu0 }
 0x121   :  { %v1150_v42 = vadd.f32 %v1149_v40, %v1148_v37  ;;  %v1151_v43 = vpop.f32.mrb[22].mxu1  ;;  %v1088_v44 = vpop.f32.mrb[23].mxu0 }
 0x122   :  { %v673_v45 = vadd.f32 %v1086_v39, %v1589_v18  ;;  %v1089_v46 = vadd.f32 %v1088_v44, %v1087_v41  ;;  %v1152_v48 = vpop.f32.mrb[23].mxu1 }
 0x123   :  { %v1153_v50 = vadd.f32 %v1152_v48, %v1151_v43 }
 0x124   :  { %v676_v51 = vadd.f32 %v1089_v46, %v1589_v18  ;;  %v770_v52 = vadd.f32 %v1150_v42, %v673_v45 }
 0x126   :  { %v1090_v53 = vpop.f32.mrb[24].mxu0  ;;  %v773_v54 = vadd.f32 %v1153_v50, %v676_v51 }
 0x127   :  { %v1154_v55 = vpop.f32.mrb[24].mxu1  ;;  %v1091_v56 = vpop.f32.mrb[25].mxu0 }
 0x128   :  { %v1092_v57 = vadd.f32 %v1091_v56, %v1090_v53  ;;  %v1155_v58 = vpop.f32.mrb[25].mxu1  ;;  %v1093_v59 = vpop.f32.mrb[26].mxu0 }
 0x129   :  { %v1156_v60 = vadd.f32 %v1155_v58, %v1154_v55  ;;  %v1157_v61 = vpop.f32.mrb[26].mxu1  ;;  %v1094_v62 = vpop.f32.mrb[27].mxu0 }
 0x12a   :  { %v681_v0 = vadd.f32 %v1092_v57, %v1589_v18  ;;  %v1095_v2 = vadd.f32 %v1094_v62, %v1093_v59  ;;  %v1158_v3 = vpop.f32.mrb[27].mxu1 }
 0x12b   :  { %v1159_v4 = vadd.f32 %v1158_v3, %v1157_v61 }
 0x12c   :  { %v684_v5 = vadd.f32 %v1095_v2, %v1589_v18  ;;  %v1623_v6 = vadd.f32 %v1156_v60, %v681_v0 }
 0x12e   :  { %v1096_v7 = vpop.f32.mrb[28].mxu0  ;;  %v1625_v8 = vadd.f32 %v1159_v4, %v684_v5 }
 0x12f   :  { %v1160_v9 = vpop.f32.mrb[28].mxu1  ;;  %v1097_v10 = vpop.f32.mrb[29].mxu0 }
 0x130   :  { %v1098_v11 = vadd.f32 %v1097_v10, %v1096_v7  ;;  %v1161_v12 = vpop.f32.mrb[29].mxu1  ;;  %v1099_v13 = vpop.f32.mrb[30].mxu0 }
 0x131   :  { %v1162_v14 = vadd.f32 %v1161_v12, %v1160_v9  ;;  %v1163_v16 = vpop.f32.mrb[30].mxu1  ;;  %v1100_v19 = vpop.f32.mrb[31].mxu0 }
 0x132   :  { %v689_v20 = vadd.f32 %v1098_v11, %v1589_v18  ;;  %v1101_v21 = vadd.f32 %v1100_v19, %v1099_v13  ;;  %v1164_v22 = vpop.f32.mrb[31].mxu1 }
 0x133   :  { %v1165_v23 = vadd.f32 %v1164_v22, %v1163_v16 }
 0x134   :  { %v692_v24 = vadd.f32 %v1101_v21, %v1589_v18  ;;  %v786_v25 = vadd.f32 %v1162_v14, %v689_v20 }
 0x136   :  { %v1200_v26 = vpop.f32.mrb[32].mxu0  ;;  %v1629_v27 = vadd.f32 %v1165_v23, %v692_v24 }
 0x137   :  { %v835_v28 = vadd.f32 %v1200_v26, %v1599_v47  ;;  %v1208_v29 = vpop.f32.mrb[32].mxu1  ;;  %v826_v30 = vpop.f32.mrb[33].mxu0 }
 0x138   :  { %v867_v32 = vadd.f32 %v1208_v29, %v770_v52  ;;  %v827_v35 = vadd.f32 %v826_v30, %v1593_v31  ;;  %v858_v37 = vpop.f32.mrb[33].mxu1  ;;  %v1201_v38 = vpop.f32.mrb[34].mxu0 }
 0x139   :  { %vm891_vm0 = vcmp.ge.f32.partialorder %v835_v28, 0.0  ;;  %v907_v39 = vmul.f32 0.01, %v835_v28  ;;  %v859_v40 = vadd.f32 %v858_v37, %v762_v34  ;;  %v838_v41 = vadd.f32 %v1201_v38, %v1601_v49  ;;  %v1209_v42 = vpop.f32.mrb[34].mxu1  ;;  %v829_v18 = vpop.f32.mrb[35].mxu0 }
 0x13a   :  { %vm899_vm1 = vcmp.ge.f32.partialorder %v867_v32, 0.0  ;;  %v915_v43 = vmul.f32 0.01, %v867_v32  ;;  %vm889_vm2 = vcmp.ge.f32.partialorder %v827_v35, 0.0  ;;  %v905_v44 = vmul.f32 0.01, %v827_v35 }
 0x13b   :  { %v923_v45 = vsel %vm891_vm0, %v835_v28, %v907_v39  ;;  %vm897_vm3 = vcmp.ge.f32.partialorder %v859_v40, 0.0  ;;  %v913_v47 = vmul.f32 0.01, %v859_v40  ;;  %vm892_vm4 = vcmp.ge.f32.partialorder %v838_v41, 0.0  ;;  %v861_v46 = vpop.f32.mrb[35].mxu1 }
 0x13c   :  { %939 = vst [vmem:[%s1694_s3 + $0x10] sm:$0xff] %v923_v45  ;;  %v931_v31 = vsel %vm899_vm1, %v867_v32, %v915_v43  ;;  %v921_v48 = vsel %vm889_vm2, %v827_v35, %v905_v44  ;;  %v908_v34 = vmul.f32 0.01, %v838_v41  ;;  %v870_v50 = vadd.f32 %v1209_v42, %v773_v54 }
 0x13d   :  { %947 = vst [vmem:[%s1694_s3 + $0x50] sm:$0xff] %v931_v31  ;;  %937 = vst [vmem:[%s1694_s3] sm:$0xff] %v921_v48  ;;  %v929_v49 = vsel %vm897_vm3, %v859_v40, %v913_v47  ;;  %v830_v51 = vadd.f32 %v829_v18, %v1595_v33  ;;  %v862_v52 = vadd.f32 %v861_v46, %v1617_v36 }
 0x13e   :  { %945 = vst [vmem:[%s1694_s3 + $0x40] sm:$0xff] %v929_v49  ;;  %v924_v53 = vsel %vm892_vm4, %v838_v41, %v908_v34  ;;  %vm900_vm5 = vcmp.ge.f32.partialorder %v870_v50, 0.0  ;;  %v916_v54 = vmul.f32 0.01, %v870_v50  ;;  %v1204_v55 = vpop.f32.mrb[36].mxu0 }
 0x13f   :  { %940 = vst [vmem:[%s1694_s3 + $0x18] sm:$0xff] %v924_v53  ;;  %vm890_vm6 = vcmp.ge.f32.partialorder %v830_v51, 0.0  ;;  %v906_v56 = vmul.f32 0.01, %v830_v51  ;;  %vm898_vm7 = vcmp.ge.f32.partialorder %v862_v52, 0.0  ;;  %v851_v33 = vadd.f32 %v1204_v55, %v1611_v15  ;;  %v1212_v36 = vpop.f32.mrb[36].mxu1 }
 0x140   :  { %v914_v57 = vmul.f32 0.01, %v862_v52  ;;  %v932_v58 = vsel %vm900_vm5, %v870_v50, %v916_v54  ;;  %v842_v59 = vpop.f32.mrb[37].mxu0  ;;  %v883_v62 = vadd.f32 %v1212_v36, %v786_v25  ;;  %v874_v2 = vpop.f32.mrb[37].mxu1 }
 0x141   :  { %948 = vst [vmem:[%s1694_s3 + $0x58] sm:$0xff] %v932_v58  ;;  %v922_v60 = vsel %vm890_vm6, %v830_v51, %v906_v56  ;;  %v843_v0 = vadd.f32 %v842_v59, %v1605_v63  ;;  %v1205_v3 = vpop.f32.mrb[38].mxu0  ;;  %vm895_vm8 = vcmp.ge.f32.partialorder %v851_v33, 0.0  ;;  %v911_v15 = vmul.f32 0.01, %v851_v33  ;;  %v1213_v7 = vpop.f32.mrb[38].mxu1 }
 0x142   :  { %v930_v61 = vsel %vm898_vm7, %v862_v52, %v914_v57  ;;  %938 = vst [vmem:[%s1694_s3 + $0x8] sm:$0xff] %v922_v60  ;;  %v875_v4 = vadd.f32 %v874_v2, %v1623_v6  ;;  %v854_v5 = vadd.f32 %v1205_v3, %v1613_v17  ;;  %v845_v9 = vpop.f32.mrb[39].mxu0  ;;  %vm903_vm9 = vcmp.ge.f32.partialorder %v883_v62, 0.0  ;;  %v877_v13 = vpop.f32.mrb[39].mxu1 }
 0x143   :  { %946 = vst [vmem:[%s1694_s3 + $0x48] sm:$0xff] %v930_v61  ;;  %v919_v63 = vmul.f32 0.01, %v883_v62  ;;  %vm893_vm10 = vcmp.ge.f32.partialorder %v843_v0, 0.0  ;;  %v909_v10 = vmul.f32 0.01, %v843_v0  ;;  %v927_v11 = vsel %vm895_vm8, %v851_v33, %v911_v15 }
 0x144   :  { %vm901_vm11 = vcmp.ge.f32.partialorder %v875_v4, 0.0  ;;  %v917_v12 = vmul.f32 0.01, %v875_v4  ;;  %vm896_vm12 = vcmp.ge.f32.partialorder %v854_v5, 0.0  ;;  %943 = vst [vmem:[%s1694_s3 + $0x30] sm:$0xff] %v927_v11  ;;  %v886_v17 = vadd.f32 %v1213_v7, %v1629_v27 }
 0x145   :  { %v935_v14 = vsel %vm903_vm9, %v883_v62, %v919_v63  ;;  %v925_v16 = vsel %vm893_vm10, %v843_v0, %v909_v10  ;;  %v912_v6 = vmul.f32 0.01, %v854_v5  ;;  %v846_v20 = vadd.f32 %v845_v9, %v1607_v1 }
 0x146   :  { %951 = vst [vmem:[%s1694_s3 + $0x70] sm:$0xff] %v935_v14  ;;  %941 = vst [vmem:[%s1694_s3 + $0x20] sm:$0xff] %v925_v16  ;;  %v933_v19 = vsel %vm901_vm11, %v875_v4, %v917_v12  ;;  %v878_v21 = vadd.f32 %v877_v13, %v1625_v8  ;;  %vm904_vm13 = vcmp.ge.f32.partialorder %v886_v17, 0.0  ;;  %v920_v23 = vmul.f32 0.01, %v886_v17 }
 0x147   :  { %949 = vst [vmem:[%s1694_s3 + $0x60] sm:$0xff] %v933_v19  ;;  %v928_v22 = vsel %vm896_vm12, %v854_v5, %v912_v6  ;;  %vm894_vm14 = vcmp.ge.f32.partialorder %v846_v20, 0.0  ;;  %v910_v24 = vmul.f32 0.01, %v846_v20 }
 0x148   :  { %944 = vst [vmem:[%s1694_s3 + $0x38] sm:$0xff] %v928_v22  ;;  %vm902_vm15 = vcmp.ge.f32.partialorder %v878_v21, 0.0  ;;  %v918_v25 = vmul.f32 0.01, %v878_v21  ;;  %v936_v26 = vsel %vm904_vm13, %v886_v17, %v920_v23 }
 0x149   :  { %952 = vst [vmem:[%s1694_s3 + $0x78] sm:$0xff] %v936_v26  ;;  %v926_v1 = vsel %vm894_vm14, %v846_v20, %v910_v24 }
 0x14a   :  { %v934_v8 = vsel %vm902_vm15, %v878_v21, %v918_v25  ;;  %942 = vst [vmem:[%s1694_s3 + $0x28] sm:$0xff] %v926_v1 }
 0x14b   :  { %950 = vst [vmem:[%s1694_s3 + $0x68] sm:$0xff] %v934_v8 }

// kernel: classifier_forward.9
= control target key start
LH: loop header
LB: loop body
LE: loop exit
PB: predicated region body
PF: predicated region fallthrough
CT: control target
= control target key end

     0   :  { %s1611_s1 = inlined_call_operand.vmem [shape: bf16[1152,128], index: 1, kind: input, shape index: {}]   ;;  %s1612_s0 = inlined_call_operand.vmem [shape: bf16[32,1152], index: 0, kind: input, shape index: {}]   ;;  %s1613_s2 = inlined_call_operand.vmem [shape: f32[1,128], index: 2, kind: input, shape index: {}]   ;;  %s1614_s3 = inlined_call_operand.vmem [shape: f32[32,128], index: 3, kind: output, shape index: {}]  }
   0x1   :  { %v1208_v0 = vld [vmem:[%s1611_s1 + $0x40] sm:$0xff]   ;;  %v1212_v4 = vld [vmem:[%s1611_s1 + $0x48] sm:$0xff]   ;;  %v1216_v8 = vld [vmem:[%s1611_s1 + $0x50] sm:$0xff]  }
   0x2   :  { %v1209_v1 = vld [vmem:[%s1611_s1] sm:$0xff]   ;;  %1066 = vmatprep.subr.bf16.mxu0 %v1208_v0  ;;  %v1213_v5 = vld [vmem:[%s1611_s1 + $0x8] sm:$0xff]   ;;  %v1217_v9 = vld [vmem:[%s1611_s1 + $0x10] sm:$0xff]  }
   0x3   :  { %v1210_v2 = vld [vmem:[%s1611_s1 + $0xc0] sm:$0xff]   ;;  %1067 = vmatpush3.bf16.msra.mxu0 %v1209_v1  ;;  %v1214_v6 = vld [vmem:[%s1611_s1 + $0xc8] sm:$0xff]   ;;  %v1218_v10 = vld [vmem:[%s1611_s1 + $0xd0] sm:$0xff]  }
   0x4   :  { %v1211_v3 = vld [vmem:[%s1611_s1 + $0x80] sm:$0xff]   ;;  %1094 = vmatprep.subr.bf16.mxu1 %v1210_v2  ;;  %1068 = vmatprep.subr.bf16.mxu0 %v1212_v4  ;;  %v1215_v7 = vld [vmem:[%s1611_s1 + $0x88] sm:$0xff]   ;;  %v1219_v11 = vld [vmem:[%s1611_s1 + $0x90] sm:$0xff]  }
   0x5   :  { %1095 = vmatpush3.bf16.msra.mxu1 %v1211_v3  ;;  %v1220_v12 = vld [vmem:[%s1611_s1 + $0x58] sm:$0xff]   ;;  %v1224_v16 = vld [vmem:[%s1611_s1 + $0x60] sm:$0xff]   ;;  %v1228_v20 = vld [vmem:[%s1611_s1 + $0x68] sm:$0xff]  }
   0x6   :  { %1096 = vmatprep.subr.bf16.mxu1 %v1214_v6  ;;  %v1221_v13 = vld [vmem:[%s1611_s1 + $0x18] sm:$0xff]   ;;  %v1225_v17 = vld [vmem:[%s1611_s1 + $0x20] sm:$0xff]   ;;  %v1229_v21 = vld [vmem:[%s1611_s1 + $0x28] sm:$0xff]  }
   0x7   :  { %1069 = vmatpush3.bf16.msra.mxu0 %v1213_v5  ;;  %v1222_v14 = vld [vmem:[%s1611_s1 + $0xd8] sm:$0xff]   ;;  %v1226_v18 = vld [vmem:[%s1611_s1 + $0xe0] sm:$0xff]   ;;  %v1230_v22 = vld [vmem:[%s1611_s1 + $0xe8] sm:$0xff]  }
   0x8   :  { %1070 = vmatprep.subr.bf16.mxu0 %v1216_v8  ;;  %v1223_v15 = vld [vmem:[%s1611_s1 + $0x98] sm:$0xff]   ;;  %v1227_v19 = vld [vmem:[%s1611_s1 + $0xa0] sm:$0xff]   ;;  %v1231_v23 = vld [vmem:[%s1611_s1 + $0xa8] sm:$0xff]  }
   0x9   :  { %1097 = vmatpush3.bf16.msra.mxu1 %v1215_v7  ;;  %v1232_v24 = vld [vmem:[%s1611_s1 + $0x70] sm:$0xff]   ;;  %v1236_v28 = vld [vmem:[%s1611_s1 + $0x78] sm:$0xff]   ;;  %v1239_v31 = vld [vmem:[%s1612_s0] ss:$36 sps:$4 sm:$0xff]  }
   0xa   :  { %1098 = vmatprep.subr.bf16.mxu1 %v1218_v10  ;;  %v1233_v25 = vld [vmem:[%s1611_s1 + $0x30] sm:$0xff]   ;;  %v1237_v29 = vld [vmem:[%s1611_s1 + $0x38] sm:$0xff]   ;;  %v1241_v32 = vld [vmem:[%s1612_s0 + $0x4] ss:$36 sps:$4 sm:$0xff]  }
   0xb   :  { %1071 = vmatpush3.bf16.msra.mxu0 %v1217_v9  ;;  %v1234_v26 = vld [vmem:[%s1611_s1 + $0xf0] sm:$0xff]   ;;  %v1238_v30 = vld [vmem:[%s1611_s1 + $0xf8] sm:$0xff]   ;;  %742 = vmatprep.mubr.bf16.mxu0 %v1241_v32  ;;  %v1243_v34 = vld [vmem:[%s1611_s1 + $0x140] sm:$0xff]  }
   0xc   :  { %1072 = vmatprep.subr.bf16.mxu0 %v1220_v12  ;;  %v1235_v27 = vld [vmem:[%s1611_s1 + $0xb0] sm:$0xff]   ;;  %v1242_v33 = vld [vmem:[%s1611_s1 + $0xb8] sm:$0xff]   ;;  %v1244_v35 = vld [vmem:[%s1612_s0 + $0x8] ss:$36 sps:$4 sm:$0xff]  }
   0xd   :  { %1099 = vmatpush3.bf16.msra.mxu1 %v1219_v11  ;;  %v1246_v36 = vld [vmem:[%s1612_s0 + $0xc] ss:$36 sps:$4 sm:$0xff]   ;;  %v1247_v37 = vld [vmem:[%s1611_s1 + $0x100] sm:$0xff]   ;;  %v1258_v48 = vld [vmem:[%s1611_s1 + $0x158] sm:$0xff]  }
   0xe   :  { %1100 = vmatprep.subr.bf16.mxu1 %v1222_v14  ;;  %791 = vmatprep.mubr.bf16.mxu1 %v1246_v36  ;;  %v1248_v38 = vld [vmem:[%s1611_s1 + $0x1c0] sm:$0xff]   ;;  %v1250_v40 = vld [vmem:[%s1611_s1 + $0x148] sm:$0xff]   ;;  %v1254_v44 = vld [vmem:[%s1611_s1 + $0x150] sm:$0xff]  }
   0xf   :  { %1073 = vmatpush3.bf16.msra.mxu0 %v1221_v13  ;;  %v1249_v39 = vld [vmem:[%s1611_s1 + $0x180] sm:$0xff]   ;;  %v1251_v41 = vld [vmem:[%s1611_s1 + $0x108] sm:$0xff]   ;;  %v1255_v45 = vld [vmem:[%s1611_s1 + $0x110] sm:$0xff]  }
  0x10   :  { %1074 = vmatprep.subr.bf16.mxu0 %v1224_v16  ;;  %v1252_v42 = vld [vmem:[%s1611_s1 + $0x1c8] sm:$0xff]   ;;  %v1256_v46 = vld [vmem:[%s1611_s1 + $0x1d0] sm:$0xff]   ;;  %v1259_v49 = vld [vmem:[%s1611_s1 + $0x118] sm:$0xff]  }
  0x11   :  { %1101 = vmatpush3.bf16.msra.mxu1 %v1223_v15  ;;  %v1253_v43 = vld [vmem:[%s1611_s1 + $0x188] sm:$0xff]   ;;  %v1257_v47 = vld [vmem:[%s1611_s1 + $0x190] sm:$0xff]   ;;  %v1260_v50 = vld [vmem:[%s1611_s1 + $0x1d8] sm:$0xff]  }
  0x12   :  { %1102 = vmatprep.subr.bf16.mxu1 %v1226_v18  ;;  %v1261_v51 = vld [vmem:[%s1611_s1 + $0x198] sm:$0xff]   ;;  %v1262_v52 = vld [vmem:[%s1611_s1 + $0x160] sm:$0xff]   ;;  %v1266_v56 = vld [vmem:[%s1611_s1 + $0x168] sm:$0xff]  }
  0x13   :  { %1075 = vmatpush3.bf16.msra.mxu0 %v1225_v17  ;;  %v1263_v53 = vld [vmem:[%s1611_s1 + $0x120] sm:$0xff]   ;;  %v1267_v57 = vld [vmem:[%s1612_s0 + $0x4c] ss:$36 sps:$4 sm:$0xff]   ;;  %v1272_v61 = vld [vmem:[%s1612_s0 + $0x54] ss:$36 sps:$4 sm:$0xff]  }
  0x14   :  { %1076 = vmatprep.subr.bf16.mxu0 %v1228_v20  ;;  %v1264_v54 = vld [vmem:[%s1611_s1 + $0x1e0] sm:$0xff]   ;;  %v1269_v58 = vld [vmem:[%s1611_s1 + $0x128] sm:$0xff]   ;;  %v1275_v63 = vld [vmem:[%s1612_s0 + $0x50] ss:$36 sps:$4 sm:$0xff]  }
  0x15   :  { %1103 = vmatpush3.bf16.msra.mxu1 %v1227_v19  ;;  %v1265_v55 = vld [vmem:[%s1611_s1 + $0x1a0] sm:$0xff]   ;;  %v1270_v59 = vld [vmem:[%s1612_s0 + $0x48] ss:$36 sps:$4 sm:$0xff]   ;;  %v1276_v0 = vld [vmem:[%s1611_s1 + $0x170] sm:$0xff]  }
  0x16   :  { %1104 = vmatprep.subr.bf16.mxu1 %v1230_v22  ;;  %v1271_v60 = vld [vmem:[%s1611_s1 + $0x1e8] sm:$0xff]   ;;  %v1277_v1 = vld [vmem:[%s1611_s1 + $0x130] sm:$0xff]   ;;  %v1280_v4 = vld [vmem:[%s1611_s1 + $0x178] sm:$0xff]  }
  0x17   :  { %1077 = vmatpush3.bf16.msra.mxu0 %v1229_v21  ;;  %v1274_v62 = vld [vmem:[%s1611_s1 + $0x1a8] sm:$0xff]   ;;  %v1278_v2 = vld [vmem:[%s1611_s1 + $0x1f0] sm:$0xff]   ;;  %v1281_v5 = vld [vmem:[%s1611_s1 + $0x138] sm:$0xff]  }
  0x18   :  { %1078 = vmatprep.subr.bf16.mxu0 %v1232_v24  ;;  %v1279_v3 = vld [vmem:[%s1611_s1 + $0x1b0] sm:$0xff]   ;;  %v1282_v6 = vld [vmem:[%s1611_s1 + $0x1f8] sm:$0xff]   ;;  %v1287_v10 = vld [vmem:[%s1611_s1 + $0x200] sm:$0xff]  }
  0x19   :  { %1105 = vmatpush3.bf16.msra.mxu1 %v1231_v23  ;;  %v1283_v7 = vld [vmem:[%s1612_s0 + $0x10] ss:$36 sps:$4 sm:$0xff]   ;;  %v1286_v9 = vld [vmem:[%s1611_s1 + $0x1b8] sm:$0xff]   ;;  %v1291_v13 = vld [vmem:[%s1611_s1 + $0x208] sm:$0xff]  }
  0x1a   :  { %1106 = vmatprep.subr.bf16.mxu1 %v1234_v26  ;;  %v1285_v8 = vld [vmem:[%s1612_s0 + $0x14] ss:$36 sps:$4 sm:$0xff]   ;;  %v1290_v12 = vld [vmem:[%s1612_s0 + $0x1c] ss:$36 sps:$4 sm:$0xff]   ;;  %v1296_v17 = vld [vmem:[%s1612_s0 + $0x64] ss:$36 sps:$4 sm:$0xff]  }
  0x1b   :  { %1079 = vmatpush3.bf16.msra.mxu0 %v1233_v25  ;;  %v1288_v11 = vld [vmem:[%s1612_s0 + $0x18] ss:$36 sps:$4 sm:$0xff]   ;;  %v1295_v16 = vld [vmem:[%s1611_s1 + $0x210] sm:$0xff]   ;;  %v1298_v18 = vld [vmem:[%s1612_s0 + $0x60] ss:$36 sps:$4 sm:$0xff]  }
  0x1c   :  { %1080 = vmatprep.subr.bf16.mxu0 %v1236_v28  ;;  %v1292_v14 = vld [vmem:[%s1612_s0 + $0x5c] ss:$36 sps:$4 sm:$0xff]   ;;  %v1301_v22 = vld [vmem:[%s1611_s1 + $0x228] sm:$0xff]   ;;  %v1302_v23 = vld [vmem:[%s1611_s1 + $0x230] sm:$0xff]  }
  0x1d   :  { %1107 = vmatpush3.bf16.msra.mxu1 %v1235_v27  ;;  %v1294_v15 = vld [vmem:[%s1612_s0 + $0x58] ss:$36 sps:$4 sm:$0xff]   ;;  %v1300_v20 = vld [vmem:[%s1611_s1 + $0x220] sm:$0xff]   ;;  %v1305_v25 = vld [vmem:[%s1612_s0 + $0x68] ss:$36 sps:$4 sm:$0xff]  }
  0x1e   :  { %1108 = vmatprep.subr.bf16.mxu1 %v1238_v30  ;;  %v1299_v19 = vld [vmem:[%s1611_s1 + $0x218] sm:$0xff]   ;;  %v1304_v21 = vld [vmem:[%s1612_s0 + $0x20] ss:$36 sps:$4 sm:$0xff]  }
  0x1f   :  { %1081 = vmatpush3.bf16.msra.mxu0 %v1237_v29  ;;  %v1303_v24 = vld [vmem:[%s1611_s1 + $0x238] sm:$0xff]   ;;  %v975_v27 = vld [vmem:[%s1613_s2] ss:$0 sm:$0xff] }
  0x20   :  { %1122 = vmatprep.subr.bf16.mxu0 %v1243_v34 }
  0x21   :  { %1109 = vmatpush3.bf16.msra.mxu1 %v1242_v33 }
  0x22   :  { %743 = vmatmul.mubr.bf16.vlgmr.msra.gmra.mrb[0].mxu0 %v1239_v31  ;;  %1150 = vmatprep.subr.bf16.mxu1 %v1248_v38 }
  0x23   :  { %1123 = vmatpush3.bf16.msra.mxu0 %v1247_v37  ;;  %750 = vmatprep.mubr.bf16.mxu0 %v1267_v57 }
  0x24   :  { %792 = vmatmul.mubr.bf16.vlgmr.msra.gmra.mrb[0].mxu1 %v1244_v35  ;;  %1124 = vmatprep.subr.bf16.mxu0 %v1250_v40 }
  0x25   :  { %1151 = vmatpush3.bf16.msra.mxu1 %v1249_v39  ;;  %799 = vmatprep.mubr.bf16.mxu1 %v1272_v61 }
  0x26   :  { %1152 = vmatprep.subr.bf16.mxu1 %v1252_v42 }
  0x27   :  { %1125 = vmatpush3.bf16.msra.mxu0 %v1251_v41 }
  0x28   :  { %1126 = vmatprep.subr.bf16.mxu0 %v1254_v44 }
  0x29   :  { %1153 = vmatpush3.bf16.msra.mxu1 %v1253_v43 }
  0x2a   :  { %1154 = vmatprep.subr.bf16.mxu1 %v1256_v46  ;;  %751 = vmatmul.mubr.bf16.gmra.mrb[4].mxu0 %v1270_v59 }
  0x2b   :  { %1127 = vmatpush3.bf16.msra.mxu0 %v1255_v45  ;;  %840 = vmatprep.mubr.bf16.mxu0 %v1285_v8 }
  0x2c   :  { %1128 = vmatprep.subr.bf16.mxu0 %v1258_v48  ;;  %800 = vmatmul.mubr.bf16.gmra.mrb[4].mxu1 %v1275_v63 }
  0x2d   :  { %1155 = vmatpush3.bf16.msra.mxu1 %v1257_v47  ;;  %889 = vmatprep.mubr.bf16.mxu1 %v1290_v12 }
  0x2e   :  { %1156 = vmatprep.subr.bf16.mxu1 %v1260_v50 }
  0x2f   :  { %1129 = vmatpush3.bf16.msra.mxu0 %v1259_v49 }
  0x30   :  { %1130 = vmatprep.subr.bf16.mxu0 %v1262_v52 }
  0x31   :  { %1157 = vmatpush3.bf16.msra.mxu1 %v1261_v51 }
  0x32   :  { %1158 = vmatprep.subr.bf16.mxu1 %v1264_v54 }
  0x33   :  { %1131 = vmatpush3.bf16.msra.mxu0 %v1263_v53 }
  0x34   :  { %1132 = vmatprep.subr.bf16.mxu0 %v1266_v56 }
  0x35   :  { %1159 = vmatpush3.bf16.msra.mxu1 %v1265_v55 }
  0x36   :  { %1160 = vmatprep.subr.bf16.mxu1 %v1271_v60 }
  0x37   :  { %1133 = vmatpush3.bf16.msra.mxu0 %v1269_v58 }
  0x38   :  { %1134 = vmatprep.subr.bf16.mxu0 %v1276_v0 }
  0x39   :  { %1161 = vmatpush3.bf16.msra.mxu1 %v1274_v62 }
  0x3a   :  { %1162 = vmatprep.subr.bf16.mxu1 %v1278_v2 }
  0x3b   :  { %1135 = vmatpush3.bf16.msra.mxu0 %v1277_v1 }
  0x3c   :  { %1136 = vmatprep.subr.bf16.mxu0 %v1280_v4 }
  0x3d   :  { %1163 = vmatpush3.bf16.msra.mxu1 %v1279_v3 }
  0x3e   :  { %1164 = vmatprep.subr.bf16.mxu1 %v1282_v6 }
  0x3f   :  { %1137 = vmatpush3.bf16.msra.mxu0 %v1281_v5 }
  0x40   :  { %1188 = vmatprep.subr.bf16.mxu0 %v1287_v10 }
  0x41   :  { %1165 = vmatpush3.bf16.msra.mxu1 %v1286_v9 }
  0x42   :  { %841 = vmatmul.mubr.bf16.vlgmr.msra.gmra.mrb[8].mxu0 %v1283_v7 }
  0x43   :  { %1189 = vmatpush3.bf16.msra.mxu0 %v1287_v10  ;;  %848 = vmatprep.mubr.bf16.mxu0 %v1292_v14 }
  0x44   :  { %890 = vmatmul.mubr.bf16.vlgmr.msra.gmra.mrb[8].mxu1 %v1288_v11  ;;  %1190 = vmatprep.subr.bf16.mxu0 %v1291_v13 }
  0x45   :  { %897 = vmatprep.mubr.bf16.mxu1 %v1296_v17 }
  0x47   :  { %1191 = vmatpush3.bf16.msra.mxu0 %v1291_v13 }
  0x48   :  { %1192 = vmatprep.subr.bf16.mxu0 %v1295_v16 }
  0x4a   :  { %849 = vmatmul.mubr.bf16.gmra.mrb[12].mxu0 %v1294_v15 }
  0x4b   :  { %1193 = vmatpush3.bf16.msra.mxu0 %v1295_v16  ;;  %1204 = vmatprep.mubr.bf16.mxu0 %v1304_v21 }
  0x4c   :  { %898 = vmatmul.mubr.bf16.gmra.mrb[12].mxu1 %v1298_v18  ;;  %1194 = vmatprep.subr.bf16.mxu0 %v1299_v19 }
  0x4f   :  { %1195 = vmatpush3.bf16.msra.mxu0 %v1299_v19 }
  0x50   :  { %1196 = vmatprep.subr.bf16.mxu0 %v1300_v20 }
  0x53   :  { %1197 = vmatpush3.bf16.msra.mxu0 %v1300_v20 }
  0x54   :  { %1198 = vmatprep.subr.bf16.mxu0 %v1301_v22 }
  0x57   :  { %1199 = vmatpush3.bf16.msra.mxu0 %v1301_v22 }
  0x58   :  { %1200 = vmatprep.subr.bf16.mxu0 %v1302_v23 }
  0x5b   :  { %1201 = vmatpush3.bf16.msra.mxu0 %v1302_v23 }
  0x5c   :  { %1202 = vmatprep.subr.bf16.mxu0 %v1303_v24 }
  0x5f   :  { %1203 = vmatpush3.bf16.msra.mxu0 %v1303_v24 }
  0x62   :  { %1205 = vmatmul.mubr.bf16.vlgmr.msra.gmra.mrb[16].mxu0 %v1305_v25 }
  0xf5   :  { %v1082_v26 = vpop.f32.mrb[0].mxu0 }
  0xf6   :  { %v1083_v28 = vpop.f32.mrb[1].mxu0 }
  0xf7   :  { %v1084_v29 = vadd.f32 %v1083_v28, %v1082_v26  ;;  %v1085_v30 = vpop.f32.mrb[2].mxu0  ;;  %v1110_v31 = vpop.f32.mrb[0].mxu1 }
  0xf8   :  { %v1086_v32 = vpop.f32.mrb[3].mxu0  ;;  %v1111_v35 = vpop.f32.mrb[1].mxu1 }
  0xf9   :  { %v745_v33 = vadd.f32 %v1084_v29, %v975_v27  ;;  %v1087_v34 = vadd.f32 %v1086_v32, %v1085_v30  ;;  %v1112_v36 = vadd.f32 %v1111_v35, %v1110_v31  ;;  %v1113_v37 = vpop.f32.mrb[2].mxu1 }
  0xfa   :  { %v1114_v39 = vpop.f32.mrb[3].mxu1 }
  0xfb   :  { %v748_v38 = vadd.f32 %v1087_v34, %v975_v27  ;;  %v794_v40 = vadd.f32 %v1112_v36, %v745_v33  ;;  %v1115_v41 = vadd.f32 %v1114_v39, %v1113_v37 }
  0xfd   :  { %v797_v42 = vadd.f32 %v1115_v41, %v748_v38  ;;  %v1088_v43 = vpop.f32.mrb[4].mxu0 }
  0xfe   :  { %v1089_v44 = vpop.f32.mrb[5].mxu0 }
  0xff   :  { %v1090_v45 = vadd.f32 %v1089_v44, %v1088_v43  ;;  %v1091_v46 = vpop.f32.mrb[6].mxu0  ;;  %v1116_v47 = vpop.f32.mrb[4].mxu1 }
 0x100   :  { %v1092_v48 = vpop.f32.mrb[7].mxu0  ;;  %v1117_v51 = vpop.f32.mrb[5].mxu1 }
 0x101   :  { %v753_v49 = vadd.f32 %v1090_v45, %v975_v27  ;;  %v1093_v50 = vadd.f32 %v1092_v48, %v1091_v46  ;;  %v1118_v52 = vadd.f32 %v1117_v51, %v1116_v47  ;;  %v1119_v53 = vpop.f32.mrb[6].mxu1 }
 0x102   :  { %v1120_v55 = vpop.f32.mrb[7].mxu1 }
 0x103   :  { %v756_v54 = vadd.f32 %v1093_v50, %v975_v27  ;;  %v802_v56 = vadd.f32 %v1118_v52, %v753_v49  ;;  %v1121_v57 = vadd.f32 %v1120_v55, %v1119_v53 }
 0x105   :  { %v805_v58 = vadd.f32 %v1121_v57, %v756_v54 }
 0x115   :  { %v1138_v59 = vpop.f32.mrb[8].mxu0 }
 0x116   :  { %v1139_v60 = vpop.f32.mrb[9].mxu0 }
 0x117   :  { %v1140_v61 = vadd.f32 %v1139_v60, %v1138_v59  ;;  %v1141_v62 = vpop.f32.mrb[10].mxu0  ;;  %v1166_v63 = vpop.f32.mrb[8].mxu1 }
 0x118   :  { %v1142_v0 = vpop.f32.mrb[11].mxu0  ;;  %v1167_v3 = vpop.f32.mrb[9].mxu1 }
 0x119   :  { %v843_v1 = vadd.f32 %v1140_v61, %v794_v40  ;;  %v1143_v2 = vadd.f32 %v1142_v0, %v1141_v62  ;;  %v1168_v4 = vadd.f32 %v1167_v3, %v1166_v63  ;;  %v1169_v5 = vpop.f32.mrb[10].mxu1 }
 0x11a   :  { %v1170_v7 = vpop.f32.mrb[11].mxu1 }
 0x11b   :  { %v846_v6 = vadd.f32 %v1143_v2, %v797_v42  ;;  %v1171_v8 = vadd.f32 %v1170_v7, %v1169_v5  ;;  %v892_v9 = vadd.f32 %v1168_v4, %v843_v1 }
 0x11d   :  { %v1144_v10 = vpop.f32.mrb[12].mxu0  ;;  %v895_v12 = vadd.f32 %v1171_v8, %v846_v6 }
 0x11e   :  { %v1145_v11 = vpop.f32.mrb[13].mxu0 }
 0x11f   :  { %v1146_v13 = vadd.f32 %v1145_v11, %v1144_v10  ;;  %v1147_v14 = vpop.f32.mrb[14].mxu0  ;;  %v1172_v15 = vpop.f32.mrb[12].mxu1 }
 0x120   :  { %v1148_v16 = vpop.f32.mrb[15].mxu0  ;;  %v1173_v19 = vpop.f32.mrb[13].mxu1 }
 0x121   :  { %v851_v17 = vadd.f32 %v1146_v13, %v802_v56  ;;  %v1149_v18 = vadd.f32 %v1148_v16, %v1147_v14  ;;  %v1174_v20 = vadd.f32 %v1173_v19, %v1172_v15  ;;  %v1175_v21 = vpop.f32.mrb[14].mxu1 }
 0x122   :  { %v1176_v23 = vpop.f32.mrb[15].mxu1 }
 0x123   :  { %v854_v22 = vadd.f32 %v1149_v18, %v805_v58  ;;  %v1177_v24 = vadd.f32 %v1176_v23, %v1175_v21  ;;  %v900_v25 = vadd.f32 %v1174_v20, %v851_v17 }
 0x125   :  { %v903_v26 = vadd.f32 %v1177_v24, %v854_v22 }
 0x135   :  { %v1206_v27 = vpop.f32.mrb[16].mxu0 }
 0x136   :  { %v949_v28 = vadd.f32 %v1206_v27, %v900_v25  ;;  %v940_v29 = vpop.f32.mrb[17].mxu0 }
 0x137   :  { %v941_v30 = vadd.f32 %v940_v29, %v892_v9  ;;  %v1207_v31 = vpop.f32.mrb[18].mxu0 }
 0x138   :  { %vm957_vm0 = vcmp.ge.f32.partialorder %v949_v28, 0.0  ;;  %v961_v32 = vmul.f32 0.01, %v949_v28  ;;  %v952_v33 = vadd.f32 %v1207_v31, %v903_v26  ;;  %v943_v34 = vpop.f32.mrb[19].mxu0 }
 0x139   :  { %vm955_vm1 = vcmp.ge.f32.partialorder %v941_v30, 0.0  ;;  %v959_v35 = vmul.f32 0.01, %v941_v30  ;;  %v944_v36 = vadd.f32 %v943_v34, %v895_v12 }
 0x13a   :  { %v965_v37 = vsel %vm957_vm0, %v949_v28, %v961_v32  ;;  %vm958_vm2 = vcmp.ge.f32.partialorder %v952_v33, 0.0  ;;  %v962_v38 = vmul.f32 0.01, %v952_v33 }
 0x13b   :  { %969 = vst [vmem:[%s1614_s3 + $0x10] sm:$0xff] %v965_v37  ;;  %v963_v39 = vsel %vm955_vm1, %v941_v30, %v959_v35  ;;  %vm956_vm3 = vcmp.ge.f32.partialorder %v944_v36, 0.0  ;;  %v960_v40 = vmul.f32 0.01, %v944_v36 }
 0x13c   :  { %967 = vst [vmem:[%s1614_s3] sm:$0xff] %v963_v39  ;;  %v966_v41 = vsel %vm958_vm2, %v952_v33, %v962_v38 }
 0x13d   :  { %970 = vst [vmem:[%s1614_s3 + $0x18] sm:$0xff] %v966_v41  ;;  %v964_v42 = vsel %vm956_vm3, %v944_v36, %v960_v40 }
 0x13e   :  { %968 = vst [vmem:[%s1614_s3 + $0x8] sm:$0xff] %v964_v42 }

// kernel: classifier_forward.10
= control target key start
LH: loop header
LB: loop body
LE: loop exit
PB: predicated region body
PF: predicated region fallthrough
CT: control target
= control target key end

     0   :  { %s2299_s1 = inlined_call_operand.vmem [shape: bf16[1152,256], index: 1, kind: input, shape index: {}]   ;;  %s2300_s0 = inlined_call_operand.vmem [shape: bf16[32,1152], index: 0, kind: input, shape index: {}]   ;;  %s2301_s2 = inlined_call_operand.vmem [shape: f32[1,256], index: 2, kind: input, shape index: {}]   ;;  %s2302_s3 = inlined_call_operand.vmem [shape: f32[32,256], index: 3, kind: output, shape index: {}]  }
   0x1   :  { %v1523_v0 = vld [vmem:[%s2299_s1 + $0x4] ss:$8 sps:$4 sm:$0xff]   ;;  %v1527_v2 = vld [vmem:[%s2299_s1] ss:$8 sps:$4 sm:$0xff]   ;;  %v1529_v4 = vld [vmem:[%s2299_s1 + $0x14] ss:$8 sps:$4 sm:$0xff]  }
   0x2   :  { %v1525_v1 = vld [vmem:[%s2299_s1 + $0x204] ss:$8 sps:$4 sm:$0xff]   ;;  %1003 = vmatprep.subr.bf16.mxu1 %v1523_v0  ;;  %v1528_v3 = vld [vmem:[%s2299_s1 + $0x200] ss:$8 sps:$4 sm:$0xff]   ;;  %v1531_v5 = vld [vmem:[%s2299_s1 + $0x214] ss:$8 sps:$4 sm:$0xff]  }
   0x3   :  { %1109 = vmatprep.subr.bf16.mxu0 %v1525_v1  ;;  %1004 = vmatpush1.bf16.msra.mxu1 %v1527_v2  ;;  %v1533_v6 = vld [vmem:[%s2299_s1 + $0x10] ss:$8 sps:$4 sm:$0xff]   ;;  %v1535_v8 = vld [vmem:[%s2299_s1 + $0x24] ss:$8 sps:$4 sm:$0xff]   ;;  %v1539_v10 = vld [vmem:[%s2299_s1 + $0x20] ss:$8 sps:$4 sm:$0xff]  }
   0x4   :  { %1110 = vmatpush1.bf16.msra.mxu0 %v1528_v3  ;;  %1005 = vmatprep.subr.bf16.mxu1 %v1529_v4  ;;  %v1534_v7 = vld [vmem:[%s2299_s1 + $0x210] ss:$8 sps:$4 sm:$0xff]   ;;  %v1537_v9 = vld [vmem:[%s2299_s1 + $0x224] ss:$8 sps:$4 sm:$0xff]   ;;  %v1540_v11 = vld [vmem:[%s2299_s1 + $0x220] ss:$8 sps:$4 sm:$0xff]  }
   0x5   :  { %1111 = vmatprep.subr.bf16.mxu0 %v1531_v5  ;;  %v1541_v12 = vld [vmem:[%s2299_s1 + $0x34] ss:$8 sps:$4 sm:$0xff]   ;;  %v1545_v14 = vld [vmem:[%s2299_s1 + $0x30] ss:$8 sps:$4 sm:$0xff]   ;;  %v1547_v16 = vld [vmem:[%s2299_s1 + $0x44] ss:$8 sps:$4 sm:$0xff]  }
   0x6   :  { %v1543_v13 = vld [vmem:[%s2299_s1 + $0x234] ss:$8 sps:$4 sm:$0xff]   ;;  %v1546_v15 = vld [vmem:[%s2299_s1 + $0x230] ss:$8 sps:$4 sm:$0xff]   ;;  %v1549_v17 = vld [vmem:[%s2299_s1 + $0x244] ss:$8 sps:$4 sm:$0xff]  }
   0x7   :  { %1006 = vmatpush1.bf16.msra.mxu1 %v1533_v6  ;;  %v1551_v18 = vld [vmem:[%s2299_s1 + $0x40] ss:$8 sps:$4 sm:$0xff]   ;;  %v1553_v20 = vld [vmem:[%s2299_s1 + $0x54] ss:$8 sps:$4 sm:$0xff]   ;;  %v1557_v22 = vld [vmem:[%s2299_s1 + $0x50] ss:$8 sps:$4 sm:$0xff]  }
   0x8   :  { %1112 = vmatpush1.bf16.msra.mxu0 %v1534_v7  ;;  %1007 = vmatprep.subr.bf16.mxu1 %v1535_v8  ;;  %v1552_v19 = vld [vmem:[%s2299_s1 + $0x240] ss:$8 sps:$4 sm:$0xff]   ;;  %v1555_v21 = vld [vmem:[%s2299_s1 + $0x254] ss:$8 sps:$4 sm:$0xff]   ;;  %v1558_v23 = vld [vmem:[%s2299_s1 + $0x250] ss:$8 sps:$4 sm:$0xff]  }
   0x9   :  { %1113 = vmatprep.subr.bf16.mxu0 %v1537_v9  ;;  %v1559_v24 = vld [vmem:[%s2299_s1 + $0x64] ss:$8 sps:$4 sm:$0xff]   ;;  %v1563_v26 = vld [vmem:[%s2299_s1 + $0x60] ss:$8 sps:$4 sm:$0xff]   ;;  %v1565_v28 = vld [vmem:[%s2299_s1 + $0x74] ss:$8 sps:$4 sm:$0xff]  }
   0xa   :  { %v1561_v25 = vld [vmem:[%s2299_s1 + $0x264] ss:$8 sps:$4 sm:$0xff]   ;;  %v1564_v27 = vld [vmem:[%s2299_s1 + $0x260] ss:$8 sps:$4 sm:$0xff]   ;;  %v1567_v29 = vld [vmem:[%s2299_s1 + $0x274] ss:$8 sps:$4 sm:$0xff]  }
   0xb   :  { %1008 = vmatpush1.bf16.msra.mxu1 %v1539_v10  ;;  %v1569_v30 = vld [vmem:[%s2299_s1 + $0x70] ss:$8 sps:$4 sm:$0xff]   ;;  %v1571_v32 = vld [vmem:[%s2299_s1 + $0x84] ss:$8 sps:$4 sm:$0xff]   ;;  %v1575_v34 = vld [vmem:[%s2299_s1 + $0x80] ss:$8 sps:$4 sm:$0xff]  }
   0xc   :  { %1114 = vmatpush1.bf16.msra.mxu0 %v1540_v11  ;;  %1009 = vmatprep.subr.bf16.mxu1 %v1541_v12  ;;  %v1570_v31 = vld [vmem:[%s2299_s1 + $0x270] ss:$8 sps:$4 sm:$0xff]   ;;  %v1573_v33 = vld [vmem:[%s2299_s1 + $0x284] ss:$8 sps:$4 sm:$0xff]   ;;  %v1576_v35 = vld [vmem:[%s2299_s1 + $0x280] ss:$8 sps:$4 sm:$0xff]  }
   0xd   :  { %1115 = vmatprep.subr.bf16.mxu0 %v1543_v13  ;;  %v1577_v36 = vld [vmem:[%s2299_s1 + $0x94] ss:$8 sps:$4 sm:$0xff]   ;;  %v1581_v38 = vld [vmem:[%s2299_s1 + $0x90] ss:$8 sps:$4 sm:$0xff]   ;;  %v1583_v40 = vld [vmem:[%s2299_s1 + $0xa4] ss:$8 sps:$4 sm:$0xff]  }
   0xe   :  { %v1579_v37 = vld [vmem:[%s2299_s1 + $0x294] ss:$8 sps:$4 sm:$0xff]   ;;  %v1582_v39 = vld [vmem:[%s2299_s1 + $0x290] ss:$8 sps:$4 sm:$0xff]   ;;  %v1585_v41 = vld [vmem:[%s2299_s1 + $0x2a4] ss:$8 sps:$4 sm:$0xff]  }
   0xf   :  { %1010 = vmatpush1.bf16.msra.mxu1 %v1545_v14  ;;  %v1587_v42 = vld [vmem:[%s2299_s1 + $0xa0] ss:$8 sps:$4 sm:$0xff]   ;;  %v1589_v44 = vld [vmem:[%s2299_s1 + $0xb4] ss:$8 sps:$4 sm:$0xff]   ;;  %v1593_v46 = vld [vmem:[%s2299_s1 + $0xb0] ss:$8 sps:$4 sm:$0xff]  }
  0x10   :  { %1116 = vmatpush1.bf16.msra.mxu0 %v1546_v15  ;;  %1011 = vmatprep.subr.bf16.mxu1 %v1547_v16  ;;  %v1588_v43 = vld [vmem:[%s2299_s1 + $0x2a0] ss:$8 sps:$4 sm:$0xff]   ;;  %v1591_v45 = vld [vmem:[%s2299_s1 + $0x2b4] ss:$8 sps:$4 sm:$0xff]   ;;  %v1594_v47 = vld [vmem:[%s2299_s1 + $0x2b0] ss:$8 sps:$4 sm:$0xff]  }
  0x11   :  { %1117 = vmatprep.subr.bf16.mxu0 %v1549_v17  ;;  %v1621_v48 = vld [vmem:[%s2300_s0 + $0x4] ss:$36 sps:$4 sm:$0xff]   ;;  %v1627_v51 = vld [vmem:[%s2300_s0 + $0x14] ss:$36 sps:$4 sm:$0xff]  }
  0x12   :  { %v1595_v49 = vld [vmem:[%s2299_s1 + $0xc4] ss:$8 sps:$4 sm:$0xff]   ;;  %1035 = vmatprep.mubr.bf16.mxu1 %v1621_v48  ;;  %v1599_v52 = vld [vmem:[%s2299_s1 + $0xc0] ss:$8 sps:$4 sm:$0xff]   ;;  %v1601_v54 = vld [vmem:[%s2299_s1 + $0xd4] ss:$8 sps:$4 sm:$0xff]   ;;  %1141 = vmatprep.mubr.bf16.mxu0 %v1627_v51 }
  0x13   :  { %1012 = vmatpush1.bf16.msra.mxu1 %v1551_v18  ;;  %v1597_v50 = vld [vmem:[%s2299_s1 + $0x2c4] ss:$8 sps:$4 sm:$0xff]   ;;  %v1600_v53 = vld [vmem:[%s2299_s1 + $0x2c0] ss:$8 sps:$4 sm:$0xff]   ;;  %v1603_v55 = vld [vmem:[%s2299_s1 + $0x2d4] ss:$8 sps:$4 sm:$0xff]  }
  0x14   :  { %1118 = vmatpush1.bf16.msra.mxu0 %v1552_v19  ;;  %1013 = vmatprep.subr.bf16.mxu1 %v1553_v20  ;;  %v1605_v56 = vld [vmem:[%s2299_s1 + $0xd0] ss:$8 sps:$4 sm:$0xff]   ;;  %v1607_v58 = vld [vmem:[%s2299_s1 + $0xe4] ss:$8 sps:$4 sm:$0xff]   ;;  %v1611_v60 = vld [vmem:[%s2299_s1 + $0xe0] ss:$8 sps:$4 sm:$0xff]  }
  0x15   :  { %1119 = vmatprep.subr.bf16.mxu0 %v1555_v21  ;;  %v1606_v57 = vld [vmem:[%s2299_s1 + $0x2d0] ss:$8 sps:$4 sm:$0xff]   ;;  %v1609_v59 = vld [vmem:[%s2299_s1 + $0x2e4] ss:$8 sps:$4 sm:$0xff]   ;;  %v1612_v61 = vld [vmem:[%s2299_s1 + $0x2e0] ss:$8 sps:$4 sm:$0xff]  }
  0x16   :  { %v1613_v62 = vld [vmem:[%s2299_s1 + $0xf4] ss:$8 sps:$4 sm:$0xff]   ;;  %v1617_v0 = vld [vmem:[%s2299_s1 + $0xf0] ss:$8 sps:$4 sm:$0xff]   ;;  %v1624_v2 = vld [vmem:[%s2299_s1 + $0x104] ss:$8 sps:$4 sm:$0xff]  }
  0x17   :  { %1014 = vmatpush1.bf16.msra.mxu1 %v1557_v22  ;;  %v1615_v63 = vld [vmem:[%s2299_s1 + $0x2f4] ss:$8 sps:$4 sm:$0xff]   ;;  %v1618_v1 = vld [vmem:[%s2299_s1 + $0x2f0] ss:$8 sps:$4 sm:$0xff]   ;;  %v1630_v3 = vld [vmem:[%s2299_s1 + $0x304] ss:$8 sps:$4 sm:$0xff]  }
  0x18   :  { %1120 = vmatpush1.bf16.msra.mxu0 %v1558_v23  ;;  %1015 = vmatprep.subr.bf16.mxu1 %v1559_v24  ;;  %v1619_v4 = vld [vmem:[%s2300_s0] ss:$36 sps:$4 sm:$0xff]   ;;  %v1625_v6 = vld [vmem:[%s2300_s0 + $0x10] ss:$36 sps:$4 sm:$0xff]  }
  0x19   :  { %1121 = vmatprep.subr.bf16.mxu0 %v1561_v25  ;;  %v1622_v5 = vld [vmem:[%s2299_s1 + $0x100] ss:$8 sps:$4 sm:$0xff]   ;;  %v1633_v8 = vld [vmem:[%s2299_s1 + $0x114] ss:$8 sps:$4 sm:$0xff]   ;;  %v1631_v10 = vld [vmem:[%s2299_s1 + $0x110] ss:$8 sps:$4 sm:$0xff]  }
  0x1a   :  { %v1628_v7 = vld [vmem:[%s2299_s1 + $0x300] ss:$8 sps:$4 sm:$0xff]   ;;  %v1636_v9 = vld [vmem:[%s2299_s1 + $0x314] ss:$8 sps:$4 sm:$0xff]   ;;  %v1634_v11 = vld [vmem:[%s2299_s1 + $0x310] ss:$8 sps:$4 sm:$0xff]  }
  0x1b   :  { %1016 = vmatpush1.bf16.msra.mxu1 %v1563_v26  ;;  %v1639_v12 = vld [vmem:[%s2299_s1 + $0x124] ss:$8 sps:$4 sm:$0xff]   ;;  %v1637_v14 = vld [vmem:[%s2299_s1 + $0x120] ss:$8 sps:$4 sm:$0xff]   ;;  %v1645_v16 = vld [vmem:[%s2299_s1 + $0x134] ss:$8 sps:$4 sm:$0xff]  }
  0x1c   :  { %1122 = vmatpush1.bf16.msra.mxu0 %v1564_v27  ;;  %1017 = vmatprep.subr.bf16.mxu1 %v1565_v28  ;;  %v1642_v13 = vld [vmem:[%s2299_s1 + $0x324] ss:$8 sps:$4 sm:$0xff]   ;;  %v1640_v15 = vld [vmem:[%s2299_s1 + $0x320] ss:$8 sps:$4 sm:$0xff]   ;;  %v1648_v17 = vld [vmem:[%s2299_s1 + $0x334] ss:$8 sps:$4 sm:$0xff]  }
  0x1d   :  { %1123 = vmatprep.subr.bf16.mxu0 %v1567_v29  ;;  %v1643_v18 = vld [vmem:[%s2299_s1 + $0x130] ss:$8 sps:$4 sm:$0xff]   ;;  %v1651_v20 = vld [vmem:[%s2299_s1 + $0x144] ss:$8 sps:$4 sm:$0xff]   ;;  %v1649_v22 = vld [vmem:[%s2299_s1 + $0x140] ss:$8 sps:$4 sm:$0xff]  }
  0x1e   :  { %v1646_v19 = vld [vmem:[%s2299_s1 + $0x330] ss:$8 sps:$4 sm:$0xff]   ;;  %v1654_v21 = vld [vmem:[%s2299_s1 + $0x344] ss:$8 sps:$4 sm:$0xff]   ;;  %v1652_v23 = vld [vmem:[%s2299_s1 + $0x340] ss:$8 sps:$4 sm:$0xff]  }
  0x1f   :  { %1018 = vmatpush1.bf16.msra.mxu1 %v1569_v30  ;;  %v1657_v24 = vld [vmem:[%s2299_s1 + $0x154] ss:$8 sps:$4 sm:$0xff]   ;;  %v1655_v26 = vld [vmem:[%s2299_s1 + $0x150] ss:$8 sps:$4 sm:$0xff]   ;;  %v1663_v28 = vld [vmem:[%s2299_s1 + $0x164] ss:$8 sps:$4 sm:$0xff]  }
  0x20   :  { %1124 = vmatpush1.bf16.msra.mxu0 %v1570_v31  ;;  %1019 = vmatprep.subr.bf16.mxu1 %v1571_v32  ;;  %v1660_v25 = vld [vmem:[%s2299_s1 + $0x354] ss:$8 sps:$4 sm:$0xff]   ;;  %v1658_v27 = vld [vmem:[%s2299_s1 + $0x350] ss:$8 sps:$4 sm:$0xff]   ;;  %v1713_v31 = vld [vmem:[%s2300_s0 + $0x48] ss:$36 sps:$4 sm:$0xff]  }
  0x21   :  { %1125 = vmatprep.subr.bf16.mxu0 %v1573_v33  ;;  %v1709_v29 = vld [vmem:[%s2300_s0 + $0x4c] ss:$36 sps:$4 sm:$0xff]   ;;  %v1711_v30 = vld [vmem:[%s2300_s0 + $0x5c] ss:$36 sps:$4 sm:$0xff]  }
  0x22   :  { %v1666_v32 = vld [vmem:[%s2299_s1 + $0x364] ss:$8 sps:$4 sm:$0xff]   ;;  %v1717_v33 = vld [vmem:[%s2300_s0 + $0x58] ss:$36 sps:$4 sm:$0xff]  }
  0x23   :  { %1020 = vmatpush1.bf16.msra.mxu1 %v1575_v34  ;;  %v1661_v34 = vld [vmem:[%s2299_s1 + $0x160] ss:$8 sps:$4 sm:$0xff]   ;;  %v1679_v48 = vld [vmem:[%s2299_s1 + $0x190] ss:$8 sps:$4 sm:$0xff]   ;;  %v1690_v51 = vld [vmem:[%s2299_s1 + $0x3a4] ss:$8 sps:$4 sm:$0xff]  }
  0x24   :  { %1126 = vmatpush1.bf16.msra.mxu0 %v1576_v35  ;;  %1021 = vmatprep.subr.bf16.mxu1 %v1577_v36  ;;  %v1664_v35 = vld [vmem:[%s2299_s1 + $0x360] ss:$8 sps:$4 sm:$0xff]   ;;  %v1669_v36 = vld [vmem:[%s2299_s1 + $0x174] ss:$8 sps:$4 sm:$0xff]  }
  0x25   :  { %1127 = vmatprep.subr.bf16.mxu0 %v1579_v37  ;;  %v1672_v37 = vld [vmem:[%s2299_s1 + $0x374] ss:$8 sps:$4 sm:$0xff]  }
  0x27   :  { %1022 = vmatpush1.bf16.msra.mxu1 %v1581_v38  ;;  %v1667_v38 = vld [vmem:[%s2299_s1 + $0x170] ss:$8 sps:$4 sm:$0xff]  }
  0x28   :  { %1128 = vmatpush1.bf16.msra.mxu0 %v1582_v39  ;;  %1023 = vmatprep.subr.bf16.mxu1 %v1583_v40  ;;  %v1670_v39 = vld [vmem:[%s2299_s1 + $0x370] ss:$8 sps:$4 sm:$0xff]   ;;  %v1675_v40 = vld [vmem:[%s2299_s1 + $0x184] ss:$8 sps:$4 sm:$0xff]  }
  0x29   :  { %1129 = vmatprep.subr.bf16.mxu0 %v1585_v41  ;;  %v1729_v41 = vld [vmem:[%s2300_s0 + $0xc] ss:$36 sps:$4 sm:$0xff]  }
  0x2b   :  { %1024 = vmatpush1.bf16.msra.mxu1 %v1587_v42  ;;  %v1678_v42 = vld [vmem:[%s2299_s1 + $0x384] ss:$8 sps:$4 sm:$0xff]  }
  0x2c   :  { %1130 = vmatpush1.bf16.msra.mxu0 %v1588_v43  ;;  %1025 = vmatprep.subr.bf16.mxu1 %v1589_v44  ;;  %v1732_v43 = vld [vmem:[%s2300_s0 + $0x1c] ss:$36 sps:$4 sm:$0xff]  }
  0x2d   :  { %1131 = vmatprep.subr.bf16.mxu0 %v1591_v45  ;;  %v1673_v44 = vld [vmem:[%s2299_s1 + $0x180] ss:$8 sps:$4 sm:$0xff]  }
  0x2e   :  { %v1676_v45 = vld [vmem:[%s2299_s1 + $0x380] ss:$8 sps:$4 sm:$0xff]  }
  0x2f   :  { %1026 = vmatpush1.bf16.msra.mxu1 %v1593_v46  ;;  %v1681_v46 = vld [vmem:[%s2299_s1 + $0x194] ss:$8 sps:$4 sm:$0xff]  }
  0x30   :  { %1132 = vmatpush1.bf16.msra.mxu0 %v1594_v47  ;;  %1027 = vmatprep.subr.bf16.mxu1 %v1595_v49  ;;  %v1684_v47 = vld [vmem:[%s2299_s1 + $0x394] ss:$8 sps:$4 sm:$0xff]   ;;  %v1682_v49 = vld [vmem:[%s2299_s1 + $0x390] ss:$8 sps:$4 sm:$0xff]  }
  0x31   :  { %1133 = vmatprep.subr.bf16.mxu0 %v1597_v50  ;;  %v1687_v50 = vld [vmem:[%s2299_s1 + $0x1a4] ss:$8 sps:$4 sm:$0xff]  }
  0x33   :  { %1028 = vmatpush1.bf16.msra.mxu1 %v1599_v52  ;;  %v1685_v52 = vld [vmem:[%s2299_s1 + $0x1a0] ss:$8 sps:$4 sm:$0xff]  }
  0x34   :  { %1134 = vmatpush1.bf16.msra.mxu0 %v1600_v53  ;;  %1029 = vmatprep.subr.bf16.mxu1 %v1601_v54  ;;  %v1688_v53 = vld [vmem:[%s2299_s1 + $0x3a0] ss:$8 sps:$4 sm:$0xff]   ;;  %v1693_v54 = vld [vmem:[%s2299_s1 + $0x1b4] ss:$8 sps:$4 sm:$0xff]  }
  0x35   :  { %1135 = vmatprep.subr.bf16.mxu0 %v1603_v55  ;;  %v1696_v55 = vld [vmem:[%s2299_s1 + $0x3b4] ss:$8 sps:$4 sm:$0xff]  }
  0x37   :  { %1030 = vmatpush1.bf16.msra.mxu1 %v1605_v56  ;;  %v1691_v56 = vld [vmem:[%s2299_s1 + $0x1b0] ss:$8 sps:$4 sm:$0xff]  }
  0x38   :  { %1136 = vmatpush1.bf16.msra.mxu0 %v1606_v57  ;;  %1031 = vmatprep.subr.bf16.mxu1 %v1607_v58  ;;  %v1694_v57 = vld [vmem:[%s2299_s1 + $0x3b0] ss:$8 sps:$4 sm:$0xff]   ;;  %v1699_v58 = vld [vmem:[%s2299_s1 + $0x1c4] ss:$8 sps:$4 sm:$0xff]  }
  0x39   :  { %1137 = vmatprep.subr.bf16.mxu0 %v1609_v59  ;;  %v1702_v59 = vld [vmem:[%s2299_s1 + $0x3c4] ss:$8 sps:$4 sm:$0xff]  }
  0x3b   :  { %1032 = vmatpush1.bf16.msra.mxu1 %v1611_v60  ;;  %v1697_v60 = vld [vmem:[%s2299_s1 + $0x1c0] ss:$8 sps:$4 sm:$0xff]  }
  0x3c   :  { %1138 = vmatpush1.bf16.msra.mxu0 %v1612_v61  ;;  %1033 = vmatprep.subr.bf16.mxu1 %v1613_v62  ;;  %v1700_v61 = vld [vmem:[%s2299_s1 + $0x3c0] ss:$8 sps:$4 sm:$0xff]   ;;  %v1705_v62 = vld [vmem:[%s2299_s1 + $0x1d4] ss:$8 sps:$4 sm:$0xff]  }
  0x3d   :  { %1139 = vmatprep.subr.bf16.mxu0 %v1615_v63  ;;  %v1708_v63 = vld [vmem:[%s2299_s1 + $0x3d4] ss:$8 sps:$4 sm:$0xff]  }
  0x3f   :  { %1034 = vmatpush1.bf16.msra.mxu1 %v1617_v0  ;;  %v1703_v0 = vld [vmem:[%s2299_s1 + $0x1d0] ss:$8 sps:$4 sm:$0xff]  }
  0x40   :  { %1140 = vmatpush1.bf16.msra.mxu0 %v1618_v1  ;;  %1056 = vmatprep.subr.bf16.mxu1 %v1624_v2  ;;  %v1706_v1 = vld [vmem:[%s2299_s1 + $0x3d0] ss:$8 sps:$4 sm:$0xff]   ;;  %v1716_v2 = vld [vmem:[%s2299_s1 + $0x1e4] ss:$8 sps:$4 sm:$0xff]  }
  0x41   :  { %1162 = vmatprep.subr.bf16.mxu0 %v1630_v3  ;;  %v1720_v3 = vld [vmem:[%s2299_s1 + $0x3e4] ss:$8 sps:$4 sm:$0xff]  }
  0x42   :  { %1036 = vmatmul.mubr.bf16.vlgmr.msra.gmra.mrb[0].mxu1 %v1619_v4  ;;  %v1714_v4 = vld [vmem:[%s2299_s1 + $0x1e0] ss:$8 sps:$4 sm:$0xff]  }
  0x43   :  { %1142 = vmatmul.mubr.bf16.vlgmr.msra.gmra.mrb[0].mxu0 %v1625_v6  ;;  %1057 = vmatpush1.bf16.msra.mxu1 %v1622_v5  ;;  %v1718_v5 = vld [vmem:[%s2299_s1 + $0x3e0] ss:$8 sps:$4 sm:$0xff]   ;;  %v1723_v6 = vld [vmem:[%s2299_s1 + $0x1f4] ss:$8 sps:$4 sm:$0xff]  }
  0x44   :  { %1163 = vmatpush1.bf16.msra.mxu0 %v1628_v7  ;;  %1058 = vmatprep.subr.bf16.mxu1 %v1633_v8  ;;  %v1726_v7 = vld [vmem:[%s2299_s1 + $0x3f4] ss:$8 sps:$4 sm:$0xff]   ;;  %v1721_v8 = vld [vmem:[%s2299_s1 + $0x1f0] ss:$8 sps:$4 sm:$0xff]  }
  0x45   :  { %1164 = vmatprep.subr.bf16.mxu0 %v1636_v9  ;;  %1045 = vmatprep.mubr.bf16.mxu1 %v1709_v29  ;;  %v1724_v9 = vld [vmem:[%s2299_s1 + $0x3f0] ss:$8 sps:$4 sm:$0xff]   ;;  %v1759_v29 = vld [vmem:[%s2299_s1 + $0x464] ss:$8 sps:$4 sm:$0xff]  }
  0x46   :  { %1151 = vmatprep.mubr.bf16.mxu0 %v1711_v30  ;;  %v1757_v30 = vld [vmem:[%s2299_s1 + $0x460] ss:$8 sps:$4 sm:$0xff]  }
  0x47   :  { %1059 = vmatpush1.bf16.msra.mxu1 %v1631_v10  ;;  %v1735_v10 = vld [vmem:[%s2299_s1 + $0x404] ss:$8 sps:$4 sm:$0xff]  }
  0x48   :  { %1165 = vmatpush1.bf16.msra.mxu0 %v1634_v11  ;;  %1060 = vmatprep.subr.bf16.mxu1 %v1639_v12  ;;  %v1727_v11 = vld [vmem:[%s2300_s0 + $0x8] ss:$36 sps:$4 sm:$0xff]   ;;  %v1730_v12 = vld [vmem:[%s2300_s0 + $0x18] ss:$36 sps:$4 sm:$0xff]  }
  0x49   :  { %1166 = vmatprep.subr.bf16.mxu0 %v1642_v13  ;;  %v1733_v13 = vld [vmem:[%s2299_s1 + $0x400] ss:$8 sps:$4 sm:$0xff]  }
  0x4a   :  { %1046 = vmatmul.mubr.bf16.gmra.mrb[4].mxu1 %v1713_v31  ;;  %v1762_v31 = vld [vmem:[%s2299_s1 + $0x474] ss:$8 sps:$4 sm:$0xff]  }
  0x4b   :  { %1061 = vmatpush1.bf16.msra.mxu1 %v1637_v14  ;;  %1152 = vmatmul.mubr.bf16.gmra.mrb[4].mxu0 %v1717_v33  ;;  %v1738_v14 = vld [vmem:[%s2299_s1 + $0x414] ss:$8 sps:$4 sm:$0xff]   ;;  %v1763_v33 = vld [vmem:[%s2300_s0 + $0x20] ss:$36 sps:$4 sm:$0xff]  }
  0x4c   :  { %1167 = vmatpush1.bf16.msra.mxu0 %v1640_v15  ;;  %1062 = vmatprep.subr.bf16.mxu1 %v1645_v16  ;;  %v1739_v15 = vld [vmem:[%s2300_s0 + $0x54] ss:$36 sps:$4 sm:$0xff]   ;;  %v1741_v16 = vld [vmem:[%s2300_s0 + $0x64] ss:$36 sps:$4 sm:$0xff]  }
  0x4d   :  { %1168 = vmatprep.subr.bf16.mxu0 %v1648_v17  ;;  %1088 = vmatprep.mubr.bf16.mxu1 %v1729_v41  ;;  %v1736_v17 = vld [vmem:[%s2299_s1 + $0x410] ss:$8 sps:$4 sm:$0xff]  }
  0x4e   :  { %1194 = vmatprep.mubr.bf16.mxu0 %v1732_v43 }
  0x4f   :  { %1063 = vmatpush1.bf16.msra.mxu1 %v1643_v18  ;;  %v1747_v18 = vld [vmem:[%s2299_s1 + $0x424] ss:$8 sps:$4 sm:$0xff]  }
  0x50   :  { %1169 = vmatpush1.bf16.msra.mxu0 %v1646_v19  ;;  %1064 = vmatprep.subr.bf16.mxu1 %v1651_v20  ;;  %v1743_v19 = vld [vmem:[%s2300_s0 + $0x50] ss:$36 sps:$4 sm:$0xff]   ;;  %v1744_v20 = vld [vmem:[%s2300_s0 + $0x60] ss:$36 sps:$4 sm:$0xff]  }
  0x51   :  { %1170 = vmatprep.subr.bf16.mxu0 %v1654_v21  ;;  %v1745_v21 = vld [vmem:[%s2299_s1 + $0x420] ss:$8 sps:$4 sm:$0xff]  }
  0x53   :  { %1065 = vmatpush1.bf16.msra.mxu1 %v1649_v22  ;;  %v1750_v22 = vld [vmem:[%s2299_s1 + $0x434] ss:$8 sps:$4 sm:$0xff]  }
  0x54   :  { %1171 = vmatpush1.bf16.msra.mxu0 %v1652_v23  ;;  %1066 = vmatprep.subr.bf16.mxu1 %v1657_v24  ;;  %v1748_v23 = vld [vmem:[%s2299_s1 + $0x430] ss:$8 sps:$4 sm:$0xff]   ;;  %v1753_v24 = vld [vmem:[%s2299_s1 + $0x444] ss:$8 sps:$4 sm:$0xff]  }
  0x55   :  { %1172 = vmatprep.subr.bf16.mxu0 %v1660_v25  ;;  %v1765_v25 = vmov 0  }
  0x57   :  { %1067 = vmatpush1.bf16.msra.mxu1 %v1655_v26  ;;  %v1751_v26 = vld [vmem:[%s2299_s1 + $0x440] ss:$8 sps:$4 sm:$0xff]  }
  0x58   :  { %1173 = vmatpush1.bf16.msra.mxu0 %v1658_v27  ;;  %1068 = vmatprep.subr.bf16.mxu1 %v1663_v28  ;;  %v1756_v27 = vld [vmem:[%s2299_s1 + $0x454] ss:$8 sps:$4 sm:$0xff]   ;;  %v1754_v28 = vld [vmem:[%s2299_s1 + $0x450] ss:$8 sps:$4 sm:$0xff]  }
  0x59   :  { %1174 = vmatprep.subr.bf16.mxu0 %v1666_v32  ;;  %v1760_v32 = vld [vmem:[%s2299_s1 + $0x470] ss:$8 sps:$4 sm:$0xff]  }
  0x5b   :  { %1069 = vmatpush1.bf16.msra.mxu1 %v1661_v34  ;;  %v1764_v34 = vld [vmem:[%s2300_s0 + $0x68] ss:$36 sps:$4 sm:$0xff]  }
  0x5c   :  { %1175 = vmatpush1.bf16.msra.mxu0 %v1664_v35  ;;  %1070 = vmatprep.subr.bf16.mxu1 %v1669_v36  ;;  %v181_v35 = vlaneseq }
  0x5d   :  { %1176 = vmatprep.subr.bf16.mxu0 %v1672_v37 }
  0x5e   :  { %v182_v36 = vshrl.u32 %v181_v35, 7 }
  0x5f   :  { %1071 = vmatpush1.bf16.msra.mxu1 %v1667_v38 }
  0x60   :  { %1177 = vmatpush1.bf16.msra.mxu0 %v1670_v39  ;;  %1072 = vmatprep.subr.bf16.mxu1 %v1675_v40  ;;  %v183_v40 = vsub.s32 0, %v182_v36  ;;  %v187_v43 = vsub.s32 1, %v182_v36 }
  0x61   :  { %1178 = vmatprep.subr.bf16.mxu0 %v1678_v42  ;;  %v179_v42 = vld [vmem:[%s2301_s2] sm:$0x3] }
  0x63   :  { %1073 = vmatpush1.bf16.msra.mxu1 %v1673_v44  ;;  %v184_v44 = vrot.slane %v179_v42, %v183_v40 }
  0x64   :  { %1179 = vmatpush1.bf16.msra.mxu0 %v1676_v45  ;;  %1074 = vmatprep.subr.bf16.mxu1 %v1681_v46  ;;  %v188_v45 = vrot.slane %v179_v42, %v187_v43 }
  0x65   :  { %1180 = vmatprep.subr.bf16.mxu0 %v1684_v47 }
  0x67   :  { %1075 = vmatpush1.bf16.msra.mxu1 %v1679_v48 }
  0x68   :  { %1181 = vmatpush1.bf16.msra.mxu0 %v1682_v49  ;;  %1076 = vmatprep.subr.bf16.mxu1 %v1687_v50 }
  0x69   :  { %1182 = vmatprep.subr.bf16.mxu0 %v1690_v51 }
  0x6b   :  { %1077 = vmatpush1.bf16.msra.mxu1 %v1685_v52 }
  0x6c   :  { %1183 = vmatpush1.bf16.msra.mxu0 %v1688_v53  ;;  %1078 = vmatprep.subr.bf16.mxu1 %v1693_v54 }
  0x6d   :  { %1184 = vmatprep.subr.bf16.mxu0 %v1696_v55 }
  0x6f   :  { %1079 = vmatpush1.bf16.msra.mxu1 %v1691_v56 }
  0x70   :  { %1185 = vmatpush1.bf16.msra.mxu0 %v1694_v57  ;;  %1080 = vmatprep.subr.bf16.mxu1 %v1699_v58 }
  0x71   :  { %1186 = vmatprep.subr.bf16.mxu0 %v1702_v59 }
  0x73   :  { %1081 = vmatpush1.bf16.msra.mxu1 %v1697_v60 }
  0x74   :  { %1187 = vmatpush1.bf16.msra.mxu0 %v1700_v61  ;;  %1082 = vmatprep.subr.bf16.mxu1 %v1705_v62 }
  0x75   :  { %1188 = vmatprep.subr.bf16.mxu0 %v1708_v63 }
  0x77   :  { %1083 = vmatpush1.bf16.msra.mxu1 %v1703_v0 }
  0x78   :  { %1189 = vmatpush1.bf16.msra.mxu0 %v1706_v1  ;;  %1084 = vmatprep.subr.bf16.mxu1 %v1716_v2 }
  0x79   :  { %1190 = vmatprep.subr.bf16.mxu0 %v1720_v3 }
  0x7b   :  { %1085 = vmatpush1.bf16.msra.mxu1 %v1714_v4 }
  0x7c   :  { %1191 = vmatpush1.bf16.msra.mxu0 %v1718_v5  ;;  %1086 = vmatprep.subr.bf16.mxu1 %v1723_v6 }
  0x7d   :  { %1192 = vmatprep.subr.bf16.mxu0 %v1726_v7 }
  0x7f   :  { %1087 = vmatpush1.bf16.msra.mxu1 %v1721_v8 }
  0x80   :  { %1193 = vmatpush1.bf16.msra.mxu0 %v1724_v9  ;;  %1466 = vmatprep.subr.bf16.mxu1 %v1735_v10 }
  0x81   :  { %1215 = vmatprep.subr.bf16.mxu0 %v1735_v10 }
  0x82   :  { %1089 = vmatmul.mubr.bf16.vlgmr.msra.gmra.mrb[0].mxu1 %v1727_v11 }
  0x83   :  { %1195 = vmatmul.mubr.bf16.vlgmr.msra.gmra.mrb[0].mxu0 %v1730_v12  ;;  %1474 = vmatpush1.bf16.msra.mxu1 %v1733_v13 }
  0x84   :  { %1216 = vmatpush1.bf16.msra.mxu0 %v1733_v13  ;;  %1467 = vmatprep.subr.bf16.mxu1 %v1738_v14 }
  0x85   :  { %1217 = vmatprep.subr.bf16.mxu0 %v1738_v14  ;;  %1098 = vmatprep.mubr.bf16.mxu1 %v1739_v15 }
  0x86   :  { %1204 = vmatprep.mubr.bf16.mxu0 %v1741_v16 }
  0x87   :  { %1475 = vmatpush1.bf16.msra.mxu1 %v1736_v17 }
  0x88   :  { %1218 = vmatpush1.bf16.msra.mxu0 %v1736_v17  ;;  %1468 = vmatprep.subr.bf16.mxu1 %v1747_v18 }
  0x89   :  { %1219 = vmatprep.subr.bf16.mxu0 %v1747_v18 }
  0x8a   :  { %1099 = vmatmul.mubr.bf16.gmra.mrb[4].mxu1 %v1743_v19 }
  0x8b   :  { %1205 = vmatmul.mubr.bf16.gmra.mrb[4].mxu0 %v1744_v20  ;;  %1476 = vmatpush1.bf16.msra.mxu1 %v1745_v21 }
  0x8c   :  { %1220 = vmatpush1.bf16.msra.mxu0 %v1745_v21  ;;  %1469 = vmatprep.subr.bf16.mxu1 %v1750_v22 }
  0x8d   :  { %1221 = vmatprep.subr.bf16.mxu0 %v1750_v22  ;;  %1247 = vmatprep.mubr.bf16.mxu0 %v1765_v25 }
  0x8e   :  { %1257 = vmatprep.mubr.bf16.mxu1 %v1765_v25 }
  0x8f   :  { %1477 = vmatpush1.bf16.msra.mxu1 %v1748_v23 }
  0x90   :  { %1222 = vmatpush1.bf16.msra.mxu0 %v1748_v23  ;;  %1470 = vmatprep.subr.bf16.mxu1 %v1753_v24 }
  0x91   :  { %1223 = vmatprep.subr.bf16.mxu0 %v1753_v24 }
  0x93   :  { %1478 = vmatpush1.bf16.msra.mxu1 %v1751_v26 }
  0x94   :  { %1224 = vmatpush1.bf16.msra.mxu0 %v1751_v26  ;;  %1471 = vmatprep.subr.bf16.mxu1 %v1756_v27 }
  0x95   :  { %1225 = vmatprep.subr.bf16.mxu0 %v1756_v27 }
  0x97   :  { %1479 = vmatpush1.bf16.msra.mxu1 %v1754_v28 }
  0x98   :  { %1226 = vmatpush1.bf16.msra.mxu0 %v1754_v28  ;;  %1472 = vmatprep.subr.bf16.mxu1 %v1759_v29 }
  0x99   :  { %1227 = vmatprep.subr.bf16.mxu0 %v1759_v29 }
  0x9b   :  { %1480 = vmatpush1.bf16.msra.mxu1 %v1757_v30 }
  0x9c   :  { %1228 = vmatpush1.bf16.msra.mxu0 %v1757_v30  ;;  %1473 = vmatprep.subr.bf16.mxu1 %v1762_v31 }
  0x9d   :  { %1229 = vmatprep.subr.bf16.mxu0 %v1762_v31 }
  0x9f   :  { %1481 = vmatpush1.bf16.msra.mxu1 %v1760_v32 }
  0xa0   :  { %1230 = vmatpush1.bf16.msra.mxu0 %v1760_v32 }
  0xa2   :  { %1258 = vmatmul.mubr.bf16.vlgmr.msra.gmra.mrb[8].mxu1 %v1764_v34 }
  0xa3   :  { %1248 = vmatmul.mubr.bf16.vlgmr.msra.gmra.mrb[0].mxu0 %v1763_v33 }
 0x155   :  { %v1090_v37 = vpop.f32.mrb[0].mxu1 }
 0x156   :  { %v1092_v38 = vpop.f32.mrb[1].mxu1  ;;  %v1482_v62 = vadd.f32 %v1090_v37, %v184_v44 }
 0x157   :  { %v1094_v39 = vpop.f32.mrb[2].mxu1  ;;  %v1484_v63 = vadd.f32 %v1092_v38, %v188_v45 }
 0x158   :  { %v1096_v41 = vpop.f32.mrb[3].mxu1  ;;  %v1486_v6 = vadd.f32 %v1094_v39, %v184_v44 }
 0x159   :  { %v1488_v7 = vadd.f32 %v1096_v41, %v188_v45 }
 0x15d   :  { %v1100_v46 = vpop.f32.mrb[4].mxu1 }
 0x15e   :  { %v1206_v47 = vpop.f32.mrb[4].mxu0  ;;  %v1490_v48 = vadd.f32 %v1100_v46, %v184_v44  ;;  %v1102_v49 = vpop.f32.mrb[5].mxu1 }
 0x15f   :  { %v1208_v50 = vpop.f32.mrb[5].mxu0  ;;  %v1493_v51 = vadd.f32 %v1102_v49, %v188_v45  ;;  %v1104_v52 = vpop.f32.mrb[6].mxu1 }
 0x160   :  { %v1210_v53 = vpop.f32.mrb[6].mxu0  ;;  %v1491_v54 = vadd.f32 %v1490_v48, %v1206_v47  ;;  %v1496_v55 = vadd.f32 %v1104_v52, %v184_v44  ;;  %v1106_v56 = vpop.f32.mrb[7].mxu1 }
 0x161   :  { %v1212_v57 = vpop.f32.mrb[7].mxu0  ;;  %v1494_v58 = vadd.f32 %v1493_v51, %v1208_v50  ;;  %v1499_v59 = vadd.f32 %v1106_v56, %v188_v45 }
 0x162   :  { %v1497_v60 = vadd.f32 %v1496_v55, %v1210_v53 }
 0x163   :  { %v1500_v61 = vadd.f32 %v1499_v59, %v1212_v57 }
 0x175   :  { %v1259_v1 = vpop.f32.mrb[8].mxu1 }
 0x176   :  { %v1249_v0 = vpop.f32.mrb[0].mxu0  ;;  %v1492_v3 = vadd.f32 %v1491_v54, %v1259_v1  ;;  %v1261_v5 = vpop.f32.mrb[9].mxu1 }
 0x177   :  { %v1483_v2 = vadd.f32 %v1482_v62, %v1249_v0  ;;  %v1251_v4 = vpop.f32.mrb[1].mxu0  ;;  %v1495_v9 = vadd.f32 %v1494_v58, %v1261_v5  ;;  %v1263_v11 = vpop.f32.mrb[10].mxu1 }
 0x178   :  { %v1485_v8 = vadd.f32 %v1484_v63, %v1251_v4  ;;  %v1253_v10 = vpop.f32.mrb[2].mxu0  ;;  %vm1272_vm1 = vcmp.ge.f32.partialorder %v1492_v3, 0.0  ;;  %v1280_v13 = vmul.f32 0.01, %v1492_v3  ;;  %v1498_v19 = vadd.f32 %v1497_v60, %v1263_v11  ;;  %v1265_v21 = vpop.f32.mrb[11].mxu1 }
 0x179   :  { %vm1268_vm0 = vcmp.ge.f32.partialorder %v1483_v2, 0.0  ;;  %v1276_v12 = vmul.f32 0.01, %v1483_v2  ;;  %vm1273_vm3 = vcmp.ge.f32.partialorder %v1495_v9, 0.0  ;;  %v1281_v15 = vmul.f32 0.01, %v1495_v9 }
 0x17a   :  { %vm1269_vm2 = vcmp.ge.f32.partialorder %v1485_v8, 0.0  ;;  %v1277_v14 = vmul.f32 0.01, %v1485_v8  ;;  %v1288_v17 = vsel %vm1272_vm1, %v1492_v3, %v1280_v13  ;;  %v1487_v18 = vadd.f32 %v1486_v6, %v1253_v10  ;;  %v1255_v20 = vpop.f32.mrb[3].mxu0 }
 0x17b   :  { %v1284_v16 = vsel %vm1268_vm0, %v1483_v2, %v1276_v12  ;;  %1296 = vst [vmem:[%s2302_s3 + $0x20] sm:$0xff] %v1288_v17  ;;  %v1289_v23 = vsel %vm1273_vm3, %v1495_v9, %v1281_v15  ;;  %v1489_v24 = vadd.f32 %v1488_v7, %v1255_v20  ;;  %v1501_v25 = vadd.f32 %v1500_v61, %v1265_v21 }
 0x17c   :  { %1292 = vst [vmem:[%s2302_s3] sm:$0xff] %v1284_v16  ;;  %v1285_v22 = vsel %vm1269_vm2, %v1485_v8, %v1277_v14  ;;  %1297 = vst [vmem:[%s2302_s3 + $0x28] sm:$0xff] %v1289_v23  ;;  %vm1270_vm4 = vcmp.ge.f32.partialorder %v1487_v18, 0.0  ;;  %v1278_v26 = vmul.f32 0.01, %v1487_v18  ;;  %vm1274_vm5 = vcmp.ge.f32.partialorder %v1498_v19, 0.0 }
 0x17d   :  { %1293 = vst [vmem:[%s2302_s3 + $0x8] sm:$0xff] %v1285_v22  ;;  %v1282_v27 = vmul.f32 0.01, %v1498_v19  ;;  %vm1271_vm6 = vcmp.ge.f32.partialorder %v1489_v24, 0.0  ;;  %v1279_v28 = vmul.f32 0.01, %v1489_v24 }
 0x17e   :  { %vm1275_vm7 = vcmp.ge.f32.partialorder %v1501_v25, 0.0  ;;  %v1283_v29 = vmul.f32 0.01, %v1501_v25  ;;  %v1286_v30 = vsel %vm1270_vm4, %v1487_v18, %v1278_v26 }
 0x17f   :  { %v1290_v31 = vsel %vm1274_vm5, %v1498_v19, %v1282_v27  ;;  %1294 = vst [vmem:[%s2302_s3 + $0x10] sm:$0xff] %v1286_v30  ;;  %v1287_v32 = vsel %vm1271_vm6, %v1489_v24, %v1279_v28 }
 0x180   :  { %1298 = vst [vmem:[%s2302_s3 + $0x30] sm:$0xff] %v1290_v31  ;;  %v1291_v33 = vsel %vm1275_vm7, %v1501_v25, %v1283_v29  ;;  %1295 = vst [vmem:[%s2302_s3 + $0x18] sm:$0xff] %v1287_v32 }
 0x181   :  { %1299 = vst [vmem:[%s2302_s3 + $0x38] sm:$0xff] %v1291_v33 }

// kernel: classifier_forward.11
= control target key start
LH: loop header
LB: loop body
LE: loop exit
PB: predicated region body
PF: predicated region fallthrough
CT: control target
= control target key end

     0   :  { %vm118_vm0 = vcmask 1041409   ;;  %s904_s0 = inlined_call_operand.vmem [shape: f32[2,16,256], index: 0, kind: input, shape index: {}]   ;;  %s905_s1 = inlined_call_operand.vmem [shape: bf16[256,256], index: 1, kind: input, shape index: {}]   ;;  %s906_s2 = inlined_call_operand.vmem [shape: f32[1,256], index: 2, kind: input, shape index: {}]   ;;  %s907_s3 = inlined_call_operand.vmem [shape: bf16[256,4], index: 3, kind: input, shape index: {}]   ;;  %s908_s4 = inlined_call_operand.vmem [shape: f32[1,4], index: 4, kind: input, shape index: {}]   ;;  %s909_s5 = inlined_call_operand.hbm [shape: f32[2,4], index: 5, kind: output, shape index: {}]  }
   0x1   :  { %v597_v0 = vld [vmem:[%s905_s1 + $0x4] ss:$8 sps:$4 sm:$0xff]   ;;  %v599_v1 = vld [vmem:[%s905_s1] ss:$8 sps:$4 sm:$0xff]   ;;  %v600_v2 = vld [vmem:[%s905_s1 + $0x14] ss:$8 sps:$4 sm:$0xff]  }
   0x2   :  { %285 = vmatprep.subr.bf16.mxu0 %v597_v0  ;;  %v602_v3 = vld [vmem:[%s905_s1 + $0x10] ss:$8 sps:$4 sm:$0xff]   ;;  %v603_v4 = vld [vmem:[%s905_s1 + $0x24] ss:$8 sps:$4 sm:$0xff]   ;;  %v605_v5 = vld [vmem:[%s905_s1 + $0x20] ss:$8 sps:$4 sm:$0xff]  }
   0x3   :  { %286 = vmatpush1.bf16.msra.mxu0 %v599_v1  ;;  %v606_v6 = vld [vmem:[%s905_s1 + $0x34] ss:$8 sps:$4 sm:$0xff]   ;;  %v608_v7 = vld [vmem:[%s905_s1 + $0x30] ss:$8 sps:$4 sm:$0xff]   ;;  %v609_v8 = vld [vmem:[%s905_s1 + $0x44] ss:$8 sps:$4 sm:$0xff]  }
   0x4   :  { %287 = vmatprep.subr.bf16.mxu0 %v600_v2  ;;  %v611_v9 = vld [vmem:[%s905_s1 + $0x40] ss:$8 sps:$4 sm:$0xff]   ;;  %v612_v10 = vld [vmem:[%s905_s1 + $0x54] ss:$8 sps:$4 sm:$0xff]   ;;  %v614_v11 = vld [vmem:[%s905_s1 + $0x50] ss:$8 sps:$4 sm:$0xff]  }
   0x5   :  { %v615_v12 = vld [vmem:[%s905_s1 + $0x64] ss:$8 sps:$4 sm:$0xff]   ;;  %v617_v13 = vld [vmem:[%s905_s1 + $0x60] ss:$8 sps:$4 sm:$0xff]   ;;  %v25_v15 = vld [vmem:[%s904_s0 + $0x18] sm:$0xff] }
   0x6   :  { %v23_v14 = vld [vmem:[%s904_s0 + $0x8] sm:$0xff]  ;;  %v618_v16 = vld [vmem:[%s905_s1 + $0x74] ss:$8 sps:$4 sm:$0xff]   ;;  %v22_v20 = vld [vmem:[%s904_s0] sm:$0xff] }
   0x7   :  { %288 = vmatpush1.bf16.msra.mxu0 %v602_v3  ;;  %v27_v17 = vld [vmem:[%s904_s0 + $0x28] sm:$0xff]  ;;  %v29_v18 = vld [vmem:[%s904_s0 + $0x38] sm:$0xff]  ;;  %v37_v19 = vadd.f32 %v25_v15, %v23_v14  ;;  %v24_v22 = vld [vmem:[%s904_s0 + $0x10] sm:$0xff] }
   0x8   :  { %289 = vmatprep.subr.bf16.mxu0 %v603_v4  ;;  %v51_v21 = vadd.f32 %v29_v18, %v27_v17  ;;  %v26_v23 = vld [vmem:[%s904_s0 + $0x20] sm:$0xff]  ;;  %v28_v24 = vld [vmem:[%s904_s0 + $0x30] sm:$0xff]  ;;  %v30_v26 = vadd.f32 %v24_v22, %v22_v20  ;;  %v647_v37 = vld [vmem:[%s907_s3 + $0x48] sm:$0xff]  }
   0x9   :  { %v38_v25 = vrot.slane %v37_v19, 4  ;;  %v44_v27 = vadd.f32 %v28_v24, %v26_v23  ;;  %v645_v28 = vld [vmem:[%s907_s3 + $0x40] sm:$0xff]   ;;  %v620_v29 = vld [vmem:[%s905_s1 + $0x70] ss:$8 sps:$4 sm:$0xff]   ;;  %v648_v41 = vld [vmem:[%s907_s3 + $0x8] sm:$0xff]  }
   0xa   :  { %v52_v30 = vrot.slane %v51_v21, 4  ;;  %v646_v31 = vld [vmem:[%s907_s3] sm:$0xff]   ;;  %v31_v34 = vrot.slane %v30_v26, 4  ;;  %574 = vmatprep.subr.bf16.mxu1 %v645_v28  ;;  %v649_v44 = vld [vmem:[%s907_s3 + $0x50] sm:$0xff]   ;;  %v651_v52 = vld [vmem:[%s907_s3 + $0x58] sm:$0xff]  }
   0xb   :  { %290 = vmatpush1.bf16.msra.mxu0 %v605_v5  ;;  %v621_v32 = vld [vmem:[%s905_s1 + $0x84] ss:$8 sps:$4 sm:$0xff]   ;;  %v39_v33 = vadd.f32 %v38_v25, %v37_v19  ;;  %v45_v35 = vrot.slane %v44_v27, 4  ;;  %575 = vmatpush3.bf16.msra.mxu1 %v646_v31  ;;  %v623_v42 = vld [vmem:[%s905_s1 + $0x80] ss:$8 sps:$4 sm:$0xff]   ;;  %v650_v49 = vld [vmem:[%s907_s3 + $0x10] sm:$0xff]  }
   0xc   :  { %291 = vmatprep.subr.bf16.mxu0 %v606_v6  ;;  %v53_v36 = vadd.f32 %v52_v30, %v51_v21  ;;  %v32_v39 = vadd.f32 %v31_v34, %v30_v26  ;;  %576 = vmatprep.subr.bf16.mxu1 %v647_v37  ;;  %v624_v45 = vld [vmem:[%s905_s1 + $0x94] ss:$8 sps:$4 sm:$0xff]   ;;  %v626_v55 = vld [vmem:[%s905_s1 + $0x90] ss:$8 sps:$4 sm:$0xff]   ;;  %v627_v60 = vld [vmem:[%s905_s1 + $0xa4] ss:$8 sps:$4 sm:$0xff]  }
   0xd   :  { %v40_v38 = vrot.slane %v39_v33, 2  ;;  %v46_v40 = vadd.f32 %v45_v35, %v44_v27  ;;  %v652_v58 = vld [vmem:[%s907_s3 + $0x18] sm:$0xff]   ;;  %v653_v62 = vld [vmem:[%s907_s3 + $0x60] sm:$0xff]  }
   0xe   :  { %v54_v43 = vrot.slane %v53_v36, 2  ;;  %v33_v47 = vrot.slane %v32_v39, 2  ;;  %v629_v63 = vld [vmem:[%s905_s1 + $0xa0] ss:$8 sps:$4 sm:$0xff]   ;;  %v630_v6 = vld [vmem:[%s905_s1 + $0xb4] ss:$8 sps:$4 sm:$0xff]  }
   0xf   :  { %292 = vmatpush1.bf16.msra.mxu0 %v608_v7  ;;  %v41_v46 = vadd.f32 %v40_v38, %v39_v33  ;;  %v47_v48 = vrot.slane %v46_v40, 2  ;;  %577 = vmatpush3.bf16.msra.mxu1 %v648_v41  ;;  %v654_v4 = vld [vmem:[%s907_s3 + $0x20] sm:$0xff]  }
  0x10   :  { %293 = vmatprep.subr.bf16.mxu0 %v609_v8  ;;  %v55_v50 = vadd.f32 %v54_v43, %v53_v36  ;;  %578 = vmatprep.subr.bf16.mxu1 %v649_v44  ;;  %v34_v54 = vadd.f32 %v33_v47, %v32_v39  ;;  %v655_v8 = vld [vmem:[%s907_s3 + $0x68] sm:$0xff]  }
  0x11   :  { %v42_v51 = vrot.slane %v41_v46, 1  ;;  %v48_v57 = vadd.f32 %v47_v48, %v46_v40 }
  0x12   :  { %v56_v53 = vrot.slane %v55_v50, 1  ;;  %v35_v1 = vrot.slane %v34_v54, 1 }
  0x13   :  { %294 = vmatpush1.bf16.msra.mxu0 %v611_v9  ;;  %v43_v56 = vadd.f32 %v42_v51, %v41_v46  ;;  %579 = vmatpush3.bf16.msra.mxu1 %v650_v49  ;;  %v49_v3 = vrot.slane %v48_v57, 1 }
  0x14   :  { %295 = vmatprep.subr.bf16.mxu0 %v612_v10  ;;  %v57_v59 = vadd.f32 %v56_v53, %v55_v50  ;;  %580 = vmatprep.subr.bf16.mxu1 %v651_v52 }
  0x15   :  { %v59_v61 = vmul.f32 0.0625, %v43_v56 }
  0x16   :  { %v61_v0 = vmul.f32 0.0625, %v57_v59 }
  0x17   :  { %296 = vmatpush1.bf16.msra.mxu0 %v614_v11  ;;  %v63_v2 = vpack.c.bf16 %v59_v61, %v59_v61  ;;  %581 = vmatpush3.bf16.msra.mxu1 %v652_v58 }
  0x18   :  { %297 = vmatprep.subr.bf16.mxu0 %v615_v12  ;;  %v65_v5 = vpack.c.bf16 %v61_v0, %v61_v0  ;;  %582 = vmatprep.subr.bf16.mxu1 %v653_v62 }
  0x19   :  { %v115_v7 = vunpack.c.l.b16 %v63_v2 }
  0x1b   :  { %298 = vmatpush1.bf16.msra.mxu0 %v617_v13 }
  0x1c   :  { %299 = vmatprep.subr.bf16.mxu0 %v618_v16 }
  0x1f   :  { %300 = vmatpush1.bf16.msra.mxu0 %v620_v29 }
  0x20   :  { %301 = vmatprep.subr.bf16.mxu0 %v621_v32 }
  0x23   :  { %302 = vmatpush1.bf16.msra.mxu0 %v623_v42 }
  0x24   :  { %303 = vmatprep.subr.bf16.mxu0 %v624_v45 }
  0x27   :  { %304 = vmatpush1.bf16.msra.mxu0 %v626_v55 }
  0x28   :  { %305 = vmatprep.subr.bf16.mxu0 %v627_v60 }
  0x29   :  { %10 = vsyncpa [#allocation3], 0  ;;  %v117_v9 = vunpack.c.l.b16 %v65_v5  ;;  %v632_v10 = vld [vmem:[%s905_s1 + $0xb0] ss:$8 sps:$4 sm:$0xff]   ;;  %v36_v12 = vadd.f32 %v35_v1, %v34_v54  ;;  %v50_v13 = vadd.f32 %v49_v3, %v48_v57  ;;  %583 = vmatpush3.bf16.msra.mxu1 %v654_v4  ;;  %v656_v14 = vld [vmem:[%s907_s3 + $0x28] sm:$0xff]   ;;  %v100_v36 = vlaneseq  ;;  %s685_s28 = smov [#allocation2]  }
  0x2a   :  { %v633_v15 = vld [vmem:[%s905_s1 + $0xc4] ss:$8 sps:$4 sm:$0xff]   ;;  %584 = vmatprep.subr.bf16.mxu1 %v655_v8  ;;  %v635_v17 = vld [vmem:[%s905_s1 + $0xc0] ss:$8 sps:$4 sm:$0xff]   ;;  %v636_v20 = vld [vmem:[%s905_s1 + $0xd4] ss:$8 sps:$4 sm:$0xff]  }
  0x2b   :  { %306 = vmatpush1.bf16.msra.mxu0 %v629_v63  ;;  %v120_v11 = vsel %vm118_vm0, %v117_v9, %v115_v7  ;;  %v58_v18 = vmul.f32 0.0625, %v36_v12  ;;  %v60_v19 = vmul.f32 0.0625, %v50_v13  ;;  %v638_v21 = vld [vmem:[%s905_s1 + $0xd0] ss:$8 sps:$4 sm:$0xff]   ;;  %v639_v24 = vld [vmem:[%s905_s1 + $0xe4] ss:$8 sps:$4 sm:$0xff]  }
  0x2c   :  { %307 = vmatprep.subr.bf16.mxu0 %v630_v6  ;;  %v122_v16 = vpack.c.b16 %v120_v11, %v120_v11  ;;  %v641_v25 = vld [vmem:[%s905_s1 + $0xe0] ss:$8 sps:$4 sm:$0xff]   ;;  %v642_v28 = vld [vmem:[%s905_s1 + $0xf4] ss:$8 sps:$4 sm:$0xff]   ;;  %v644_v29 = vld [vmem:[%s905_s1 + $0xf0] ss:$8 sps:$4 sm:$0xff]  }
  0x2d   :  { %585 = vmatpush3.bf16.msra.mxu1 %v656_v14  ;;  %v62_v22 = vpack.c.bf16 %v58_v18, %v58_v18  ;;  %v64_v23 = vpack.c.bf16 %v60_v19, %v60_v19  ;;  %v657_v32 = vld [vmem:[%s907_s3 + $0x70] sm:$0xff]   ;;  %v659_v34 = vld [vmem:[%s907_s3 + $0x78] sm:$0xff]   ;;  %v101_v37 = vshrl.u32 %v100_v36, 7  ;;  %v98_v39 = vld [vmem:[%s906_s2] sm:$0x3]  ;;  %s517_s29 = sshll.u32 %s685_s28, 4  ;;  %s518_s29 = int_to_ptr.vmem [resolvable:$true] %s517_s29 }
  0x2e   :  { %317 = vmatprep.mubr.bf16.mxu0 %v122_v16  ;;  %v658_v33 = vld [vmem:[%s907_s3 + $0x30] sm:$0xff]   ;;  %586 = vmatprep.subr.bf16.mxu1 %v657_v32  ;;  %v660_v35 = vld [vmem:[%s907_s3 + $0x38] sm:$0xff]   ;;  %v557_v56 = vld [vmem:[%s908_s4] ss:$0 sm:$0xff]  ;;  %vm509_vm3 = vcmask 25600   ;;  %s661_s30 = scalar_lea.vmem %s518_s29, 32  ;;  %p666_p1 = scmp.lt.s32.totalorder %s518_s29, %s518_s29 }
  0x2f   :  { %308 = vmatpush1.bf16.msra.mxu0 %v632_v10  ;;  %v114_v26 = vunpack.c.l.b16 %v62_v22  ;;  %v116_v27 = vunpack.c.l.b16 %v64_v23  ;;  %v102_v38 = vsub.s32 0, %v101_v37  ;;  %v106_v40 = vsub.s32 1, %v101_v37  ;;  %p662_p0 = scmp.ne.s32.totalorder %s518_s29, %s661_s30  ;;  %p667_p2 = scmp.lt.s32.totalorder %s661_s30, %s661_s30 }
  0x30   :  { %309 = vmatprep.subr.bf16.mxu0 %v633_v15 }
  0x31   :  { %v119_v30 = vsel %vm118_vm0, %v116_v27, %v114_v26  ;;  %587 = vmatpush3.bf16.msra.mxu1 %v658_v33  ;;  %v103_v41 = vrot.slane %v98_v39, %v102_v38  ;;  %v107_v42 = vrot.slane %v98_v39, %v106_v40  ;;  %p668_p3 = por %p667_p2, %p666_p1 }
  0x32   :  { %v121_v31 = vpack.c.b16 %v119_v30, %v119_v30  ;;  %588 = vmatprep.subr.bf16.mxu1 %v659_v34 }
  0x33   :  { %310 = vmatpush1.bf16.msra.mxu0 %v635_v17  ;;  %p669_p4 = pnand %p668_p3, %p662_p0 }
  0x34   :  { %311 = vmatprep.subr.bf16.mxu0 %v636_v20 }
  0x35   :  { %589 = vmatpush3.bf16.msra.mxu1 %v660_v35 }
  0x37   :  { %312 = vmatpush1.bf16.msra.mxu0 %v638_v21 }
  0x38   :  { %313 = vmatprep.subr.bf16.mxu0 %v639_v24 }
  0x3b   :  { %314 = vmatpush1.bf16.msra.mxu0 %v641_v25 }
  0x3c   :  { %315 = vmatprep.subr.bf16.mxu0 %v642_v28 }
  0x3f   :  { %316 = vmatpush1.bf16.msra.mxu0 %v644_v29 }
  0x42   :  { %318 = vmatmul.mubr.bf16.vlgmr.msra.gmra.mrb[0].mxu0 %v121_v31 }
 0x115   :  { %v319_v43 = vpop.f32.mrb[0].mxu0 }
 0x116   :  { %v320_v44 = vadd.f32 %v319_v43, %v103_v41  ;;  %v321_v45 = vpop.f32.mrb[1].mxu0 }
 0x117   :  { %v322_v46 = vadd.f32 %v321_v45, %v107_v42  ;;  %v323_v47 = vpop.f32.mrb[2].mxu0 }
 0x118   :  { %vm326_vm1 = vcmp.ge.f32.partialorder %v320_v44, 0.0  ;;  %v328_v48 = vmul.f32 0.01, %v320_v44  ;;  %v324_v49 = vpop.f32.mrb[3].mxu0 }
 0x119   :  { %vm327_vm2 = vcmp.ge.f32.partialorder %v322_v46, 0.0  ;;  %v329_v50 = vmul.f32 0.01, %v322_v46 }
 0x11a   :  { %v330_v51 = vsel %vm326_vm1, %v320_v44, %v328_v48 }
 0x11b   :  { %v331_v52 = vsel %vm327_vm2, %v322_v46, %v329_v50  ;;  %v332_v54 = vpack.c.bf16 %v330_v51, %v330_v51 }
 0x11c   :  { %v333_v53 = vpack.c.bf16 %v331_v52, %v331_v52 }
 0x11e   :  { %501 = vmatprep.mubr.bf16.mxu1 %v333_v53 }
 0x11f   :  { %502 = vmatmul.mubr.bf16.vlgmr.msra.gmra.mrb[0].mxu1 %v332_v54 }
 0x1f2   :  { %v590_v55 = vpop.f32.mrb[0].mxu1 }
 0x1f3   :  { %v591_v57 = vpop.f32.mrb[1].mxu1 }
 0x1f4   :  { %v592_v58 = vadd.f32 %v591_v57, %v590_v55  ;;  %v593_v59 = vpop.f32.mrb[2].mxu1 }
 0x1f5   :  { %v594_v60 = vpop.f32.mrb[3].mxu1 }
 0x1f6   :  { %v504_v61 = vadd.f32 %v592_v58, %v557_v56 }
 0x1f8   :  { %510 = vst.msk [vmem:[#allocation2] sm:$0x3] %vm509_vm3, %v504_v61 }
 0x1f9   :  { %672 = shalt.err (!%p669_p4)
}
 0x1fa   :  { %s673_s4 = scalar_lea.hbm %s909_s5, 32 }
 0x1fb   :  { %p674_p5 = scmp.ne.s32.totalorder %s909_s5, %s673_s4  ;;  %p677_p6 = scmp.lt.u32.totalorder %s673_s4, %s909_s5 }
 0x1fd   :  { %p679_p7 = pnand %p677_p6, %p674_p5 }
 0x1ff   :  { %682 = shalt.err (!%p679_p7)
}
 0x200   :  { %520 = dma.vmem_to_hbm [thread:$0]  %s518_s29, 32, %s909_s5, [#allocation3]  }
 0x201   :  { %683 = dma.done.wait [#allocation3], 32  }
 0x202   :  { %684 = vsyncadd [#allocation3], 4294967264 }
 0x203   :  { %524 = vsyncpa [#allocation3], 1 }

</bundles_post_ra>
